<compile_context>
chip_gen: v7x
topology: tpu7x:2x2x1
jax: 0.10.0
libtpu: 0.0.40
codegen_flags: <defaults>
</compile_context>

<pallas_src>
import functools

import jax
import jax.numpy as jnp
from jax.experimental import pallas as pl
from jax.experimental.pallas import tpu as pltpu


# ------------------------------ Pallas kernel ------------------------------ #

def _lga_kernel(x_ref, wq_ref, wk_ref, wv_ref, bq_ref, bk_ref, bv_ref,
                wp_ref, bp_ref, o_ref, *, num_heads, win_tokens, scale):
    """Fused QKV + windowed MHSA + output projection for one tile of windows.

    x_ref : (TG*S, C)      flattened tokens of TG windows (S = ws*ws each)
    wq/wk/wv : (H, C, hd)  per-head projection weights
    bq/bk/bv : (H, 1, hd)  per-head projection biases
    wp : (H, hd, C)        output projection, split along its input (head) rows
    bp : (1, C)            output projection bias
    o  : (TG*S, C)
    """
    rows, C = x_ref.shape
    tg = rows // win_tokens
    hd = C // num_heads

    x = x_ref[...].astype(jnp.float32)
    acc = jnp.zeros((rows, C), jnp.float32)

    for h in range(num_heads):                      # static unroll, small H
        q = (jnp.dot(x, wq_ref[h], preferred_element_type=jnp.float32)
             + bq_ref[h]) * scale
        k = jnp.dot(x, wk_ref[h], preferred_element_type=jnp.float32) + bk_ref[h]
        v = jnp.dot(x, wv_ref[h], preferred_element_type=jnp.float32) + bv_ref[h]

        q3 = q.reshape(tg, win_tokens, hd)
        k3 = k.reshape(tg, win_tokens, hd)
        v3 = v.reshape(tg, win_tokens, hd)

        # attention within each window, batched over the tg windows of the tile
        a = jnp.einsum('gqd,gkd->gqk', q3, k3, preferred_element_type=jnp.float32)
        a = a - jnp.max(a, axis=-1, keepdims=True)
        e = jnp.exp(a)
        p = e / jnp.sum(e, axis=-1, keepdims=True)
        oh = jnp.einsum('gqk,gkd->gqd', p, v3, preferred_element_type=jnp.float32)

        # accumulate this head's contribution to the output projection
        acc = acc + jnp.dot(oh.reshape(rows, hd), wp_ref[h],
                            preferred_element_type=jnp.float32)

    o_ref[...] = (acc + bp_ref[...]).astype(o_ref.dtype)


# ------------------------------- JAX wrapper -------------------------------- #

def locally_grouped_attn_forward(x, size, params, *, num_heads, ws,
                                 block_windows=None):
    """LocallyGroupedAttn forward. x: (B, N, C), size=(H, W), N == H*W."""
    assert ws != 1
    wqkv, bqkv, wproj, bproj = params
    B, N, C = x.shape
    H, W = size
    assert N == H * W and C % num_heads == 0
    hd = C // num_heads
    S = ws * ws
    scale = float(hd) ** -0.5

    # --- pad + window partition (layout glue, stays in XLA) ---
    pad_r = (ws - W % ws) % ws
    pad_b = (ws - H % ws) % ws
    xi = x.reshape(B, H, W, C)
    if pad_r or pad_b:
        xi = jnp.pad(xi, ((0, 0), (0, pad_b), (0, pad_r), (0, 0)))
    Hp, Wp = H + pad_b, W + pad_r
    hh, ww = Hp // ws, Wp // ws
    G = B * hh * ww
    xw = (xi.reshape(B, hh, ws, ww, ws, C)
            .transpose(0, 1, 3, 2, 4, 5)
            .reshape(G, S, C))

    # --- per-head weight split (tiny, done once; kernel sees lane-dense ops) ---
    wq3 = wqkv.reshape(C, 3, num_heads, hd)
    wq = jnp.transpose(wq3[:, 0], (1, 0, 2))       # (H, C, hd)
    wk = jnp.transpose(wq3[:, 1], (1, 0, 2))
    wv = jnp.transpose(wq3[:, 2], (1, 0, 2))
    bq3 = bqkv.reshape(3, num_heads, 1, hd)
    bq, bk, bv = bq3[0], bq3[1], bq3[2]            # (H, 1, hd)
    wp = wproj.reshape(num_heads, hd, C)           # (H, hd, C)
    bp = bproj.reshape(1, C)

    # --- tiling over windows ---
    if block_windows is None:
        block_windows = max(1, min(G, max(1, 512 // S)))   # ~512 token rows/tile
    tg = int(block_windows)
    num_blocks = -(-G // tg)
    Gp = num_blocks * tg
    if Gp != G:
        xw = jnp.pad(xw, ((0, Gp - G), (0, 0), (0, 0)))
    rows = tg * S
    x2 = xw.reshape(Gp * S, C)

    kernel = functools.partial(_lga_kernel, num_heads=num_heads,
                               win_tokens=S, scale=scale)
    rep2 = lambda g: (0, 0)
    rep3 = lambda g: (0, 0, 0)

    y2 = pl.pallas_call(
        kernel,
        grid=(num_blocks,),
        in_specs=[
            pl.BlockSpec((rows, C), lambda g: (g, 0)),
            pl.BlockSpec((num_heads, C, hd), rep3),
            pl.BlockSpec((num_heads, C, hd), rep3),
            pl.BlockSpec((num_heads, C, hd), rep3),
            pl.BlockSpec((num_heads, 1, hd), rep3),
            pl.BlockSpec((num_heads, 1, hd), rep3),
            pl.BlockSpec((num_heads, 1, hd), rep3),
            pl.BlockSpec((num_heads, hd, C), rep3),
            pl.BlockSpec((1, C), rep2),
        ],
        out_specs=pl.BlockSpec((rows, C), lambda g: (g, 0)),
        out_shape=jax.ShapeDtypeStruct((Gp * S, C), x.dtype),
        compiler_params=pltpu.CompilerParams(
            dimension_semantics=("parallel",),
            vmem_limit_bytes=32 * 1024 * 1024),
    )(x2, wq, wk, wv, bq, bk, bv, wp, bp)

    # --- window un-partition + crop (layout glue) ---
    y = (y2.reshape(Gp, S, C)[:G]
           .reshape(B, hh, ww, ws, ws, C)
           .transpose(0, 1, 3, 2, 4, 5)
           .reshape(B, Hp, Wp, C)[:, :H, :W, :]
           .reshape(B, N, C))
    return y


# --------------------------- pure-JAX reference ----------------------------- #

def lga_reference(x, size, params, *, num_heads, ws):
    """Direct transcription of the PyTorch forward (dropout p=0)."""
    wqkv, bqkv, wproj, bproj = params
    B, N, C = x.shape
    H, W = size
    hd = C // num_heads
    scale = float(hd) ** -0.5
    pad_r = (ws - W % ws) % ws
    pad_b = (ws - H % ws) % ws
    xi = jnp.pad(x.reshape(B, H, W, C),
                 ((0, 0), (0, pad_b), (0, pad_r), (0, 0)))
    Hp, Wp = H + pad_b, W + pad_r
    hh, ww = Hp // ws, Wp // ws
    xw = xi.reshape(B, hh, ws, ww, ws, C).transpose(0, 1, 3, 2, 4, 5)
    qkv = xw @ wqkv + bqkv                                   # (..., 3C)
    qkv = (qkv.reshape(B, hh * ww, ws * ws, 3, num_heads, hd)
              .transpose(3, 0, 1, 4, 2, 5))
    q, k, v = qkv[0], qkv[1], qkv[2]                         # (B, G, H, S, hd)
    attn = (q @ jnp.swapaxes(k, -2, -1)) * scale
    attn = jax.nn.softmax(attn, axis=-1)
    o = (attn @ v).transpose(0, 1, 3, 2, 4).reshape(B, hh, ww, ws, ws, C)
    y = o.transpose(0, 1, 3, 2, 4, 5).reshape(B, hh * ws, ww * ws, C)
    y = y[:, :H, :W, :].reshape(B, N, C)
    return y @ wproj + bproj


# -------------------------- deterministic params ---------------------------- #

def init_lga_params(key, dim):
    k1, k2, k3, k4 = jax.random.split(key, 4)
    s = dim ** -0.5
    wqkv = jax.random.normal(k1, (dim, 3 * dim), jnp.float32) * s
    bqkv = jax.random.normal(k2, (3 * dim,), jnp.float32) * 0.02
    wproj = jax.random.normal(k3, (dim, dim), jnp.float32) * s
    bproj = jax.random.normal(k4, (dim,), jnp.float32) * 0.02
    return wqkv, bqkv, wproj, bproj


# ------------------------------------ main ----------------------------------- #

if __name__ == "__main__":
    key = jax.random.PRNGKey(0)
    kx1, kp1, kx2, kp2 = jax.random.split(key, 4)

    # Config 1: no spatial padding, multi-step pipelined grid (4 tiles).
    B, H, W, C, num_heads, ws = 2, 16, 16, 32, 4, 4
    x1 = jax.random.normal(kx1, (B, H * W, C), jnp.float32)
    params1 = init_lga_params(kp1, C)
    out1 = locally_grouped_attn_forward(x1, (H, W), params1,
                                        num_heads=num_heads, ws=ws,
                                        block_windows=8)
    jax.block_until_ready(out1)
    ref1 = lga_reference(x1, (H, W), params1, num_heads=num_heads, ws=ws)
    assert out1.shape == (B, H * W, C), out1.shape
    assert bool(jnp.all(jnp.isfinite(out1)))
    assert float(jnp.max(jnp.abs(out1 - ref1))) < 5e-2

    # Config 2: exercises spatial padding (H,W not multiples of ws) and the
    # pad-to-tile path on the window axis.
    B2, H2, W2, C2, nh2, ws2 = 1, 13, 10, 32, 4, 4
    x2 = jax.random.normal(kx2, (B2, H2 * W2, C2), jnp.float32)
    params2 = init_lga_params(kp2, C2)
    out2 = locally_grouped_attn_forward(x2, (H2, W2), params2,
                                        num_heads=nh2, ws=ws2,
                                        block_windows=5)
    jax.block_until_ready(out2)
    ref2 = lga_reference(x2, (H2, W2), params2, num_heads=nh2, ws=ws2)
    assert out2.shape == (B2, H2 * W2, C2), out2.shape
    assert bool(jnp.all(jnp.isfinite(out2)))
    assert float(jnp.max(jnp.abs(out2 - ref2))) < 5e-2

    print("KERNEL_OK")
</pallas_src>

<mosaic_0001>
module attributes {stable_mosaic.version = 11 : i64} {
  func.func @_lga_kernel(%arg0: i32, %arg1: memref<128x32xf32, #tpu.memory_space<vmem>>, %arg2: memref<4x32x8xf32, #tpu.memory_space<vmem>>, %arg3: memref<4x32x8xf32, #tpu.memory_space<vmem>>, %arg4: memref<4x32x8xf32, #tpu.memory_space<vmem>>, %arg5: memref<4x1x8xf32, #tpu.memory_space<vmem>>, %arg6: memref<4x1x8xf32, #tpu.memory_space<vmem>>, %arg7: memref<4x1x8xf32, #tpu.memory_space<vmem>>, %arg8: memref<4x8x32xf32, #tpu.memory_space<vmem>>, %arg9: memref<1x32xf32, #tpu.memory_space<vmem>>, %arg10: memref<128x32xf32, #tpu.memory_space<vmem>>) attributes {dimension_semantics = [#tpu.dimension_semantics<parallel>], iteration_bounds = array<i64: 4>, scalar_prefetch = 0 : i64, scratch_operands = 0 : i64, tpu.core_type = #tpu.core_type<tc>, window_params = [{transform_indices = @transform_0, window_bounds = array<i64: 128, 32>}, {pipeline_mode = #tpu.pipeline_mode<synchronous>, transform_indices = @transform_1, window_bounds = array<i64: 4, 32, 8>}, {pipeline_mode = #tpu.pipeline_mode<synchronous>, transform_indices = @transform_2, window_bounds = array<i64: 4, 32, 8>}, {pipeline_mode = #tpu.pipeline_mode<synchronous>, transform_indices = @transform_3, window_bounds = array<i64: 4, 32, 8>}, {pipeline_mode = #tpu.pipeline_mode<synchronous>, transform_indices = @transform_4, window_bounds = array<i64: 4, 1, 8>}, {pipeline_mode = #tpu.pipeline_mode<synchronous>, transform_indices = @transform_5, window_bounds = array<i64: 4, 1, 8>}, {pipeline_mode = #tpu.pipeline_mode<synchronous>, transform_indices = @transform_6, window_bounds = array<i64: 4, 1, 8>}, {pipeline_mode = #tpu.pipeline_mode<synchronous>, transform_indices = @transform_7, window_bounds = array<i64: 4, 8, 32>}, {pipeline_mode = #tpu.pipeline_mode<synchronous>, transform_indices = @transform_8, window_bounds = array<i64: 1, 32>}, {transform_indices = @transform_9, window_bounds = array<i64: 128, 32>}]} {
    %c0 = arith.constant 0 : index
    %c0_0 = arith.constant 0 : index
    %0 = vector.load %arg1[%c0, %c0_0] : memref<128x32xf32, #tpu.memory_space<vmem>>, vector<128x32xf32>
    %cst = arith.constant 0.000000e+00 : f32
    %1 = vector.broadcast %cst : f32 to vector<128x32xf32>
    %c0_1 = arith.constant 0 : index
    %c0_2 = arith.constant 0 : index
    %c0_3 = arith.constant 0 : index
    %2 = vector.load %arg2[%c0_1, %c0_2, %c0_3] : memref<4x32x8xf32, #tpu.memory_space<vmem>>, vector<1x32x8xf32>
    %3 = vector.shape_cast %2 : vector<1x32x8xf32> to vector<32x8xf32>
    %cst_4 = arith.constant dense<0.000000e+00> : vector<128x8xf32>
    %4 = tpu.matmul %0, %3, %cst_4 {dimension_numbers = #tpu.dot_dimension_numbers<[1], [0], [0], [1], [0, 0, 1, 1], [], []>} : vector<128x32xf32>, vector<32x8xf32>, vector<128x8xf32> -> vector<128x8xf32>
    %c0_5 = arith.constant 0 : index
    %c0_6 = arith.constant 0 : index
    %c0_7 = arith.constant 0 : index
    %5 = vector.load %arg5[%c0_5, %c0_6, %c0_7] : memref<4x1x8xf32, #tpu.memory_space<vmem>>, vector<1x1x8xf32>
    %6 = vector.shape_cast %5 : vector<1x1x8xf32> to vector<1x8xf32>
    %7 = vector.broadcast %6 : vector<1x8xf32> to vector<128x8xf32>
    %8 = arith.addf %4, %7 : vector<128x8xf32>
    %cst_8 = arith.constant 0.353553385 : f32
    %9 = vector.broadcast %cst_8 : f32 to vector<128x8xf32>
    %10 = arith.mulf %8, %9 : vector<128x8xf32>
    %c0_9 = arith.constant 0 : index
    %c0_10 = arith.constant 0 : index
    %c0_11 = arith.constant 0 : index
    %11 = vector.load %arg3[%c0_9, %c0_10, %c0_11] : memref<4x32x8xf32, #tpu.memory_space<vmem>>, vector<1x32x8xf32>
    %12 = vector.shape_cast %11 : vector<1x32x8xf32> to vector<32x8xf32>
    %cst_12 = arith.constant dense<0.000000e+00> : vector<128x8xf32>
    %13 = tpu.matmul %0, %12, %cst_12 {dimension_numbers = #tpu.dot_dimension_numbers<[1], [0], [0], [1], [0, 0, 1, 1], [], []>} : vector<128x32xf32>, vector<32x8xf32>, vector<128x8xf32> -> vector<128x8xf32>
    %c0_13 = arith.constant 0 : index
    %c0_14 = arith.constant 0 : index
    %c0_15 = arith.constant 0 : index
    %14 = vector.load %arg6[%c0_13, %c0_14, %c0_15] : memref<4x1x8xf32, #tpu.memory_space<vmem>>, vector<1x1x8xf32>
    %15 = vector.shape_cast %14 : vector<1x1x8xf32> to vector<1x8xf32>
    %16 = vector.broadcast %15 : vector<1x8xf32> to vector<128x8xf32>
    %17 = arith.addf %13, %16 : vector<128x8xf32>
    %c0_16 = arith.constant 0 : index
    %c0_17 = arith.constant 0 : index
    %c0_18 = arith.constant 0 : index
    %18 = vector.load %arg4[%c0_16, %c0_17, %c0_18] : memref<4x32x8xf32, #tpu.memory_space<vmem>>, vector<1x32x8xf32>
    %19 = vector.shape_cast %18 : vector<1x32x8xf32> to vector<32x8xf32>
    %cst_19 = arith.constant dense<0.000000e+00> : vector<128x8xf32>
    %20 = tpu.matmul %0, %19, %cst_19 {dimension_numbers = #tpu.dot_dimension_numbers<[1], [0], [0], [1], [0, 0, 1, 1], [], []>} : vector<128x32xf32>, vector<32x8xf32>, vector<128x8xf32> -> vector<128x8xf32>
    %c0_20 = arith.constant 0 : index
    %c0_21 = arith.constant 0 : index
    %c0_22 = arith.constant 0 : index
    %21 = vector.load %arg7[%c0_20, %c0_21, %c0_22] : memref<4x1x8xf32, #tpu.memory_space<vmem>>, vector<1x1x8xf32>
    %22 = vector.shape_cast %21 : vector<1x1x8xf32> to vector<1x8xf32>
    %23 = vector.broadcast %22 : vector<1x8xf32> to vector<128x8xf32>
    %24 = arith.addf %20, %23 : vector<128x8xf32>
    %25 = vector.shape_cast %10 : vector<128x8xf32> to vector<8x16x8xf32>
    %26 = vector.shape_cast %17 : vector<128x8xf32> to vector<8x16x8xf32>
    %27 = vector.shape_cast %24 : vector<128x8xf32> to vector<8x16x8xf32>
    "tpu.trace_start"() <{level = 10 : i32, message = "gqd,gkd->gqk"}> : () -> ()
    %cst_23 = arith.constant dense<0.000000e+00> : vector<8x16x16xf32>
    %28 = tpu.matmul %25, %26, %cst_23 {dimension_numbers = #tpu.dot_dimension_numbers<[2], [2], [1], [1], [0, 0, 0, 1, 1, 1], [0], [0]>} : vector<8x16x8xf32>, vector<8x16x8xf32>, vector<8x16x16xf32> -> vector<8x16x16xf32>
    "tpu.trace_stop"() : () -> ()
    %cst_24 = arith.constant dense<0xFF800000> : vector<8x16xf32>
    %29 = vector.multi_reduction <maximumf>, %28, %cst_24 [2] : vector<8x16x16xf32> to vector<8x16xf32>
    %30 = vector.shape_cast %29 : vector<8x16xf32> to vector<8x16x1xf32>
    %31 = vector.broadcast %30 : vector<8x16x1xf32> to vector<8x16x16xf32>
    %32 = arith.subf %28, %31 : vector<8x16x16xf32>
    %33 = math.exp %32 : vector<8x16x16xf32>
    %cst_25 = arith.constant dense<0.000000e+00> : vector<8x16xf32>
    %34 = vector.multi_reduction <add>, %33, %cst_25 [2] : vector<8x16x16xf32> to vector<8x16xf32>
    %35 = vector.shape_cast %34 : vector<8x16xf32> to vector<8x16x1xf32>
    %36 = vector.broadcast %35 : vector<8x16x1xf32> to vector<8x16x16xf32>
    %37 = arith.divf %33, %36 : vector<8x16x16xf32>
    "tpu.trace_start"() <{level = 10 : i32, message = "gqk,gkd->gqd"}> : () -> ()
    %cst_26 = arith.constant dense<0.000000e+00> : vector<8x16x8xf32>
    %38 = tpu.matmul %37, %27, %cst_26 {dimension_numbers = #tpu.dot_dimension_numbers<[2], [1], [1], [2], [0, 0, 0, 1, 1, 2], [0], [0]>} : vector<8x16x16xf32>, vector<8x16x8xf32>, vector<8x16x8xf32> -> vector<8x16x8xf32>
    "tpu.trace_stop"() : () -> ()
    %39 = vector.shape_cast %38 : vector<8x16x8xf32> to vector<128x8xf32>
    %c0_27 = arith.constant 0 : index
    %c0_28 = arith.constant 0 : index
    %c0_29 = arith.constant 0 : index
    %40 = vector.load %arg8[%c0_27, %c0_28, %c0_29] : memref<4x8x32xf32, #tpu.memory_space<vmem>>, vector<1x8x32xf32>
    %41 = vector.shape_cast %40 : vector<1x8x32xf32> to vector<8x32xf32>
    %cst_30 = arith.constant dense<0.000000e+00> : vector<128x32xf32>
    %42 = tpu.matmul %39, %41, %cst_30 {dimension_numbers = #tpu.dot_dimension_numbers<[1], [0], [0], [1], [0, 0, 1, 1], [], []>} : vector<128x8xf32>, vector<8x32xf32>, vector<128x32xf32> -> vector<128x32xf32>
    %43 = arith.addf %1, %42 : vector<128x32xf32>
    %c1 = arith.constant 1 : index
    %c0_31 = arith.constant 0 : index
    %c0_32 = arith.constant 0 : index
    %44 = vector.load %arg2[%c1, %c0_31, %c0_32] : memref<4x32x8xf32, #tpu.memory_space<vmem>>, vector<1x32x8xf32>
    %45 = vector.shape_cast %44 : vector<1x32x8xf32> to vector<32x8xf32>
    %cst_33 = arith.constant dense<0.000000e+00> : vector<128x8xf32>
    %46 = tpu.matmul %0, %45, %cst_33 {dimension_numbers = #tpu.dot_dimension_numbers<[1], [0], [0], [1], [0, 0, 1, 1], [], []>} : vector<128x32xf32>, vector<32x8xf32>, vector<128x8xf32> -> vector<128x8xf32>
    %c1_34 = arith.constant 1 : index
    %c0_35 = arith.constant 0 : index
    %c0_36 = arith.constant 0 : index
    %47 = vector.load %arg5[%c1_34, %c0_35, %c0_36] : memref<4x1x8xf32, #tpu.memory_space<vmem>>, vector<1x1x8xf32>
    %48 = vector.shape_cast %47 : vector<1x1x8xf32> to vector<1x8xf32>
    %49 = vector.broadcast %48 : vector<1x8xf32> to vector<128x8xf32>
    %50 = arith.addf %46, %49 : vector<128x8xf32>
    %cst_37 = arith.constant 0.353553385 : f32
    %51 = vector.broadcast %cst_37 : f32 to vector<128x8xf32>
    %52 = arith.mulf %50, %51 : vector<128x8xf32>
    %c1_38 = arith.constant 1 : index
    %c0_39 = arith.constant 0 : index
    %c0_40 = arith.constant 0 : index
    %53 = vector.load %arg3[%c1_38, %c0_39, %c0_40] : memref<4x32x8xf32, #tpu.memory_space<vmem>>, vector<1x32x8xf32>
    %54 = vector.shape_cast %53 : vector<1x32x8xf32> to vector<32x8xf32>
    %cst_41 = arith.constant dense<0.000000e+00> : vector<128x8xf32>
    %55 = tpu.matmul %0, %54, %cst_41 {dimension_numbers = #tpu.dot_dimension_numbers<[1], [0], [0], [1], [0, 0, 1, 1], [], []>} : vector<128x32xf32>, vector<32x8xf32>, vector<128x8xf32> -> vector<128x8xf32>
    %c1_42 = arith.constant 1 : index
    %c0_43 = arith.constant 0 : index
    %c0_44 = arith.constant 0 : index
    %56 = vector.load %arg6[%c1_42, %c0_43, %c0_44] : memref<4x1x8xf32, #tpu.memory_space<vmem>>, vector<1x1x8xf32>
    %57 = vector.shape_cast %56 : vector<1x1x8xf32> to vector<1x8xf32>
    %58 = vector.broadcast %57 : vector<1x8xf32> to vector<128x8xf32>
    %59 = arith.addf %55, %58 : vector<128x8xf32>
    %c1_45 = arith.constant 1 : index
    %c0_46 = arith.constant 0 : index
    %c0_47 = arith.constant 0 : index
    %60 = vector.load %arg4[%c1_45, %c0_46, %c0_47] : memref<4x32x8xf32, #tpu.memory_space<vmem>>, vector<1x32x8xf32>
    %61 = vector.shape_cast %60 : vector<1x32x8xf32> to vector<32x8xf32>
    %cst_48 = arith.constant dense<0.000000e+00> : vector<128x8xf32>
    %62 = tpu.matmul %0, %61, %cst_48 {dimension_numbers = #tpu.dot_dimension_numbers<[1], [0], [0], [1], [0, 0, 1, 1], [], []>} : vector<128x32xf32>, vector<32x8xf32>, vector<128x8xf32> -> vector<128x8xf32>
    %c1_49 = arith.constant 1 : index
    %c0_50 = arith.constant 0 : index
    %c0_51 = arith.constant 0 : index
    %63 = vector.load %arg7[%c1_49, %c0_50, %c0_51] : memref<4x1x8xf32, #tpu.memory_space<vmem>>, vector<1x1x8xf32>
    %64 = vector.shape_cast %63 : vector<1x1x8xf32> to vector<1x8xf32>
    %65 = vector.broadcast %64 : vector<1x8xf32> to vector<128x8xf32>
    %66 = arith.addf %62, %65 : vector<128x8xf32>
    %67 = vector.shape_cast %52 : vector<128x8xf32> to vector<8x16x8xf32>
    %68 = vector.shape_cast %59 : vector<128x8xf32> to vector<8x16x8xf32>
    %69 = vector.shape_cast %66 : vector<128x8xf32> to vector<8x16x8xf32>
    "tpu.trace_start"() <{level = 10 : i32, message = "gqd,gkd->gqk"}> : () -> ()
    %cst_52 = arith.constant dense<0.000000e+00> : vector<8x16x16xf32>
    %70 = tpu.matmul %67, %68, %cst_52 {dimension_numbers = #tpu.dot_dimension_numbers<[2], [2], [1], [1], [0, 0, 0, 1, 1, 1], [0], [0]>} : vector<8x16x8xf32>, vector<8x16x8xf32>, vector<8x16x16xf32> -> vector<8x16x16xf32>
    "tpu.trace_stop"() : () -> ()
    %cst_53 = arith.constant dense<0xFF800000> : vector<8x16xf32>
    %71 = vector.multi_reduction <maximumf>, %70, %cst_53 [2] : vector<8x16x16xf32> to vector<8x16xf32>
    %72 = vector.shape_cast %71 : vector<8x16xf32> to vector<8x16x1xf32>
    %73 = vector.broadcast %72 : vector<8x16x1xf32> to vector<8x16x16xf32>
    %74 = arith.subf %70, %73 : vector<8x16x16xf32>
    %75 = math.exp %74 : vector<8x16x16xf32>
    %cst_54 = arith.constant dense<0.000000e+00> : vector<8x16xf32>
    %76 = vector.multi_reduction <add>, %75, %cst_54 [2] : vector<8x16x16xf32> to vector<8x16xf32>
    %77 = vector.shape_cast %76 : vector<8x16xf32> to vector<8x16x1xf32>
    %78 = vector.broadcast %77 : vector<8x16x1xf32> to vector<8x16x16xf32>
    %79 = arith.divf %75, %78 : vector<8x16x16xf32>
    "tpu.trace_start"() <{level = 10 : i32, message = "gqk,gkd->gqd"}> : () -> ()
    %cst_55 = arith.constant dense<0.000000e+00> : vector<8x16x8xf32>
    %80 = tpu.matmul %79, %69, %cst_55 {dimension_numbers = #tpu.dot_dimension_numbers<[2], [1], [1], [2], [0, 0, 0, 1, 1, 2], [0], [0]>} : vector<8x16x16xf32>, vector<8x16x8xf32>, vector<8x16x8xf32> -> vector<8x16x8xf32>
    "tpu.trace_stop"() : () -> ()
    %81 = vector.shape_cast %80 : vector<8x16x8xf32> to vector<128x8xf32>
    %c1_56 = arith.constant 1 : index
    %c0_57 = arith.constant 0 : index
    %c0_58 = arith.constant 0 : index
    %82 = vector.load %arg8[%c1_56, %c0_57, %c0_58] : memref<4x8x32xf32, #tpu.memory_space<vmem>>, vector<1x8x32xf32>
    %83 = vector.shape_cast %82 : vector<1x8x32xf32> to vector<8x32xf32>
    %cst_59 = arith.constant dense<0.000000e+00> : vector<128x32xf32>
    %84 = tpu.matmul %81, %83, %cst_59 {dimension_numbers = #tpu.dot_dimension_numbers<[1], [0], [0], [1], [0, 0, 1, 1], [], []>} : vector<128x8xf32>, vector<8x32xf32>, vector<128x32xf32> -> vector<128x32xf32>
    %85 = arith.addf %43, %84 : vector<128x32xf32>
    %c2 = arith.constant 2 : index
    %c0_60 = arith.constant 0 : index
    %c0_61 = arith.constant 0 : index
    %86 = vector.load %arg2[%c2, %c0_60, %c0_61] : memref<4x32x8xf32, #tpu.memory_space<vmem>>, vector<1x32x8xf32>
    %87 = vector.shape_cast %86 : vector<1x32x8xf32> to vector<32x8xf32>
    %cst_62 = arith.constant dense<0.000000e+00> : vector<128x8xf32>
    %88 = tpu.matmul %0, %87, %cst_62 {dimension_numbers = #tpu.dot_dimension_numbers<[1], [0], [0], [1], [0, 0, 1, 1], [], []>} : vector<128x32xf32>, vector<32x8xf32>, vector<128x8xf32> -> vector<128x8xf32>
    %c2_63 = arith.constant 2 : index
    %c0_64 = arith.constant 0 : index
    %c0_65 = arith.constant 0 : index
    %89 = vector.load %arg5[%c2_63, %c0_64, %c0_65] : memref<4x1x8xf32, #tpu.memory_space<vmem>>, vector<1x1x8xf32>
    %90 = vector.shape_cast %89 : vector<1x1x8xf32> to vector<1x8xf32>
    %91 = vector.broadcast %90 : vector<1x8xf32> to vector<128x8xf32>
    %92 = arith.addf %88, %91 : vector<128x8xf32>
    %cst_66 = arith.constant 0.353553385 : f32
    %93 = vector.broadcast %cst_66 : f32 to vector<128x8xf32>
    %94 = arith.mulf %92, %93 : vector<128x8xf32>
    %c2_67 = arith.constant 2 : index
    %c0_68 = arith.constant 0 : index
    %c0_69 = arith.constant 0 : index
    %95 = vector.load %arg3[%c2_67, %c0_68, %c0_69] : memref<4x32x8xf32, #tpu.memory_space<vmem>>, vector<1x32x8xf32>
    %96 = vector.shape_cast %95 : vector<1x32x8xf32> to vector<32x8xf32>
    %cst_70 = arith.constant dense<0.000000e+00> : vector<128x8xf32>
    %97 = tpu.matmul %0, %96, %cst_70 {dimension_numbers = #tpu.dot_dimension_numbers<[1], [0], [0], [1], [0, 0, 1, 1], [], []>} : vector<128x32xf32>, vector<32x8xf32>, vector<128x8xf32> -> vector<128x8xf32>
    %c2_71 = arith.constant 2 : index
    %c0_72 = arith.constant 0 : index
    %c0_73 = arith.constant 0 : index
    %98 = vector.load %arg6[%c2_71, %c0_72, %c0_73] : memref<4x1x8xf32, #tpu.memory_space<vmem>>, vector<1x1x8xf32>
    %99 = vector.shape_cast %98 : vector<1x1x8xf32> to vector<1x8xf32>
    %100 = vector.broadcast %99 : vector<1x8xf32> to vector<128x8xf32>
    %101 = arith.addf %97, %100 : vector<128x8xf32>
    %c2_74 = arith.constant 2 : index
    %c0_75 = arith.constant 0 : index
    %c0_76 = arith.constant 0 : index
    %102 = vector.load %arg4[%c2_74, %c0_75, %c0_76] : memref<4x32x8xf32, #tpu.memory_space<vmem>>, vector<1x32x8xf32>
    %103 = vector.shape_cast %102 : vector<1x32x8xf32> to vector<32x8xf32>
    %cst_77 = arith.constant dense<0.000000e+00> : vector<128x8xf32>
    %104 = tpu.matmul %0, %103, %cst_77 {dimension_numbers = #tpu.dot_dimension_numbers<[1], [0], [0], [1], [0, 0, 1, 1], [], []>} : vector<128x32xf32>, vector<32x8xf32>, vector<128x8xf32> -> vector<128x8xf32>
    %c2_78 = arith.constant 2 : index
    %c0_79 = arith.constant 0 : index
    %c0_80 = arith.constant 0 : index
    %105 = vector.load %arg7[%c2_78, %c0_79, %c0_80] : memref<4x1x8xf32, #tpu.memory_space<vmem>>, vector<1x1x8xf32>
    %106 = vector.shape_cast %105 : vector<1x1x8xf32> to vector<1x8xf32>
    %107 = vector.broadcast %106 : vector<1x8xf32> to vector<128x8xf32>
    %108 = arith.addf %104, %107 : vector<128x8xf32>
    %109 = vector.shape_cast %94 : vector<128x8xf32> to vector<8x16x8xf32>
    %110 = vector.shape_cast %101 : vector<128x8xf32> to vector<8x16x8xf32>
    %111 = vector.shape_cast %108 : vector<128x8xf32> to vector<8x16x8xf32>
    "tpu.trace_start"() <{level = 10 : i32, message = "gqd,gkd->gqk"}> : () -> ()
    %cst_81 = arith.constant dense<0.000000e+00> : vector<8x16x16xf32>
    %112 = tpu.matmul %109, %110, %cst_81 {dimension_numbers = #tpu.dot_dimension_numbers<[2], [2], [1], [1], [0, 0, 0, 1, 1, 1], [0], [0]>} : vector<8x16x8xf32>, vector<8x16x8xf32>, vector<8x16x16xf32> -> vector<8x16x16xf32>
    "tpu.trace_stop"() : () -> ()
    %cst_82 = arith.constant dense<0xFF800000> : vector<8x16xf32>
    %113 = vector.multi_reduction <maximumf>, %112, %cst_82 [2] : vector<8x16x16xf32> to vector<8x16xf32>
    %114 = vector.shape_cast %113 : vector<8x16xf32> to vector<8x16x1xf32>
    %115 = vector.broadcast %114 : vector<8x16x1xf32> to vector<8x16x16xf32>
    %116 = arith.subf %112, %115 : vector<8x16x16xf32>
    %117 = math.exp %116 : vector<8x16x16xf32>
    %cst_83 = arith.constant dense<0.000000e+00> : vector<8x16xf32>
    %118 = vector.multi_reduction <add>, %117, %cst_83 [2] : vector<8x16x16xf32> to vector<8x16xf32>
    %119 = vector.shape_cast %118 : vector<8x16xf32> to vector<8x16x1xf32>
    %120 = vector.broadcast %119 : vector<8x16x1xf32> to vector<8x16x16xf32>
    %121 = arith.divf %117, %120 : vector<8x16x16xf32>
    "tpu.trace_start"() <{level = 10 : i32, message = "gqk,gkd->gqd"}> : () -> ()
    %cst_84 = arith.constant dense<0.000000e+00> : vector<8x16x8xf32>
    %122 = tpu.matmul %121, %111, %cst_84 {dimension_numbers = #tpu.dot_dimension_numbers<[2], [1], [1], [2], [0, 0, 0, 1, 1, 2], [0], [0]>} : vector<8x16x16xf32>, vector<8x16x8xf32>, vector<8x16x8xf32> -> vector<8x16x8xf32>
    "tpu.trace_stop"() : () -> ()
    %123 = vector.shape_cast %122 : vector<8x16x8xf32> to vector<128x8xf32>
    %c2_85 = arith.constant 2 : index
    %c0_86 = arith.constant 0 : index
    %c0_87 = arith.constant 0 : index
    %124 = vector.load %arg8[%c2_85, %c0_86, %c0_87] : memref<4x8x32xf32, #tpu.memory_space<vmem>>, vector<1x8x32xf32>
    %125 = vector.shape_cast %124 : vector<1x8x32xf32> to vector<8x32xf32>
    %cst_88 = arith.constant dense<0.000000e+00> : vector<128x32xf32>
    %126 = tpu.matmul %123, %125, %cst_88 {dimension_numbers = #tpu.dot_dimension_numbers<[1], [0], [0], [1], [0, 0, 1, 1], [], []>} : vector<128x8xf32>, vector<8x32xf32>, vector<128x32xf32> -> vector<128x32xf32>
    %127 = arith.addf %85, %126 : vector<128x32xf32>
    %c3 = arith.constant 3 : index
    %c0_89 = arith.constant 0 : index
    %c0_90 = arith.constant 0 : index
    %128 = vector.load %arg2[%c3, %c0_89, %c0_90] : memref<4x32x8xf32, #tpu.memory_space<vmem>>, vector<1x32x8xf32>
    %129 = vector.shape_cast %128 : vector<1x32x8xf32> to vector<32x8xf32>
    %cst_91 = arith.constant dense<0.000000e+00> : vector<128x8xf32>
    %130 = tpu.matmul %0, %129, %cst_91 {dimension_numbers = #tpu.dot_dimension_numbers<[1], [0], [0], [1], [0, 0, 1, 1], [], []>} : vector<128x32xf32>, vector<32x8xf32>, vector<128x8xf32> -> vector<128x8xf32>
    %c3_92 = arith.constant 3 : index
    %c0_93 = arith.constant 0 : index
    %c0_94 = arith.constant 0 : index
    %131 = vector.load %arg5[%c3_92, %c0_93, %c0_94] : memref<4x1x8xf32, #tpu.memory_space<vmem>>, vector<1x1x8xf32>
    %132 = vector.shape_cast %131 : vector<1x1x8xf32> to vector<1x8xf32>
    %133 = vector.broadcast %132 : vector<1x8xf32> to vector<128x8xf32>
    %134 = arith.addf %130, %133 : vector<128x8xf32>
    %cst_95 = arith.constant 0.353553385 : f32
    %135 = vector.broadcast %cst_95 : f32 to vector<128x8xf32>
    %136 = arith.mulf %134, %135 : vector<128x8xf32>
    %c3_96 = arith.constant 3 : index
    %c0_97 = arith.constant 0 : index
    %c0_98 = arith.constant 0 : index
    %137 = vector.load %arg3[%c3_96, %c0_97, %c0_98] : memref<4x32x8xf32, #tpu.memory_space<vmem>>, vector<1x32x8xf32>
    %138 = vector.shape_cast %137 : vector<1x32x8xf32> to vector<32x8xf32>
    %cst_99 = arith.constant dense<0.000000e+00> : vector<128x8xf32>
    %139 = tpu.matmul %0, %138, %cst_99 {dimension_numbers = #tpu.dot_dimension_numbers<[1], [0], [0], [1], [0, 0, 1, 1], [], []>} : vector<128x32xf32>, vector<32x8xf32>, vector<128x8xf32> -> vector<128x8xf32>
    %c3_100 = arith.constant 3 : index
    %c0_101 = arith.constant 0 : index
    %c0_102 = arith.constant 0 : index
    %140 = vector.load %arg6[%c3_100, %c0_101, %c0_102] : memref<4x1x8xf32, #tpu.memory_space<vmem>>, vector<1x1x8xf32>
    %141 = vector.shape_cast %140 : vector<1x1x8xf32> to vector<1x8xf32>
    %142 = vector.broadcast %141 : vector<1x8xf32> to vector<128x8xf32>
    %143 = arith.addf %139, %142 : vector<128x8xf32>
    %c3_103 = arith.constant 3 : index
    %c0_104 = arith.constant 0 : index
    %c0_105 = arith.constant 0 : index
    %144 = vector.load %arg4[%c3_103, %c0_104, %c0_105] : memref<4x32x8xf32, #tpu.memory_space<vmem>>, vector<1x32x8xf32>
    %145 = vector.shape_cast %144 : vector<1x32x8xf32> to vector<32x8xf32>
    %cst_106 = arith.constant dense<0.000000e+00> : vector<128x8xf32>
    %146 = tpu.matmul %0, %145, %cst_106 {dimension_numbers = #tpu.dot_dimension_numbers<[1], [0], [0], [1], [0, 0, 1, 1], [], []>} : vector<128x32xf32>, vector<32x8xf32>, vector<128x8xf32> -> vector<128x8xf32>
    %c3_107 = arith.constant 3 : index
    %c0_108 = arith.constant 0 : index
    %c0_109 = arith.constant 0 : index
    %147 = vector.load %arg7[%c3_107, %c0_108, %c0_109] : memref<4x1x8xf32, #tpu.memory_space<vmem>>, vector<1x1x8xf32>
    %148 = vector.shape_cast %147 : vector<1x1x8xf32> to vector<1x8xf32>
    %149 = vector.broadcast %148 : vector<1x8xf32> to vector<128x8xf32>
    %150 = arith.addf %146, %149 : vector<128x8xf32>
    %151 = vector.shape_cast %136 : vector<128x8xf32> to vector<8x16x8xf32>
    %152 = vector.shape_cast %143 : vector<128x8xf32> to vector<8x16x8xf32>
    %153 = vector.shape_cast %150 : vector<128x8xf32> to vector<8x16x8xf32>
    "tpu.trace_start"() <{level = 10 : i32, message = "gqd,gkd->gqk"}> : () -> ()
    %cst_110 = arith.constant dense<0.000000e+00> : vector<8x16x16xf32>
    %154 = tpu.matmul %151, %152, %cst_110 {dimension_numbers = #tpu.dot_dimension_numbers<[2], [2], [1], [1], [0, 0, 0, 1, 1, 1], [0], [0]>} : vector<8x16x8xf32>, vector<8x16x8xf32>, vector<8x16x16xf32> -> vector<8x16x16xf32>
    "tpu.trace_stop"() : () -> ()
    %cst_111 = arith.constant dense<0xFF800000> : vector<8x16xf32>
    %155 = vector.multi_reduction <maximumf>, %154, %cst_111 [2] : vector<8x16x16xf32> to vector<8x16xf32>
    %156 = vector.shape_cast %155 : vector<8x16xf32> to vector<8x16x1xf32>
    %157 = vector.broadcast %156 : vector<8x16x1xf32> to vector<8x16x16xf32>
    %158 = arith.subf %154, %157 : vector<8x16x16xf32>
    %159 = math.exp %158 : vector<8x16x16xf32>
    %cst_112 = arith.constant dense<0.000000e+00> : vector<8x16xf32>
    %160 = vector.multi_reduction <add>, %159, %cst_112 [2] : vector<8x16x16xf32> to vector<8x16xf32>
    %161 = vector.shape_cast %160 : vector<8x16xf32> to vector<8x16x1xf32>
    %162 = vector.broadcast %161 : vector<8x16x1xf32> to vector<8x16x16xf32>
    %163 = arith.divf %159, %162 : vector<8x16x16xf32>
    "tpu.trace_start"() <{level = 10 : i32, message = "gqk,gkd->gqd"}> : () -> ()
    %cst_113 = arith.constant dense<0.000000e+00> : vector<8x16x8xf32>
    %164 = tpu.matmul %163, %153, %cst_113 {dimension_numbers = #tpu.dot_dimension_numbers<[2], [1], [1], [2], [0, 0, 0, 1, 1, 2], [0], [0]>} : vector<8x16x16xf32>, vector<8x16x8xf32>, vector<8x16x8xf32> -> vector<8x16x8xf32>
    "tpu.trace_stop"() : () -> ()
    %165 = vector.shape_cast %164 : vector<8x16x8xf32> to vector<128x8xf32>
    %c3_114 = arith.constant 3 : index
    %c0_115 = arith.constant 0 : index
    %c0_116 = arith.constant 0 : index
    %166 = vector.load %arg8[%c3_114, %c0_115, %c0_116] : memref<4x8x32xf32, #tpu.memory_space<vmem>>, vector<1x8x32xf32>
    %167 = vector.shape_cast %166 : vector<1x8x32xf32> to vector<8x32xf32>
    %cst_117 = arith.constant dense<0.000000e+00> : vector<128x32xf32>
    %168 = tpu.matmul %165, %167, %cst_117 {dimension_numbers = #tpu.dot_dimension_numbers<[1], [0], [0], [1], [0, 0, 1, 1], [], []>} : vector<128x8xf32>, vector<8x32xf32>, vector<128x32xf32> -> vector<128x32xf32>
    %169 = arith.addf %127, %168 : vector<128x32xf32>
    %c0_118 = arith.constant 0 : index
    %c0_119 = arith.constant 0 : index
    %170 = vector.load %arg9[%c0_118, %c0_119] : memref<1x32xf32, #tpu.memory_space<vmem>>, vector<1x32xf32>
    %171 = vector.broadcast %170 : vector<1x32xf32> to vector<128x32xf32>
    %172 = arith.addf %169, %171 : vector<128x32xf32>
    %c0_120 = arith.constant 0 : index
    %c0_121 = arith.constant 0 : index
    %173 = vector.load %arg10[%c0_120, %c0_121] : memref<128x32xf32, #tpu.memory_space<vmem>>, vector<128x32xf32>
    tpu.vector_store %arg10[%c0_120, %c0_121], %172 {strides = array<i32>} : memref<128x32xf32, #tpu.memory_space<vmem>>, vector<128x32xf32>,
    return
  }
  func.func @transform_0(%arg0: i32) -> (i32, i32) {
    %c0_i32 = arith.constant 0 : i32
    %c0_i32_0 = arith.constant 0 : i32
    return %arg0, %c0_i32 : i32, i32
  }
  func.func @transform_1(%arg0: i32) -> (i32, i32, i32) {
    %c0_i32 = arith.constant 0 : i32
    %c0_i32_0 = arith.constant 0 : i32
    %c0_i32_1 = arith.constant 0 : i32
    %c0_i32_2 = arith.constant 0 : i32
    return %c0_i32, %c0_i32_0, %c0_i32_1 : i32, i32, i32
  }
  func.func @transform_2(%arg0: i32) -> (i32, i32, i32) {
    %c0_i32 = arith.constant 0 : i32
    %c0_i32_0 = arith.constant 0 : i32
    %c0_i32_1 = arith.constant 0 : i32
    %c0_i32_2 = arith.constant 0 : i32
    return %c0_i32, %c0_i32_0, %c0_i32_1 : i32, i32, i32
  }
  func.func @transform_3(%arg0: i32) -> (i32, i32, i32) {
    %c0_i32 = arith.constant 0 : i32
    %c0_i32_0 = arith.constant 0 : i32
    %c0_i32_1 = arith.constant 0 : i32
    %c0_i32_2 = arith.constant 0 : i32
    return %c0_i32, %c0_i32_0, %c0_i32_1 : i32, i32, i32
  }
  func.func @transform_4(%arg0: i32) -> (i32, i32, i32) {
    %c0_i32 = arith.constant 0 : i32
    %c0_i32_0 = arith.constant 0 : i32
    %c0_i32_1 = arith.constant 0 : i32
    %c0_i32_2 = arith.constant 0 : i32
    return %c0_i32, %c0_i32_0, %c0_i32_1 : i32, i32, i32
  }
  func.func @transform_5(%arg0: i32) -> (i32, i32, i32) {
    %c0_i32 = arith.constant 0 : i32
    %c0_i32_0 = arith.constant 0 : i32
    %c0_i32_1 = arith.constant 0 : i32
    %c0_i32_2 = arith.constant 0 : i32
    return %c0_i32, %c0_i32_0, %c0_i32_1 : i32, i32, i32
  }
  func.func @transform_6(%arg0: i32) -> (i32, i32, i32) {
    %c0_i32 = arith.constant 0 : i32
    %c0_i32_0 = arith.constant 0 : i32
    %c0_i32_1 = arith.constant 0 : i32
    %c0_i32_2 = arith.constant 0 : i32
    return %c0_i32, %c0_i32_0, %c0_i32_1 : i32, i32, i32
  }
  func.func @transform_7(%arg0: i32) -> (i32, i32, i32) {
    %c0_i32 = arith.constant 0 : i32
    %c0_i32_0 = arith.constant 0 : i32
    %c0_i32_1 = arith.constant 0 : i32
    %c0_i32_2 = arith.constant 0 : i32
    return %c0_i32, %c0_i32_0, %c0_i32_1 : i32, i32, i32
  }
  func.func @transform_8(%arg0: i32) -> (i32, i32) {
    %c0_i32 = arith.constant 0 : i32
    %c0_i32_0 = arith.constant 0 : i32
    %c0_i32_1 = arith.constant 0 : i32
    return %c0_i32, %c0_i32_0 : i32, i32
  }
  func.func @transform_9(%arg0: i32) -> (i32, i32) {
    %c0_i32 = arith.constant 0 : i32
    %c0_i32_0 = arith.constant 0 : i32
    return %arg0, %c0_i32 : i32, i32
  }
}

</mosaic_0001>

<bundles_post_ra>
// kernel: tpu_custom_call.1
= control target key start
LH: loop header
LB: loop body
LE: loop exit
PB: predicated region body
PF: predicated region fallthrough
CT: control target
= control target key end

     0   :  { %s12194_s30 = smov 0   ;;  %s14293_s0 = inlined_call_operand.vmem [shape: f32[512,32], index: 0, kind: input, shape index: {}]   ;;  %s14294_s1 = inlined_call_operand.vmem [shape: f32[4,32,8], index: 1, kind: input, shape index: {}]   ;;  %s14295_s2 = inlined_call_operand.vmem [shape: f32[4,32,8], index: 2, kind: input, shape index: {}]   ;;  %s14296_s3 = inlined_call_operand.vmem [shape: f32[4,32,8], index: 3, kind: input, shape index: {}]   ;;  %s14297_s4 = inlined_call_operand.vmem [shape: f32[4,1,8], index: 4, kind: input, shape index: {}]   ;;  %s14298_s5 = inlined_call_operand.vmem [shape: f32[4,1,8], index: 5, kind: input, shape index: {}]   ;;  %s14299_s6 = inlined_call_operand.vmem [shape: f32[4,1,8], index: 6, kind: input, shape index: {}]   ;;  %s14300_s7 = inlined_call_operand.vmem [shape: f32[4,8,32], index: 7, kind: input, shape index: {}]   ;;  %s14301_s8 = inlined_call_operand.vmem [shape: f32[1,32], index: 8, kind: input, shape index: {}]   ;;  %s14302_s9 = inlined_call_operand.vmem [shape: f32[512,32], index: 9, kind: output, shape index: {}]  }
   0x1 LB: > { %s9343_s10 = sadd.s32 4294967295, %s12142_s30   ;;  %p9347_p0 = scmp.ge.s32.totalorder %s12142_s30, 1  ;;  %s12142_s30 = sphi %s12194_s30, %s19_s30  }
   0x2   : > { %p288_p1 = scmp.lt.s32.totalorder %s12142_s30, 5 }
   0x4   : > { %p289_p2 = pnand %p9347_p0, %p288_p1 }
   0x6   : > { %292 = sbr.rel (%p289_p2) target bundleno = 3900 (0xf3c), region = 56 }
   0xd   : > { %v352_v0 = vld [vmem:[%s14294_s1] sm:$0xff]  ;;  %v353_v1 = vld [vmem:[%s14294_s1 + $0x8] sm:$0xff]  ;;  %v354_v2 = vld [vmem:[%s14294_s1 + $0x10] sm:$0xff]  ;;  %s9348_s17 = sshll.u32 %s9343_s10, 4  ;;  %vm363_vm0 = vcmask 261120   ;;  %vm885_vm1 = vcmask 64512  }
   0xe   : > { %v11363_v3 = vpack.c.bf16 %v353_v1, %v352_v0  ;;  %v355_v4 = vld [vmem:[%s14294_s1 + $0x18] sm:$0xff]  ;;  %p325_p3 = scmp.lt.s32.totalorder %s9348_s17, 63  ;;  %v573_v6 = vld [vmem:[%s14295_s2] sm:$0xff]  ;;  %v574_v7 = vld [vmem:[%s14295_s2 + $0x8] sm:$0xff]  ;;  %v14305_v62 = vmov 0  ;;  %vm1582_vm3 = vcmask 130048  }
   0xf   : > { %v11367_v5 = vpack.c.bf16 %v355_v4, %v354_v2  ;;  %v729_v8 = vld [vmem:[%s14296_s3] sm:$0xff]  ;;  %v730_v9 = vld [vmem:[%s14296_s3 + $0x8] sm:$0xff]  ;;  %v11371_v10 = vpack.c.bf16 %v574_v7, %v573_v6  ;;  %v575_v11 = vld [vmem:[%s14295_s2 + $0x10] sm:$0xff] }
  0x10   : > { %11779 = vmatprep.subr.bf16.mxu1 %v11363_v3  ;;  %s14320_s17 = smov (!%p325_p3, %s9348_s17), 63  ;;  %11364 = vmatprep.subr.bf16.mxu0 %v11363_v3  ;;  %v576_v12 = vld [vmem:[%s14295_s2 + $0x18] sm:$0xff]  ;;  %v11379_v13 = vpack.c.bf16 %v730_v9, %v729_v8  ;;  %v731_v16 = vld [vmem:[%s14296_s3 + $0x10] sm:$0xff]  ;;  %v12370_v34 = vld [vmem:[%s14297_s4] ss:$0 sm:$0xff] }
  0x11   : > { %11781 = vmatpush3.bf16.msra.mxu1 %v11363_v3  ;;  %11366 = vmatpush3.bf16.msra.mxu0 %v11363_v3  ;;  %s9349_s28 = sshll.u32 %s14320_s17, 3  ;;  %v732_v17 = vld [vmem:[%s14296_s3 + $0x18] sm:$0xff]  ;;  %v11375_v19 = vpack.c.bf16 %v576_v12, %v575_v11  ;;  %v12394_v54 = vld [vmem:[%s14298_s5] ss:$0 sm:$0xff]  ;;  %vm12404_vm2 = vmpackc.low %vm885_vm1, %vm885_vm1 }
  0x12   : > { %11780 = vmatprep.subr.bf16.mxu1 %v11367_v5  ;;  %11368 = vmatprep.subr.bf16.mxu0 %v11367_v5  ;;  %s12234_s11 = scalar_lea.vmem %s14293_s0, %s9349_s28  ;;  %v11383_v21 = vpack.c.bf16 %v732_v17, %v731_v16  ;;  %v14306_v62 = vsel %vm12404_vm2, 4294967295, %v14305_v62  ;;  %s14256_s26 = scalar_lea.vmem %s14302_s9, %s9349_s28 }
  0x13   : > { %v12243_v14 = vld [vmem:[%s12234_s11 + $0x40] sm:$0xff]  ;;  %v12248_v15 = vld [vmem:[%s12234_s11 + $0x48] sm:$0xff]  ;;  %v346_v18 = vld [vmem:[%s12234_s11 + $0x50] sm:$0xff]  ;;  %14307 = vst [vmem:[#allocation2_spill] sm:$0xff] %v14306_v62 }
  0x14   : > { %10447 = vmatprep.mubr.msk.f32.mxu1 %vm363_vm0, %v12243_v14  ;;  %v12258_v20 = vld [vmem:[%s12234_s11] sm:$0xff]  ;;  %v347_v22 = vld [vmem:[%s12234_s11 + $0x58] sm:$0xff]  ;;  %v12267_v23 = vld [vmem:[%s12234_s11 + $0x8] sm:$0xff] }
  0x15   : > { %11782 = vmatpush3.bf16.msra.mxu1 %v11367_v5  ;;  %11370 = vmatpush3.bf16.msra.mxu0 %v11367_v5  ;;  %v348_v24 = vld [vmem:[%s12234_s11 + $0x60] sm:$0xff]  ;;  %v12271_v25 = vld [vmem:[%s12234_s11 + $0x10] sm:$0xff]  ;;  %v349_v26 = vld [vmem:[%s12234_s11 + $0x68] sm:$0xff] }
  0x16   : > { %11372 = vmatprep.subr.bf16.mxu1 %v11371_v10  ;;  %10435 = vmatprep.mubr.msk.f32.mxu0 %vm363_vm0, %v12258_v20  ;;  %v12281_v27 = vld [vmem:[%s12234_s11 + $0x18] sm:$0xff]  ;;  %v350_v28 = vld [vmem:[%s12234_s11 + $0x70] sm:$0xff]  ;;  %v12285_v29 = vld [vmem:[%s12234_s11 + $0x20] sm:$0xff] }
  0x17   : > { %11380 = vmatprep.subr.bf16.mxu0 %v11379_v13  ;;  %v12294_v30 = vld [vmem:[%s12234_s11 + $0x78] sm:$0xff]  ;;  %v12297_v31 = vld [vmem:[%s12234_s11 + $0x28] sm:$0xff]  ;;  %v12300_v32 = vld [vmem:[%s12234_s11 + $0x30] sm:$0xff] }
  0x18   : > { %10448 = vmatmul.mubr.msk.f32.vlgmr.msra.gmra.mrb[0].mxu1 %vm363_vm0, %v12248_v15  ;;  %10436 = vmatmul.mubr.msk.f32.vlgmr.msra.gmra.mrb[0].mxu0 %vm363_vm0, %v12267_v23  ;;  %v12311_v33 = vld [vmem:[%s12234_s11 + $0x38] sm:$0xff] }
  0x19   : > { %10450 = vmatprep.mubr.msk.f32.mxu1 %vm363_vm0, %v346_v18  ;;  %11374 = vmatpush3.bf16.msra.mxu1 %v11371_v10 }
  0x1a   : > { %11376 = vmatprep.subr.bf16.mxu1 %v11375_v19  ;;  %10438 = vmatprep.mubr.msk.f32.mxu0 %vm363_vm0, %v12271_v25 }
  0x1b   : > { %11382 = vmatpush3.bf16.msra.mxu0 %v11379_v13 }
  0x1c   : > { %10451 = vmatmul.mubr.msk.f32.gmra.mrb[2].mxu1 %vm363_vm0, %v347_v22  ;;  %11384 = vmatprep.subr.bf16.mxu0 %v11383_v21 }
  0x1d   : > { %10453 = vmatprep.mubr.msk.f32.mxu1 %vm363_vm0, %v348_v24  ;;  %11378 = vmatpush3.bf16.msra.mxu1 %v11375_v19 }
  0x1e   : > { %10439 = vmatmul.mubr.msk.f32.gmra.mrb[2].mxu0 %vm363_vm0, %v12281_v27 }
  0x1f   : > { %10441 = vmatprep.mubr.msk.f32.mxu0 %vm363_vm0, %v12285_v29  ;;  %11386 = vmatpush3.bf16.msra.mxu0 %v11383_v21 }
  0x20   : > { %10454 = vmatmul.mubr.msk.f32.gmra.mrb[4].mxu1 %vm363_vm0, %v349_v26 }
  0x21   : > { %10456 = vmatprep.mubr.msk.f32.mxu1 %vm363_vm0, %v350_v28 }
  0x22   : > { %10442 = vmatmul.mubr.msk.f32.gmra.mrb[4].mxu0 %vm363_vm0, %v12297_v31 }
  0x23   : > { %10444 = vmatprep.mubr.msk.f32.mxu0 %vm363_vm0, %v12300_v32 }
  0x24   : > { %10457 = vmatmul.mubr.msk.f32.gmra.mrb[6].mxu1 %vm363_vm0, %v12294_v30 }
  0x25   : > { %10467 = vmatprep.mubr.msk.f32.mxu1 %vm363_vm0, %v12258_v20 }
  0x26   : > { %10445 = vmatmul.mubr.msk.f32.gmra.mrb[6].mxu0 %vm363_vm0, %v12311_v33 }
  0x27   : > { %10499 = vmatprep.mubr.msk.f32.mxu0 %vm363_vm0, %v12258_v20 }
  0x28   : > { %10468 = vmatmul.mubr.msk.f32.vlgmr.msra.gmra.mrb[8].mxu1 %vm363_vm0, %v12267_v23 }
  0x29   : > { %10470 = vmatprep.mubr.msk.f32.mxu1 %vm363_vm0, %v12271_v25 }
  0x2a   : > { %10500 = vmatmul.mubr.msk.f32.vlgmr.msra.gmra.mrb[8].mxu0 %vm363_vm0, %v12267_v23 }
  0x2b   : > { %10502 = vmatprep.mubr.msk.f32.mxu0 %vm363_vm0, %v12271_v25 }
  0x2c   : > { %10471 = vmatmul.mubr.msk.f32.gmra.mrb[10].mxu1 %vm363_vm0, %v12281_v27 }
  0x2d   : > { %10473 = vmatprep.mubr.msk.f32.mxu1 %vm363_vm0, %v12285_v29 }
  0x2e   : > { %10503 = vmatmul.mubr.msk.f32.gmra.mrb[10].mxu0 %vm363_vm0, %v12281_v27 }
  0x2f   : > { %10505 = vmatprep.mubr.msk.f32.mxu0 %vm363_vm0, %v12285_v29 }
  0x30   : > { %10474 = vmatmul.mubr.msk.f32.gmra.mrb[12].mxu1 %vm363_vm0, %v12297_v31 }
  0x31   : > { %10476 = vmatprep.mubr.msk.f32.mxu1 %vm363_vm0, %v12300_v32 }
  0x32   : > { %10506 = vmatmul.mubr.msk.f32.gmra.mrb[12].mxu0 %vm363_vm0, %v12297_v31 }
  0x33   : > { %10508 = vmatprep.mubr.msk.f32.mxu0 %vm363_vm0, %v12300_v32 }
  0x34   : > { %10477 = vmatmul.mubr.msk.f32.gmra.mrb[14].mxu1 %vm363_vm0, %v12311_v33 }
  0x35   : > { %10479 = vmatprep.mubr.msk.f32.mxu1 %vm363_vm0, %v12243_v14 }
  0x36   : > { %10509 = vmatmul.mubr.msk.f32.gmra.mrb[14].mxu0 %vm363_vm0, %v12311_v33 }
  0x37   : > { %10511 = vmatprep.mubr.msk.f32.mxu0 %vm363_vm0, %v12243_v14 }
  0x38   : > { %10480 = vmatmul.mubr.msk.f32.gmra.mrb[16].mxu1 %vm363_vm0, %v12248_v15 }
  0x39   : > { %10482 = vmatprep.mubr.msk.f32.mxu1 %vm363_vm0, %v346_v18 }
  0x3a   : > { %10512 = vmatmul.mubr.msk.f32.gmra.mrb[16].mxu0 %vm363_vm0, %v12248_v15 }
  0x3b   : > { %10514 = vmatprep.mubr.msk.f32.mxu0 %vm363_vm0, %v346_v18 }
  0x3c   : > { %10483 = vmatmul.mubr.msk.f32.gmra.mrb[18].mxu1 %vm363_vm0, %v347_v22 }
  0x3d   : > { %10485 = vmatprep.mubr.msk.f32.mxu1 %vm363_vm0, %v348_v24 }
  0x3e   : > { %10515 = vmatmul.mubr.msk.f32.gmra.mrb[18].mxu0 %vm363_vm0, %v347_v22 }
  0x3f   : > { %10517 = vmatprep.mubr.msk.f32.mxu0 %vm363_vm0, %v348_v24 }
  0x40   : > { %10486 = vmatmul.mubr.msk.f32.gmra.mrb[20].mxu1 %vm363_vm0, %v349_v26 }
  0x41   : > { %10488 = vmatprep.mubr.msk.f32.mxu1 %vm363_vm0, %v350_v28 }
  0x42   : > { %10518 = vmatmul.mubr.msk.f32.gmra.mrb[20].mxu0 %vm363_vm0, %v349_v26 }
  0x43   : > { %10520 = vmatprep.mubr.msk.f32.mxu0 %vm363_vm0, %v350_v28 }
  0x44   : > { %10489 = vmatmul.mubr.msk.f32.gmra.mrb[22].mxu1 %vm363_vm0, %v12294_v30 }
  0x46   : > { %10521 = vmatmul.mubr.msk.f32.gmra.mrb[22].mxu0 %vm363_vm0, %v12294_v30 }
  0xeb   : > { %v12372_v35 = vpop.f32.mrb[0].mxu1  ;;  %v10437_v38 = vpop.f32.mrb[0].mxu0 }
  0xec   : > { %v518_v36 = vpop.f32.mrb[1].mxu1  ;;  %v478_v39 = vpop.f32.mrb[1].mxu0  ;;  %v484_v3 = vadd.f32 %v10437_v38, %v12370_v34 }
  0xed   : > { %v519_v37 = vadd.f32 %v12370_v34, %v518_v36  ;;  %v479_v42 = vadd.f32 %v12370_v34, %v478_v39 }
  0xee   : > { %v558_v10 = vmul.f32 0.35355338, %v484_v3 }
  0xef   : > { %v565_v40 = vmul.f32 0.35355338, %v519_v37  ;;  %v12375_v41 = vpop.f32.mrb[2].mxu1  ;;  %v557_v44 = vmul.f32 0.35355338, %v479_v42 }
  0xf0   : > { %v12378_v43 = vpop.f32.mrb[3].mxu1 }
  0xf1   : > { %10555 = vmatprep.mubr.msk.f32.mxu0 %vm885_vm1, %v565_v40  ;;  %v10440_v45 = vpop.f32.mrb[2].mxu0  ;;  %10527 = vmatprep.mubr.msk.f32.mxu1 %vm885_vm1, %v557_v44 }
  0xf2   : > { %v488_v46 = vpop.f32.mrb[3].mxu0  ;;  %v494_v17 = vadd.f32 %v10440_v45, %v12370_v34 }
  0xf3   : > { %v12381_v47 = vpop.f32.mrb[4].mxu1  ;;  %v489_v5 = vadd.f32 %v12370_v34, %v488_v46  ;;  %v524_v46 = vadd.f32 %v12372_v35, %v12370_v34 }
  0xf4   : > { %v12384_v48 = vpop.f32.mrb[5].mxu1  ;;  %v560_v28 = vmul.f32 0.35355338, %v494_v17 }
  0xf5   : > { %v10443_v49 = vpop.f32.mrb[4].mxu0  ;;  %v559_v12 = vmul.f32 0.35355338, %v489_v5 }
  0xf6   : > { %v498_v50 = vpop.f32.mrb[5].mxu0  ;;  %v504_v44 = vadd.f32 %v10443_v49, %v12370_v34 }
  0xf7   : > { %v10458_v51 = vpop.f32.mrb[6].mxu1  ;;  %v499_v22 = vadd.f32 %v12370_v34, %v498_v50 }
  0xf8   : > { %v12387_v52 = vadd.f32 %v10458_v51, %v12370_v34  ;;  %v12389_v53 = vpop.f32.mrb[7].mxu1 }
  0xf9   : > { %v12396_v55 = vpop.f32.mrb[6].mxu0  ;;  %v561_v39 = vmul.f32 0.35355338, %v499_v22 }
  0xfa   : > { %v508_v56 = vpop.f32.mrb[7].mxu0 }
  0xfb   : > { %v10469_v57 = vpop.f32.mrb[8].mxu1 }
  0xfc   : > { %v656_v58 = vadd.f32 %v10469_v57, %v12394_v54  ;;  %v650_v59 = vpop.f32.mrb[9].mxu1 }
  0xfd   : > { %v651_v60 = vadd.f32 %v12394_v54, %v650_v59  ;;  %v12400_v61 = vpop.f32.mrb[8].mxu0  ;;  %v539_v59 = vadd.f32 %v12370_v34, %v12384_v48 }
  0xff   : > { %v11387_v63 = vpack.c.bf16 %v656_v58, %v651_v60  ;;  %v10472_v0 = vpop.f32.mrb[10].mxu1  ;;  %v509_v58 = vadd.f32 %v12370_v34, %v508_v56  ;;  %v562_v60 = vmul.f32 0.35355338, %v504_v44  ;;  %v569_v5 = vmul.f32 0.35355338, %v539_v59 }
 0x100   : > { %v666_v1 = vadd.f32 %v10472_v0, %v12394_v54  ;;  %v660_v2 = vpop.f32.mrb[11].mxu1  ;;  %v566_v0 = vmul.f32 0.35355338, %v524_v46  ;;  %v514_v56 = vadd.f32 %v12396_v55, %v12370_v34 }
 0x101   : > { %11389 = vmatprep.subr.msk.bf16.mxu1 %vm12404_vm2, %v11387_v63  ;;  %v661_v4 = vadd.f32 %v12394_v54, %v660_v2  ;;  %v563_v2 = vmul.f32 0.35355338, %v509_v58 }
 0x102   : > { %11392 = vmatpush3.bf16.xpose.msk.msra.mxu1 %vm12404_vm2, %v11387_v63  ;;  %v564_v55 = vmul.f32 0.35355338, %v514_v56 }
 0x103   : > { %v11393_v6 = vpack.c.bf16 %v666_v1, %v661_v4  ;;  %v10475_v7 = vpop.f32.mrb[12].mxu1 }
 0x104   : > { %v676_v8 = vadd.f32 %v10475_v7, %v12394_v54  ;;  %v670_v9 = vpop.f32.mrb[13].mxu1  ;;  %v544_v7 = vadd.f32 %v12381_v47, %v12370_v34  ;;  %v534_v47 = vadd.f32 %v12375_v41, %v12370_v34  ;;  %v9386_v41 = vld [vmem:[%s14299_s6] ss:$0 sm:$0xff] }
 0x105   : > { %v671_v11 = vadd.f32 %v12394_v54, %v670_v9  ;;  %11395 = vmatprep.subr.msk.bf16.mxu1 %vm12404_vm2, %v11393_v6 }
 0x107   : > { %v11399_v13 = vpack.c.bf16 %v676_v8, %v671_v11  ;;  %v10478_v14 = vpop.f32.mrb[14].mxu1  ;;  %v570_v8 = vmul.f32 0.35355338, %v544_v7 }
 0x108   : > { %v686_v15 = vadd.f32 %v10478_v14, %v12394_v54  ;;  %v680_v16 = vpop.f32.mrb[15].mxu1 }
 0x109   : > { %10528 = vmatmul.mubr.msk.f32.vlgmr.msra.gmra.mrb[24].mxu1 %vm885_vm1, %v558_v10  ;;  %v681_v18 = vadd.f32 %v12394_v54, %v680_v16  ;;  %v568_v10 = vmul.f32 0.35355338, %v534_v47 }
 0x10a   : > { %11398 = vmatpush3.bf16.xpose.msk.msra.mxu1 %vm12404_vm2, %v11393_v6  ;;  %10534 = vmatprep.mubr.msk.f32.mxu1 %vm885_vm1, %v559_v12  ;;  %v572_v12 = vmul.f32 0.35355338, %v12387_v52 }
 0x10b   : > { %v11405_v19 = vpack.c.bf16 %v686_v15, %v681_v18  ;;  %v10481_v21 = vpop.f32.mrb[16].mxu1  ;;  %11401 = vmatprep.subr.msk.bf16.mxu1 %vm12404_vm2, %v11399_v13 }
 0x10c   : > { %v696_v24 = vadd.f32 %v10481_v21, %v12394_v54  ;;  %v690_v26 = vpop.f32.mrb[17].mxu1 }
 0x10d   : > { %v691_v36 = vadd.f32 %v12394_v54, %v690_v26 }
 0x10f   : > { %v11411_v37 = vpack.c.bf16 %v696_v24, %v691_v36  ;;  %v10484_v38 = vpop.f32.mrb[18].mxu1 }
 0x110   : > { %v706_v40 = vadd.f32 %v10484_v38, %v12394_v54  ;;  %v700_v42 = vpop.f32.mrb[19].mxu1 }
 0x111   : > { %10535 = vmatmul.mubr.msk.f32.vlgmr.msra.gmra.mrb[26].mxu1 %vm885_vm1, %v560_v28  ;;  %11413 = vmatprep.subr.msk.bf16.mxu0 %vm12404_vm2, %v11411_v37  ;;  %v701_v45 = vadd.f32 %v12394_v54, %v700_v42 }
 0x112   : > { %11404 = vmatpush3.bf16.xpose.msk.msra.mxu1 %vm12404_vm2, %v11399_v13  ;;  %11416 = vmatpush3.bf16.xpose.msk.msra.mxu0 %vm12404_vm2, %v11411_v37  ;;  %v812_v13 = vadd.f32 %v12400_v61, %v9386_v41 }
 0x113   : > { %v11417_v50 = vpack.c.bf16 %v706_v40, %v701_v45  ;;  %v10487_v51 = vpop.f32.mrb[20].mxu1  ;;  %10541 = vmatprep.mubr.msk.f32.mxu1 %vm885_vm1, %v561_v39  ;;  %11407 = vmatprep.subr.msk.bf16.mxu1 %vm12404_vm2, %v11405_v19 }
 0x114   : > { %v716_v49 = vadd.f32 %v10487_v51, %v12394_v54  ;;  %v710_v57 = vpop.f32.mrb[21].mxu1 }
 0x115   : > { %v711_v63 = vadd.f32 %v12394_v54, %v710_v57 }
 0x117   : > { %v11423_v35 = vpack.c.bf16 %v716_v49, %v711_v63  ;;  %v10490_v1 = vpop.f32.mrb[22].mxu1 }
 0x118   : > { %v726_v3 = vadd.f32 %v10490_v1, %v12394_v54  ;;  %v720_v4 = vpop.f32.mrb[23].mxu1 }
 0x119   : > { %10542 = vmatmul.mubr.msk.f32.vlgmr.msra.gmra.mrb[28].mxu1 %vm885_vm1, %v562_v60  ;;  %10556 = vmatmul.mubr.msk.f32.vlgmr.msra.gmra.mrb[24].mxu0 %vm885_vm1, %v566_v0  ;;  %v721_v48 = vadd.f32 %v12394_v54, %v720_v4  ;;  %v529_v54 = vadd.f32 %v12370_v34, %v12378_v43  ;;  %v549_v43 = vadd.f32 %v12370_v34, %v12389_v53  ;;  %v806_v34 = vpop.f32.mrb[9].mxu0 }
 0x11a   : > { %11425 = vmatprep.subr.msk.bf16.mxu0 %vm12404_vm2, %v11423_v35  ;;  %11410 = vmatpush3.bf16.xpose.msk.msra.mxu1 %vm12404_vm2, %v11405_v19  ;;  %v807_v53 = vadd.f32 %v9386_v41, %v806_v34  ;;  %v10504_v14 = vpop.f32.mrb[10].mxu0 }
 0x11b   : > { %11428 = vmatpush3.bf16.xpose.msk.msra.mxu0 %vm12404_vm2, %v11423_v35  ;;  %10569 = vmatprep.mubr.msk.f32.mxu0 %vm885_vm1, %v569_v5  ;;  %v11429_v6 = vpack.c.bf16 %v726_v3, %v721_v48  ;;  %v567_v9 = vmul.f32 0.35355338, %v529_v54  ;;  %v571_v11 = vmul.f32 0.35355338, %v549_v43  ;;  %v822_v15 = vadd.f32 %v10504_v14, %v9386_v41  ;;  %v816_v16 = vpop.f32.mrb[11].mxu0 }
 0x11c   : > { %10548 = vmatprep.mubr.msk.f32.mxu1 %vm885_vm1, %v563_v2  ;;  %11419 = vmatprep.subr.msk.bf16.mxu1 %vm12404_vm2, %v11417_v50  ;;  %v11435_v17 = vpack.c.bf16 %v812_v13, %v807_v53  ;;  %v817_v18 = vadd.f32 %v9386_v41, %v816_v16  ;;  %v10507_v19 = vpop.f32.mrb[12].mxu0 }
 0x11d   : > { %v832_v21 = vadd.f32 %v10507_v19, %v9386_v41  ;;  %v826_v22 = vpop.f32.mrb[13].mxu0 }
 0x11e   : > { %v11439_v24 = vpack.c.bf16 %v822_v15, %v817_v18  ;;  %v827_v52 = vadd.f32 %v9386_v41, %v826_v22  ;;  %v10510_v26 = vpop.f32.mrb[14].mxu0  ;;  %11436 = vmatprep.subr.bf16.mxu0 %v11435_v17 }
 0x11f   : > { %v842_v28 = vadd.f32 %v10510_v26, %v9386_v41  ;;  %v836_v36 = vpop.f32.mrb[15].mxu0 }
 0x120   : > { %v12493_v37 = vpack.c.bf16 %v832_v21, %v827_v52  ;;  %v837_v61 = vadd.f32 %v9386_v41, %v836_v36  ;;  %v10513_v38 = vpop.f32.mrb[16].mxu0 }
 0x121   : > { %10549 = vmatmul.mubr.msk.f32.vlgmr.msra.gmra.mrb[30].mxu1 %vm885_vm1, %v564_v55  ;;  %v852_v39 = vadd.f32 %v10513_v38, %v9386_v41  ;;  %v846_v40 = vpop.f32.mrb[17].mxu0 }
 0x122   : > { %10570 = vmatmul.mubr.msk.f32.vlgmr.msra.gmra.mrb[26].mxu0 %vm885_vm1, %v570_v8  ;;  %11422 = vmatpush3.bf16.xpose.msk.msra.mxu1 %vm12404_vm2, %v11417_v50  ;;  %v12495_v42 = vpack.c.bf16 %v842_v28, %v837_v61  ;;  %v847_v44 = vadd.f32 %v9386_v41, %v846_v40  ;;  %v10516_v45 = vpop.f32.mrb[18].mxu0 }
 0x123   : > { %10562 = vmatprep.mubr.msk.f32.mxu1 %vm885_vm1, %v567_v9  ;;  %11431 = vmatprep.subr.msk.bf16.mxu1 %vm12404_vm2, %v11429_v6  ;;  %v862_v46 = vadd.f32 %v10516_v45, %v9386_v41  ;;  %v856_v50 = vpop.f32.mrb[19].mxu0 }
 0x124   : > { %11438 = vmatpush3.bf16.msra.mxu0 %v11435_v17  ;;  %v12498_v51 = vpack.c.bf16 %v852_v39, %v847_v44  ;;  %v857_v49 = vadd.f32 %v9386_v41, %v856_v50  ;;  %v10519_v57 = vpop.f32.mrb[20].mxu0 }
 0x125   : > { %11444 = vmatprep.subr.bf16.mxu0 %v12493_v37  ;;  %v872_v58 = vadd.f32 %v10519_v57, %v9386_v41  ;;  %v866_v59 = vpop.f32.mrb[21].mxu0 }
 0x126   : > { %v12501_v60 = vpack.c.bf16 %v862_v46, %v857_v49  ;;  %v867_v63 = vadd.f32 %v9386_v41, %v866_v59  ;;  %v10522_v0 = vpop.f32.mrb[22].mxu0 }
 0x127   : > { %v882_v35 = vadd.f32 %v10522_v0, %v9386_v41  ;;  %v876_v1 = vpop.f32.mrb[23].mxu0 }
 0x128   : > { %v12503_v2 = vpack.c.bf16 %v872_v58, %v867_v63  ;;  %v877_v3 = vadd.f32 %v9386_v41, %v876_v1 }
 0x129   : > { %10563 = vmatmul.mubr.msk.f32.vlgmr.msra.gmra.mrb[32].mxu1 %vm885_vm1, %v568_v10 }
 0x12a   : > { %11434 = vmatpush3.bf16.xpose.msk.msra.mxu1 %vm12404_vm2, %v11429_v6  ;;  %10576 = vmatprep.mubr.msk.f32.mxu1 %vm885_vm1, %v571_v11  ;;  %v12505_v4 = vpack.c.bf16 %v882_v35, %v877_v3 }
 0x12b   : > { %11440 = vmatprep.subr.bf16.mxu1 %v11439_v24 }
 0x131   : > { %10577 = vmatmul.mubr.msk.f32.vlgmr.msra.gmra.mrb[34].mxu1 %vm885_vm1, %v572_v12 }
 0x132   : > { %11442 = vmatpush3.bf16.msra.mxu1 %v11439_v24 }
 0x133   : > { %11448 = vmatprep.subr.bf16.mxu1 %v12495_v42 }
 0x1dc   : > { %v10529_v5 = vpop.f32.mrb[24].mxu1 }
 0x1dd   : > { %v964_v56 = vpop.f32.mrb[25].mxu1  ;;  %v1586_v10 = vsel %vm1582_vm3, %v10529_v5, -inf }
 0x1de   : > { %v1583_v48 = vsel %vm1582_vm3, %v964_v56, -inf }
 0x1df   : > { %1584 = vmax.xlane.f32.xlu0 %v1583_v48 }
 0x1e4   : > { %v10536_v6 = vpop.f32.mrb[26].mxu1 }
 0x1e5   : > { %v1051_v7 = vpop.f32.mrb[27].mxu1  ;;  %v1592_v54 = vsel %vm1582_vm3, %v10536_v6, -inf }
 0x1e6   : > { %1593 = vmax.xlane.f32.xlu0 %v1592_v54  ;;  %v1589_v55 = vsel %vm1582_vm3, %v1051_v7, -inf }
 0x1ea   : > { %1590 = vmax.xlane.f32.xlu0 %v1589_v55 }
 0x1ec   : > { %v12510_v8 = vpop.f32.mrb[28].mxu1  ;;  %v12512_v9 = vpop.f32.mrb[24].mxu0 }
 0x1ed   : > { %v12514_v47 = vpop.f32.mrb[29].mxu1  ;;  %v12516_v43 = vpop.f32.mrb[25].mxu0  ;;  %v1598_v11 = vsel %vm1582_vm3, %v12510_v8, -inf  ;;  %v1610_v36 = vsel %vm1582_vm3, %v12512_v9, -inf }
 0x1ee   : > { %1587 = vmax.xlane.f32.xlu0 %v1586_v10  ;;  %v1595_v34 = vsel %vm1582_vm3, %v12514_v47, -inf  ;;  %v1607_v15 = vsel %vm1582_vm3, %v12516_v43, -inf }
 0x1f2   : > { %1599 = vmax.xlane.f32.xlu0 %v1598_v11 }
 0x1f4   : > { %v10550_v12 = vpop.f32.mrb[30].mxu1 }
 0x1f5   : > { %v12521_v41 = vpop.f32.mrb[26].mxu0  ;;  %v1225_v13 = vpop.f32.mrb[31].mxu1  ;;  %v1604_v53 = vsel %vm1582_vm3, %v10550_v12, -inf }
 0x1f6   : > { %v12526_v14 = vpop.f32.mrb[27].mxu0  ;;  %1596 = vmax.xlane.f32.xlu0 %v1595_v34  ;;  %1605 = vmax.xlane.f32.xlu1 %v1604_v53  ;;  %v1601_v16 = vsel %vm1582_vm3, %v1225_v13, -inf  ;;  %v1622_v61 = vsel %vm1582_vm3, %v12521_v41, -inf }
 0x1f7   : > { %v1619_v19 = vsel %vm1582_vm3, %v12526_v14, -inf }
 0x1fa   : > { %1608 = vmax.xlane.f32.xlu0 %v1607_v15  ;;  %1602 = vmax.xlane.f32.xlu1 %v1601_v16 }
 0x1fc   : > { %v10564_v17 = vpop.f32.mrb[32].mxu1 }
 0x1fd   : > { %v12531_v18 = vpop.f32.mrb[33].mxu1  ;;  %v1616_v21 = vsel %vm1582_vm3, %v10564_v17, -inf }
 0x1fe   : > { %1620 = vmax.xlane.f32.xlu0 %v1619_v19  ;;  %1617 = vmax.xlane.f32.xlu1 %v1616_v21  ;;  %v1613_v22 = vsel %vm1582_vm3, %v12531_v18, -inf }
 0x202   : > { %1614 = vmax.xlane.f32.xlu1 %v1613_v22 }
 0x204   : > { %v12538_v24 = vpop.f32.mrb[34].mxu1 }
 0x205   : > { %v12540_v52 = vpop.f32.mrb[35].mxu1  ;;  %v1628_v28 = vsel %vm1582_vm3, %v12538_v24, -inf }
 0x206   : > { %v1625_v26 = vsel %vm1582_vm3, %v12540_v52, -inf }
 0x207   : > { %1626 = vmax.xlane.f32.xlu1 %v1625_v26 }
 0x20b   : > { %1629 = vmax.xlane.f32.xlu1 %v1628_v28 }
 0x20f   : > { %1611 = vmax.xlane.f32.xlu1 %v1610_v36 }
 0x213   : > { %1623 = vmax.xlane.f32.xlu1 %v1622_v61 }
 0x26c   : > { %v1585_v38 = vpop.xlane.xlu0 %1584 }
 0x26d   : > { %v1631_v46 = vsub.f32 %v964_v56, %v1585_v38 }
 0x26f   : > { %v1647_v57 = vmul.f32 1.442695, %v1631_v46 }
 0x273   : > { %v1594_v39 = vpop.xlane.xlu0 %1593 }
 0x274   : > { %v1634_v40 = vsub.f32 %v10536_v6, %v1594_v39 }
 0x276   : > { %v1653_v44 = vmul.f32 1.442695, %v1634_v40 }
 0x277   : > { %v1591_v45 = vpop.xlane.xlu0 %1590 }
 0x278   : > { %11839 = vpow2.f32 %v1653_v44  ;;  %v1633_v58 = vsub.f32 %v1051_v7, %v1591_v45 }
 0x27a   : > { %v1651_v35 = vmul.f32 1.442695, %v1633_v58 }
 0x27b   : > { %v1588_v50 = vpop.xlane.xlu0 %1587 }
 0x27c   : > { %v1632_v49 = vsub.f32 %v10529_v5, %v1588_v50 }
 0x27e   : > { %v1649_v59 = vmul.f32 1.442695, %v1632_v49 }
 0x27f   : > { %v1600_v63 = vpop.xlane.xlu0 %1599 }
 0x280   : > { %11841 = vpow2.f32 %v1649_v59  ;;  %v1636_v34 = vsub.f32 %v12510_v8, %v1600_v63 }
 0x281   : > { %11843 = vpow2.f32 %v1647_v57 }
 0x282   : > { %v12550_v0 = vpop.eup %11839  ;;  %11845 = vpow2.f32 %v1651_v35  ;;  %v1657_v21 = vmul.f32 1.442695, %v1636_v34 }
 0x283   : > { %v1606_v1 = vpop.xlane.xlu1 %1605  ;;  %v1688_v3 = vsel %vm1582_vm3, %v12550_v0, 0.0  ;;  %v1597_v48 = vpop.xlane.xlu0 %1596 }
 0x284   : > { %v1638_v6 = vsub.f32 %v10550_v12, %v1606_v1  ;;  %1689 = vadd.xlane.f32.xlu1 %v1688_v3  ;;  %v1635_v5 = vsub.f32 %v12514_v47, %v1597_v48 }
 0x286   : > { %v1661_v56 = vmul.f32 1.442695, %v1638_v6  ;;  %v1655_v53 = vmul.f32 1.442695, %v1635_v5 }
 0x287   : > { %v1603_v54 = vpop.xlane.xlu1 %1602  ;;  %v1609_v10 = vpop.xlane.xlu0 %1608 }
 0x288   : > { %v1637_v7 = vsub.f32 %v1225_v13, %v1603_v54  ;;  %11847 = vpow2.f32 %v1661_v56  ;;  %v1639_v13 = vsub.f32 %v12516_v43, %v1609_v10 }
 0x28a   : > { %v12555_v55 = vpop.eup %11841  ;;  %v1659_v11 = vmul.f32 1.442695, %v1637_v7  ;;  %v1663_v38 = vmul.f32 1.442695, %v1639_v13 }
 0x28b   : > { %v1618_v15 = vpop.xlane.xlu1 %1617  ;;  %v1682_v16 = vsel %vm1582_vm3, %v12555_v55, 0.0  ;;  %v12560_v12 = vpop.eup %11843 }
 0x28c   : > { %v1642_v19 = vsub.f32 %v10564_v17, %v1618_v15  ;;  %1683 = vadd.xlane.f32.xlu0 %v1682_v16  ;;  %11849 = vpow2.f32 %v1659_v11  ;;  %v1679_v26 = vsel %vm1582_vm3, %v12560_v12, 0.0  ;;  %v12565_v8 = vpop.eup %11845  ;;  %v1621_v28 = vpop.xlane.xlu0 %1620 }
 0x28d   : > { %11851 = vpow2.f32 %v1655_v53  ;;  %v1643_v39 = vsub.f32 %v12526_v14, %v1621_v28  ;;  %v1685_v43 = vsel %vm1582_vm3, %v12565_v8, 0.0 }
 0x28e   : > { %v1669_v47 = vmul.f32 1.442695, %v1642_v19 }
 0x28f   : > { %v1615_v22 = vpop.xlane.xlu1 %1614  ;;  %v1671_v46 = vmul.f32 1.442695, %v1643_v39 }
 0x290   : > { %v1641_v36 = vsub.f32 %v12531_v18, %v1615_v22  ;;  %1680 = vadd.xlane.f32.xlu0 %v1679_v26  ;;  %11853 = vpow2.f32 %v1669_v47 }
 0x291   : > { %11855 = vpow2.f32 %v1657_v21 }
 0x292   : > { %v1667_v61 = vmul.f32 1.442695, %v1641_v36  ;;  %v12568_v17 = vpop.eup %11847 }
 0x293   : > { %v1700_v40 = vsel %vm1582_vm3, %v12568_v17, 0.0 }
 0x294   : > { %11857 = vpow2.f32 %v1667_v61  ;;  %1686 = vadd.xlane.f32.xlu0 %v1685_v43  ;;  %v1627_v44 = vpop.xlane.xlu1 %1626  ;;  %1701 = vadd.xlane.f32.xlu1 %v1700_v40 }
 0x295   : > { %v1645_v18 = vsub.f32 %v12540_v52, %v1627_v44  ;;  %11859 = vpow2.f32 %v1663_v38 }
 0x296   : > { %v12576_v45 = vpop.eup %11849 }
 0x297   : > { %v1675_v50 = vmul.f32 1.442695, %v1645_v18  ;;  %v1697_v14 = vsel %vm1582_vm3, %v12576_v45, 0.0  ;;  %v12580_v57 = vpop.eup %11851 }
 0x298   : > { %v1630_v49 = vpop.xlane.xlu1 %1629  ;;  %1698 = vadd.xlane.f32.xlu0 %v1697_v14  ;;  %v1691_v52 = vsel %vm1582_vm3, %v12580_v57, 0.0 }
 0x299   : > { %11861 = vpow2.f32 %v1675_v50  ;;  %v1646_v58 = vsub.f32 %v12538_v24, %v1630_v49 }
 0x29a   : > { %v12583_v59 = vpop.eup %11853  ;;  %11863 = vpow2.f32 %v1671_v46 }
 0x29b   : > { %v1677_v63 = vmul.f32 1.442695, %v1646_v58  ;;  %v1712_v35 = vsel %vm1582_vm3, %v12583_v59, 0.0  ;;  %v12589_v3 = vpop.eup %11855 }
 0x29c   : > { %v1612_v1 = vpop.xlane.xlu1 %1611  ;;  %1692 = vadd.xlane.f32.xlu0 %v1691_v52  ;;  %1713 = vadd.xlane.f32.xlu1 %v1712_v35  ;;  %v1694_v5 = vsel %vm1582_vm3, %v12589_v3, 0.0 }
 0x29d   : > { %11865 = vpow2.f32 %v1677_v63  ;;  %v1640_v48 = vsub.f32 %v12512_v9, %v1612_v1 }
 0x29e   : > { %v12592_v6 = vpop.eup %11857 }
 0x29f   : > { %v1665_v24 = vmul.f32 1.442695, %v1640_v48  ;;  %v1709_v56 = vsel %vm1582_vm3, %v12592_v6, 0.0  ;;  %v12598_v7 = vpop.eup %11859 }
 0x2a0   : > { %v1624_v54 = vpop.xlane.xlu1 %1623  ;;  %1695 = vadd.xlane.f32.xlu0 %v1694_v5  ;;  %1710 = vadd.xlane.f32.xlu1 %v1709_v56  ;;  %v1703_v34 = vsel %vm1582_vm3, %v12598_v7, 0.0 }
 0x2a1   : > { %11867 = vpow2.f32 %v1665_v24  ;;  %v1644_v10 = vsub.f32 %v12521_v41, %v1624_v54  ;;  %v9474_v54 = vld [vmem:[%s14295_s2 + $0x28] sm:$0xff] }
 0x2a3   : > { %v12601_v11 = vpop.eup %11861  ;;  %v1673_v9 = vmul.f32 1.442695, %v1644_v10 }
 0x2a4   : > { %v1721_v53 = vsel %vm1582_vm3, %v12601_v11, 0.0  ;;  %v12607_v15 = vpop.eup %11863  ;;  %1704 = vadd.xlane.f32.xlu0 %v1703_v34 }
 0x2a5   : > { %11869 = vpow2.f32 %v1673_v9  ;;  %1722 = vadd.xlane.f32.xlu1 %v1721_v53  ;;  %v1715_v19 = vsel %vm1582_vm3, %v12607_v15, 0.0 }
 0x2a7   : > { %v12609_v16 = vpop.eup %11865 }
 0x2a8   : > { %v1724_v41 = vsel %vm1582_vm3, %v12609_v16, 0.0  ;;  %1716 = vadd.xlane.f32.xlu0 %v1715_v19 }
 0x2a9   : > { %1725 = vadd.xlane.f32.xlu1 %v1724_v41 }
 0x2ab   : > { %v12615_v47 = vpop.eup %11867 }
 0x2ac   : > { %v1706_v21 = vsel %vm1582_vm3, %v12615_v47, 0.0 }
 0x2ad   : > { %1707 = vadd.xlane.f32.xlu1 %v1706_v21 }
 0x2af   : > { %v12619_v13 = vpop.eup %11869 }
 0x2b0   : > { %v1718_v22 = vsel %vm1582_vm3, %v12619_v13, 0.0 }
 0x2b1   : > { %1719 = vadd.xlane.f32.xlu1 %v1718_v22 }
 0x311   : > { %v1690_v36 = vpop.xlane.xlu1 %1689 }
 0x319   : > { %v1684_v26 = vpop.xlane.xlu0 %1683 }
 0x31a   : > { %11871 = vrcp.f32 %v1684_v26  ;;  %v9452_v26 = vld [vmem:[%s14294_s1 + $0x28] sm:$0xff] }
 0x31d   : > { %v1681_v28 = vpop.xlane.xlu0 %1680 }
 0x31e   : > { %11873 = vrcp.f32 %v1681_v28 }
 0x31f   : > { %11875 = vrcp.f32 %v1690_v36 }
 0x321   : > { %v1687_v61 = vpop.xlane.xlu0 %1686  ;;  %v1702_v38 = vpop.xlane.xlu1 %1701 }
 0x322   : > { %11877 = vrcp.f32 %v1687_v61 }
 0x323   : > { %11879 = vrcp.f32 %v1702_v38 }
 0x324   : > { %v11872_v43 = vpop.eup %11871 }
 0x325   : > { %v1699_v39 = vpop.xlane.xlu0 %1698  ;;  %v1730_v50 = vmul.f32 %v11872_v43, %v12555_v55  ;;  %v9454_v43 = vld [vmem:[%s14294_s1 + $0x38] sm:$0xff] }
 0x326   : > { %11881 = vrcp.f32 %v1699_v39  ;;  %v9453_v39 = vld [vmem:[%s14294_s1 + $0x30] sm:$0xff] }
 0x328   : > { %v11874_v40 = vpop.eup %11873 }
 0x329   : > { %v1728_v44 = vmul.f32 %v11874_v40, %v12560_v12  ;;  %v1693_v18 = vpop.xlane.xlu0 %1692  ;;  %v1714_v46 = vpop.xlane.xlu1 %1713 }
 0x32a   : > { %v11876_v14 = vpop.eup %11875  ;;  %11883 = vrcp.f32 %v1693_v18  ;;  %v9497_v18 = vld [vmem:[%s14296_s3 + $0x30] sm:$0xff] }
 0x32b   : > { %10583 = vmatprep.mubr.msk.f32.mxu0 %vm1582_vm3, %v1728_v44  ;;  %11885 = vrcp.f32 %v1714_v46  ;;  %v1734_v52 = vmul.f32 %v11876_v14, %v12550_v0  ;;  %v9498_v46 = vld [vmem:[%s14296_s3 + $0x38] sm:$0xff]  ;;  %v12795_v14 = vld [vmem:[%s12234_s11 + $0x8] sm:$0xff] }
 0x32c   : > { %v11878_v49 = vpop.eup %11877  ;;  %10584 = vmatmul.mubr.msk.f32.vlgmr.msra.gmra.mrb[28].mxu0 %vm1582_vm3, %v1730_v50  ;;  %v11487_v50 = vpack.c.bf16 %v9498_v46, %v9497_v18 }
 0x32d   : > { %11446 = vmatpush3.bf16.msra.mxu0 %v12493_v37  ;;  %v1732_v58 = vmul.f32 %v11878_v49, %v12565_v8  ;;  %v1696_v63 = vpop.xlane.xlu0 %1695  ;;  %v1711_v12 = vpop.xlane.xlu1 %1710  ;;  %v12800_v49 = vld [vmem:[%s12234_s11 + $0x10] sm:$0xff] }
 0x32e   : > { %11452 = vmatprep.subr.bf16.mxu0 %v12498_v51  ;;  %11887 = vrcp.f32 %v1696_v63  ;;  %v11880_v55 = vpop.eup %11879  ;;  %v12810_v63 = vld [vmem:[%s12234_s11 + $0x20] sm:$0xff] }
 0x32f   : > { %10590 = vmatprep.mubr.msk.f32.mxu1 %vm1582_vm3, %v1732_v58  ;;  %11889 = vrcp.f32 %v1711_v12  ;;  %v1742_v48 = vmul.f32 %v11880_v55, %v12568_v17  ;;  %v9473_v17 = vld [vmem:[%s14295_s2 + $0x20] sm:$0xff]  ;;  %v12805_v58 = vld [vmem:[%s12234_s11 + $0x18] sm:$0xff]  ;;  %v12815_v12 = vld [vmem:[%s12234_s11 + $0x28] sm:$0xff] }
 0x330   : > { %10591 = vmatmul.mubr.msk.f32.vlgmr.msra.gmra.mrb[36].mxu1 %vm1582_vm3, %v1734_v52  ;;  %v11882_v35 = vpop.eup %11881  ;;  %v11475_v53 = vpack.c.bf16 %v9474_v54, %v9473_v17  ;;  %v12820_v52 = vld [vmem:[%s12234_s11 + $0x30] sm:$0xff]  ;;  %v12825_v55 = vld [vmem:[%s12234_s11 + $0x38] sm:$0xff] }
 0x331   : > { %11450 = vmatpush3.bf16.msra.mxu1 %v12495_v42  ;;  %v1705_v37 = vpop.xlane.xlu0 %1704  ;;  %v1740_v1 = vmul.f32 %v11882_v35, %v12576_v45 }
 0x332   : > { %11456 = vmatprep.subr.bf16.mxu1 %v12501_v60  ;;  %v1723_v8 = vpop.xlane.xlu1 %1722  ;;  %11891 = vrcp.f32 %v1705_v37 }
 0x333   : > { %11893 = vrcp.f32 %v1723_v8  ;;  %10604 = vmatprep.mubr.msk.f32.mxu1 %vm1582_vm3, %v1740_v1 }
 0x334   : > { %v11884_v0 = vpop.eup %11883  ;;  %10605 = vmatmul.mubr.msk.f32.vlgmr.msra.gmra.mrb[38].mxu1 %vm1582_vm3, %v1742_v48 }
 0x335   : > { %11458 = vmatpush3.bf16.msra.mxu1 %v12501_v60  ;;  %v1736_v42 = vmul.f32 %v11884_v0, %v12580_v57  ;;  %v1717_v56 = vpop.xlane.xlu0 %1716  ;;  %v11886_v5 = vpop.eup %11885 }
 0x336   : > { %v1726_v24 = vpop.xlane.xlu1 %1725  ;;  %11464 = vmatprep.subr.bf16.mxu1 %v12505_v4  ;;  %v1750_v34 = vmul.f32 %v11886_v5, %v12583_v59  ;;  %v9476_v59 = vld [vmem:[%s14295_s2 + $0x38] sm:$0xff] }
 0x337   : > { %11895 = vrcp.f32 %v1726_v24  ;;  %10597 = vmatprep.mubr.msk.f32.mxu0 %vm1582_vm3, %v1736_v42 }
 0x338   : > { %v11888_v45 = vpop.eup %11887  ;;  %11897 = vrcp.f32 %v1717_v56 }
 0x339   : > { %v11890_v60 = vpop.eup %11889  ;;  %v1738_v57 = vmul.f32 %v11888_v45, %v12589_v3 }
 0x33a   : > { %v1708_v10 = vpop.xlane.xlu1 %1707  ;;  %v1748_v9 = vmul.f32 %v11890_v60, %v12592_v6 }
 0x33b   : > { %11899 = vrcp.f32 %v1708_v10  ;;  %10598 = vmatmul.mubr.msk.f32.vlgmr.msra.gmra.mrb[30].mxu0 %vm1582_vm3, %v1738_v57  ;;  %v12876_v10 = vld [vmem:[%s14298_s5 + $0x1] ss:$0 sm:$0xff] }
 0x33c   : > { %v11892_v19 = vpop.eup %11891  ;;  %11454 = vmatpush3.bf16.msra.mxu0 %v12498_v51  ;;  %10618 = vmatprep.mubr.msk.f32.mxu1 %vm1582_vm3, %v1748_v9  ;;  %v9475_v51 = vld [vmem:[%s14295_s2 + $0x30] sm:$0xff] }
 0x33d   : > { %v11894_v41 = vpop.eup %11893  ;;  %10619 = vmatmul.mubr.msk.f32.vlgmr.msra.gmra.mrb[40].mxu1 %vm1582_vm3, %v1750_v34  ;;  %11460 = vmatprep.subr.bf16.mxu0 %v12503_v2  ;;  %v1744_v3 = vmul.f32 %v11892_v19, %v12598_v7 }
 0x33e   : > { %v1720_v21 = vpop.xlane.xlu1 %1719  ;;  %11466 = vmatpush3.bf16.msra.mxu1 %v12505_v4  ;;  %v1756_v6 = vmul.f32 %v11894_v41, %v12601_v11  ;;  %v11479_v4 = vpack.c.bf16 %v9476_v59, %v9475_v51  ;;  %v9451_v11 = vld [vmem:[%s14294_s1 + $0x20] sm:$0xff] }
 0x33f   : > { %11901 = vrcp.f32 %v1720_v21  ;;  %10611 = vmatprep.mubr.msk.f32.mxu0 %vm1582_vm3, %v1744_v3  ;;  %11476 = vmatprep.subr.bf16.mxu1 %v11475_v53  ;;  %v12888_v51 = vld [vmem:[%s14297_s4 + $0x1] ss:$0 sm:$0xff] }
 0x340   : > { %10632 = vmatprep.mubr.msk.f32.mxu1 %vm1582_vm3, %v1756_v6 }
 0x341   : > { %v11896_v22 = vpop.eup %11895 }
 0x342   : > { %v1758_v7 = vmul.f32 %v11896_v22, %v12609_v16  ;;  %v11898_v28 = vpop.eup %11897  ;;  %v11467_v16 = vpack.c.bf16 %v9452_v26, %v9451_v11 }
 0x343   : > { %v1752_v38 = vmul.f32 %v11898_v28, %v12607_v15  ;;  %v11471_v15 = vpack.c.bf16 %v9454_v43, %v9453_v39 }
 0x344   : > { %10633 = vmatmul.mubr.msk.f32.vlgmr.msra.gmra.mrb[42].mxu1 %vm1582_vm3, %v1758_v7 }
 0x345   : > { %v11900_v36 = vpop.eup %11899  ;;  %11478 = vmatpush3.bf16.msra.mxu1 %v11475_v53  ;;  %10675 = vmatprep.mubr.msk.f32.mxu1 %vm363_vm0, %v12258_v20 }
 0x346   : > { %v1746_v61 = vmul.f32 %v11900_v36, %v12615_v47  ;;  %11480 = vmatprep.subr.bf16.mxu1 %v11479_v4  ;;  %v12776_v47 = vld [vmem:[%s12234_s11 + $0x78] sm:$0xff] }
 0x348   : > { %10612 = vmatmul.mubr.msk.f32.vlgmr.msra.gmra.mrb[32].mxu0 %vm1582_vm3, %v1746_v61 }
 0x349   : > { %v11902_v40 = vpop.eup %11901  ;;  %11462 = vmatpush3.bf16.msra.mxu0 %v12503_v2  ;;  %10625 = vmatprep.mubr.msk.f32.mxu0 %vm1582_vm3, %v1752_v38  ;;  %v12696_v2 = vld [vmem:[%s12234_s11] sm:$0xff] }
 0x34a   : > { %v1754_v20 = vmul.f32 %v11902_v40, %v12619_v13  ;;  %11482 = vmatpush3.bf16.msra.mxu1 %v11479_v4  ;;  %11468 = vmatprep.subr.bf16.mxu0 %v11467_v16  ;;  %v9496_v13 = vld [vmem:[%s14296_s3 + $0x28] sm:$0xff] }
 0x34c   : > { %10626 = vmatmul.mubr.msk.f32.vlgmr.msra.gmra.mrb[34].mxu0 %vm1582_vm3, %v1754_v20 }
 0x34d   : > { %10676 = vmatmul.mubr.msk.f32.vlgmr.msra.gmra.mrb[44].mxu1 %vm363_vm0, %v12267_v23  ;;  %11470 = vmatpush3.bf16.msra.mxu0 %v11467_v16 }
 0x34e   : > { %11472 = vmatprep.subr.bf16.mxu0 %v11471_v15  ;;  %10678 = vmatprep.mubr.msk.f32.mxu1 %vm363_vm0, %v12271_v25 }
 0x34f   : > { %10643 = vmatprep.mubr.msk.f32.mxu0 %vm363_vm0, %v12696_v2 }
 0x351   : > { %11474 = vmatpush3.bf16.msra.mxu0 %v11471_v15  ;;  %10679 = vmatmul.mubr.msk.f32.gmra.mrb[46].mxu1 %vm363_vm0, %v12281_v27 }
 0x352   : > { %10681 = vmatprep.mubr.msk.f32.mxu1 %vm363_vm0, %v12285_v29 }
 0x354   : > { %10644 = vmatmul.mubr.msk.f32.vlgmr.msra.gmra.mrb[36].mxu0 %vm363_vm0, %v12267_v23  ;;  %v12719_v23 = vld [vmem:[%s12234_s11 + $0x40] sm:$0xff] }
 0x355   : > { %10682 = vmatmul.mubr.msk.f32.gmra.mrb[48].mxu1 %vm363_vm0, %v12297_v31  ;;  %10646 = vmatprep.mubr.msk.f32.mxu0 %vm363_vm0, %v12271_v25  ;;  %v12726_v25 = vld [vmem:[%s12234_s11 + $0x48] sm:$0xff] }
 0x356   : > { %10684 = vmatprep.mubr.msk.f32.mxu1 %vm363_vm0, %v12300_v32 }
 0x358   : > { %10647 = vmatmul.mubr.msk.f32.gmra.mrb[38].mxu0 %vm363_vm0, %v12281_v27  ;;  %v12733_v27 = vld [vmem:[%s12234_s11 + $0x50] sm:$0xff] }
 0x359   : > { %10685 = vmatmul.mubr.msk.f32.gmra.mrb[50].mxu1 %vm363_vm0, %v12311_v33  ;;  %10649 = vmatprep.mubr.msk.f32.mxu0 %vm363_vm0, %v12285_v29  ;;  %v12742_v29 = vld [vmem:[%s12234_s11 + $0x58] sm:$0xff] }
 0x35a   : > { %10687 = vmatprep.mubr.msk.f32.mxu1 %vm363_vm0, %v12719_v23 }
 0x35c   : > { %10650 = vmatmul.mubr.msk.f32.gmra.mrb[40].mxu0 %vm363_vm0, %v12297_v31  ;;  %v12747_v31 = vld [vmem:[%s12234_s11 + $0x60] sm:$0xff] }
 0x35d   : > { %10688 = vmatmul.mubr.msk.f32.gmra.mrb[52].mxu1 %vm363_vm0, %v12726_v25  ;;  %10652 = vmatprep.mubr.msk.f32.mxu0 %vm363_vm0, %v12300_v32  ;;  %v12754_v32 = vld [vmem:[%s12234_s11 + $0x68] sm:$0xff] }
 0x35e   : > { %10690 = vmatprep.mubr.msk.f32.mxu1 %vm363_vm0, %v12733_v27 }
 0x360   : > { %10653 = vmatmul.mubr.msk.f32.gmra.mrb[42].mxu0 %vm363_vm0, %v12311_v33  ;;  %v12761_v33 = vld [vmem:[%s12234_s11 + $0x70] sm:$0xff] }
 0x361   : > { %10655 = vmatprep.mubr.msk.f32.mxu0 %vm363_vm0, %v12719_v23  ;;  %10691 = vmatmul.mubr.msk.f32.gmra.mrb[54].mxu1 %vm363_vm0, %v12742_v29 }
 0x362   : > { %10693 = vmatprep.mubr.msk.f32.mxu1 %vm363_vm0, %v12747_v31 }
 0x364   : > { %10656 = vmatmul.mubr.msk.f32.gmra.mrb[44].mxu0 %vm363_vm0, %v12726_v25 }
 0x365   : > { %10694 = vmatmul.mubr.msk.f32.gmra.mrb[56].mxu1 %vm363_vm0, %v12754_v32  ;;  %10658 = vmatprep.mubr.msk.f32.mxu0 %vm363_vm0, %v12733_v27 }
 0x366   : > { %10696 = vmatprep.mubr.msk.f32.mxu1 %vm363_vm0, %v12761_v33 }
 0x368   : > { %10659 = vmatmul.mubr.msk.f32.gmra.mrb[46].mxu0 %vm363_vm0, %v12742_v29 }
 0x369   : > { %10661 = vmatprep.mubr.msk.f32.mxu0 %vm363_vm0, %v12747_v31  ;;  %10697 = vmatmul.mubr.msk.f32.gmra.mrb[58].mxu1 %vm363_vm0, %v12294_v30  ;;  %v9495_v30 = vld [vmem:[%s14296_s3 + $0x20] sm:$0xff] }
 0x36a   : > { %v11483_v44 = vpack.c.bf16 %v9496_v13, %v9495_v30 }
 0x36c   : > { %10662 = vmatmul.mubr.msk.f32.gmra.mrb[48].mxu0 %vm363_vm0, %v12754_v32  ;;  %11484 = vmatprep.subr.bf16.mxu0 %v11483_v44 }
 0x36d   : > { %10664 = vmatprep.mubr.msk.f32.mxu0 %vm363_vm0, %v12761_v33  ;;  %11486 = vmatpush3.bf16.msra.mxu0 %v11483_v44 }
 0x36e   : > { %11488 = vmatprep.subr.bf16.mxu0 %v11487_v50 }
 0x370   : > { %10665 = vmatmul.mubr.msk.f32.gmra.mrb[50].mxu0 %vm363_vm0, %v12776_v47 }
 0x371   : > { %10707 = vmatprep.mubr.msk.f32.mxu0 %vm363_vm0, %v12696_v2  ;;  %11490 = vmatpush3.bf16.msra.mxu0 %v11487_v50 }
 0x374   : > { %10708 = vmatmul.mubr.msk.f32.vlgmr.msra.gmra.mrb[52].mxu0 %vm363_vm0, %v12795_v14 }
 0x375   : > { %10710 = vmatprep.mubr.msk.f32.mxu0 %vm363_vm0, %v12800_v49 }
 0x378   : > { %10711 = vmatmul.mubr.msk.f32.gmra.mrb[54].mxu0 %vm363_vm0, %v12805_v58 }
 0x379   : > { %10713 = vmatprep.mubr.msk.f32.mxu0 %vm363_vm0, %v12810_v63 }
 0x37c   : > { %10714 = vmatmul.mubr.msk.f32.gmra.mrb[56].mxu0 %vm363_vm0, %v12815_v12 }
 0x37d   : > { %10716 = vmatprep.mubr.msk.f32.mxu0 %vm363_vm0, %v12820_v52 }
 0x380   : > { %10717 = vmatmul.mubr.msk.f32.gmra.mrb[58].mxu0 %vm363_vm0, %v12825_v55 }
 0x381   : > { %10719 = vmatprep.mubr.msk.f32.mxu0 %vm363_vm0, %v12719_v23 }
 0x384   : > { %10720 = vmatmul.mubr.msk.f32.gmra.mrb[60].mxu0 %vm363_vm0, %v12726_v25 }
 0x385   : > { %10722 = vmatprep.mubr.msk.f32.mxu0 %vm363_vm0, %v12733_v27 }
 0x388   : > { %10723 = vmatmul.mubr.msk.f32.gmra.mrb[62].mxu0 %vm363_vm0, %v12742_v29 }
 0x389   : > { %10725 = vmatprep.mubr.msk.f32.mxu0 %vm363_vm0, %v12747_v31 }
 0x38c   : > { %10726 = vmatmul.mubr.msk.f32.gmra.mrb[64].mxu0 %vm363_vm0, %v12754_v32 }
 0x38d   : > { %10728 = vmatprep.mubr.msk.f32.mxu0 %vm363_vm0, %v12761_v33 }
 0x390   : > { %10729 = vmatmul.mubr.msk.f32.gmra.mrb[66].mxu0 %vm363_vm0, %v12776_v47 }
 0x3ff   : > { %v12845_v35 = vpop.f32.mrb[28].mxu0 }
 0x400   : > { %v12847_v37 = vpop.f32.mrb[29].mxu0 }
 0x403   : > { %v12849_v8 = vpop.f32.mrb[36].mxu1 }
 0x404   : > { %v12851_v1 = vpop.f32.mrb[37].mxu1 }
 0x407   : > { %v12853_v48 = vpop.f32.mrb[38].mxu1 }
 0x408   : > { %v12855_v0 = vpop.f32.mrb[39].mxu1 }
 0x40e   : > { %v12857_v24 = vpop.f32.mrb[30].mxu0 }
 0x40f   : > { %v12859_v42 = vpop.f32.mrb[31].mxu0 }
 0x410   : > { %v12861_v56 = vpop.f32.mrb[40].mxu1 }
 0x411   : > { %14308 = vst [vmem:[#allocation3_spill] sm:$0xff] %v12861_v56  ;;  %v12863_v5 = vpop.f32.mrb[41].mxu1 }
 0x417   : > { %v12865_v45 = vpop.f32.mrb[42].mxu1 }
 0x418   : > { %14309 = vst [vmem:[#allocation4_spill] sm:$0xff] %v12865_v45  ;;  %v12867_v17 = vpop.f32.mrb[43].mxu1 }
 0x419   : > { %14310 = vst [vmem:[#allocation5_spill] sm:$0xff] %v12867_v17 }
 0x41b   : > { %v12869_v54 = vpop.f32.mrb[32].mxu0 }
 0x41c   : > { %v12871_v60 = vpop.f32.mrb[33].mxu0 }
 0x41f   : > { %v12878_v57 = vpop.f32.mrb[34].mxu0 }
 0x420   : > { %14311 = vst [vmem:[#allocation6_spill] sm:$0xff] %v12878_v57  ;;  %v10677_v9 = vpop.f32.mrb[44].mxu1  ;;  %v12880_v34 = vpop.f32.mrb[35].mxu0 }
 0x421   : > { %14312 = vst [vmem:[#allocation7_spill] sm:$0xff] %v12880_v34  ;;  %v2667_v53 = vadd.f32 %v10677_v9, %v12876_v10  ;;  %v2661_v19 = vpop.f32.mrb[45].mxu1 }
 0x422   : > { %v2662_v41 = vadd.f32 %v12876_v10, %v2661_v19 }
 0x424   : > { %v11491_v21 = vpack.c.bf16 %v2667_v53, %v2662_v41  ;;  %v10680_v3 = vpop.f32.mrb[46].mxu1 }
 0x425   : > { %v2677_v6 = vadd.f32 %v10680_v3, %v12876_v10  ;;  %v2671_v59 = vpop.f32.mrb[47].mxu1 }
 0x426   : > { %11493 = vmatprep.subr.msk.bf16.mxu1 %vm12404_vm2, %v11491_v21  ;;  %v2672_v22 = vadd.f32 %v12876_v10, %v2671_v59 }
 0x427   : > { %11496 = vmatpush3.bf16.xpose.msk.msra.mxu1 %vm12404_vm2, %v11491_v21  ;;  %v10645_v7 = vpop.f32.mrb[36].mxu0 }
 0x428   : > { %v2493_v4 = vadd.f32 %v10645_v7, %v12888_v51  ;;  %v11497_v11 = vpack.c.bf16 %v2677_v6, %v2672_v22  ;;  %v2487_v26 = vpop.f32.mrb[37].mxu0  ;;  %v10683_v28 = vpop.f32.mrb[48].mxu1 }
 0x429   : > { %v2488_v36 = vadd.f32 %v12888_v51, %v2487_v26  ;;  %v2687_v61 = vadd.f32 %v10683_v28, %v12876_v10  ;;  %v2681_v16 = vpop.f32.mrb[49].mxu1 }
 0x42a   : > { %11499 = vmatprep.subr.msk.bf16.mxu1 %vm12404_vm2, %v11497_v11  ;;  %v2682_v38 = vadd.f32 %v12876_v10, %v2681_v16  ;;  %v2567_v40 = vmul.f32 0.35355338, %v2493_v4 }
 0x42b   : > { %v2566_v39 = vmul.f32 0.35355338, %v2488_v36  ;;  %v10648_v43 = vpop.f32.mrb[38].mxu0 }
 0x42c   : > { %v2497_v20 = vpop.f32.mrb[39].mxu0  ;;  %v11503_v15 = vpack.c.bf16 %v2687_v61, %v2682_v38  ;;  %v10686_v30 = vpop.f32.mrb[50].mxu1  ;;  %v2503_v46 = vadd.f32 %v10648_v43, %v12888_v51 }
 0x42d   : > { %10735 = vmatprep.mubr.msk.f32.mxu1 %vm885_vm1, %v2566_v39  ;;  %v2498_v13 = vadd.f32 %v12888_v51, %v2497_v20  ;;  %v2697_v44 = vadd.f32 %v10686_v30, %v12876_v10  ;;  %v2691_v18 = vpop.f32.mrb[51].mxu1 }
 0x42e   : > { %10736 = vmatmul.mubr.msk.f32.vlgmr.msra.gmra.mrb[60].mxu1 %vm885_vm1, %v2567_v40  ;;  %v2692_v50 = vadd.f32 %v12876_v10, %v2691_v18  ;;  %v2569_v22 = vmul.f32 0.35355338, %v2503_v46 }
 0x42f   : > { %11502 = vmatpush3.bf16.xpose.msk.msra.mxu1 %vm12404_vm2, %v11497_v11  ;;  %v2568_v9 = vmul.f32 0.35355338, %v2498_v13  ;;  %v10651_v53 = vpop.f32.mrb[40].mxu0 }
 0x430   : > { %v11509_v19 = vpack.c.bf16 %v2697_v44, %v2692_v50  ;;  %v10689_v41 = vpop.f32.mrb[52].mxu1  ;;  %11505 = vmatprep.subr.msk.bf16.mxu1 %vm12404_vm2, %v11503_v15  ;;  %v2507_v21 = vpop.f32.mrb[41].mxu0  ;;  %v2513_v38 = vadd.f32 %v10651_v53, %v12888_v51 }
 0x431   : > { %v2707_v3 = vadd.f32 %v10689_v41, %v12876_v10  ;;  %v2701_v6 = vpop.f32.mrb[53].mxu1  ;;  %10742 = vmatprep.mubr.msk.f32.mxu1 %vm885_vm1, %v2568_v9  ;;  %v2508_v59 = vadd.f32 %v12888_v51, %v2507_v21 }
 0x432   : > { %v2702_v7 = vadd.f32 %v12876_v10, %v2701_v6  ;;  %v2571_v50 = vmul.f32 0.35355338, %v2513_v38 }
 0x433   : > { %v10654_v4 = vpop.f32.mrb[42].mxu0  ;;  %v2570_v26 = vmul.f32 0.35355338, %v2508_v59 }
 0x434   : > { %v11515_v11 = vpack.c.bf16 %v2707_v3, %v2702_v7  ;;  %v2517_v28 = vpop.f32.mrb[43].mxu0  ;;  %v10692_v36 = vpop.f32.mrb[54].mxu1 }
 0x435   : > { %v2717_v61 = vadd.f32 %v10692_v36, %v12876_v10  ;;  %v2711_v16 = vpop.f32.mrb[55].mxu1  ;;  %v2518_v43 = vadd.f32 %v12888_v51, %v2517_v28 }
 0x436   : > { %10743 = vmatmul.mubr.msk.f32.vlgmr.msra.gmra.mrb[62].mxu1 %vm885_vm1, %v2569_v22  ;;  %11517 = vmatprep.subr.msk.bf16.mxu0 %vm12404_vm2, %v11515_v11  ;;  %v2712_v39 = vadd.f32 %v12876_v10, %v2711_v16 }
 0x437   : > { %11508 = vmatpush3.bf16.xpose.msk.msra.mxu1 %vm12404_vm2, %v11503_v15  ;;  %v10657_v40 = vpop.f32.mrb[44].mxu0  ;;  %11520 = vmatpush3.bf16.xpose.msk.msra.mxu0 %vm12404_vm2, %v11515_v11  ;;  %v2572_v41 = vmul.f32 0.35355338, %v2518_v43 }
 0x438   : > { %v2533_v20 = vadd.f32 %v10657_v40, %v12888_v51  ;;  %v2527_v30 = vpop.f32.mrb[45].mxu0  ;;  %10749 = vmatprep.mubr.msk.f32.mxu1 %vm885_vm1, %v2570_v26  ;;  %11511 = vmatprep.subr.msk.bf16.mxu1 %vm12404_vm2, %v11509_v19  ;;  %v11521_v13 = vpack.c.bf16 %v2717_v61, %v2712_v39  ;;  %v10695_v44 = vpop.f32.mrb[56].mxu1  ;;  %v2523_v61 = vadd.f32 %v10654_v4, %v12888_v51 }
 0x439   : > { %v2528_v18 = vadd.f32 %v12888_v51, %v2527_v30  ;;  %v2727_v15 = vadd.f32 %v10695_v44, %v12876_v10  ;;  %v2721_v46 = vpop.f32.mrb[57].mxu1 }
 0x43a   : > { %v2575_v9 = vmul.f32 0.35355338, %v2533_v20  ;;  %v2722_v53 = vadd.f32 %v12876_v10, %v2721_v46  ;;  %v2573_v20 = vmul.f32 0.35355338, %v2523_v61 }
 0x43b   : > { %v2574_v21 = vmul.f32 0.35355338, %v2528_v18  ;;  %v10660_v3 = vpop.f32.mrb[46].mxu0 }
 0x43c   : > { %v11527_v6 = vpack.c.bf16 %v2727_v15, %v2722_v53  ;;  %v2537_v59 = vpop.f32.mrb[47].mxu0  ;;  %v10698_v22 = vpop.f32.mrb[58].mxu1  ;;  %v2543_v18 = vadd.f32 %v10660_v3, %v12888_v51 }
 0x43d   : > { %10763 = vmatprep.mubr.msk.f32.mxu0 %vm885_vm1, %v2574_v21  ;;  %v2737_v7 = vadd.f32 %v10698_v22, %v12876_v10  ;;  %v2731_v11 = vpop.f32.mrb[59].mxu1  ;;  %v2538_v28 = vadd.f32 %v12888_v51, %v2537_v59 }
 0x43e   : > { %10750 = vmatmul.mubr.msk.f32.vlgmr.msra.gmra.mrb[64].mxu1 %vm885_vm1, %v2571_v50  ;;  %10764 = vmatmul.mubr.msk.f32.vlgmr.msra.gmra.mrb[68].mxu0 %vm885_vm1, %v2575_v9  ;;  %v2732_v26 = vadd.f32 %v12876_v10, %v2731_v11  ;;  %v2577_v46 = vmul.f32 0.35355338, %v2543_v18  ;;  %v9500_v9 = vld [vmem:[%s14299_s6 + $0x1] ss:$0 sm:$0xff] }
 0x43f   : > { %11514 = vmatpush3.bf16.xpose.msk.msra.mxu1 %vm12404_vm2, %v11509_v19  ;;  %10756 = vmatprep.mubr.msk.f32.mxu1 %vm885_vm1, %v2572_v41  ;;  %v10663_v36 = vpop.f32.mrb[48].mxu0  ;;  %v2576_v39 = vmul.f32 0.35355338, %v2538_v28 }
 0x440   : > { %11523 = vmatprep.subr.msk.bf16.mxu1 %vm12404_vm2, %v11521_v13  ;;  %11529 = vmatprep.subr.msk.bf16.mxu0 %vm12404_vm2, %v11527_v6  ;;  %v2553_v16 = vadd.f32 %v10663_v36, %v12888_v51  ;;  %v11533_v38 = vpack.c.bf16 %v2737_v7, %v2732_v26  ;;  %v2547_v10 = vpop.f32.mrb[49].mxu0 }
 0x441   : > { %11532 = vmatpush3.bf16.xpose.msk.msra.mxu0 %vm12404_vm2, %v11527_v6  ;;  %v2548_v19 = vadd.f32 %v12888_v51, %v2547_v10 }
 0x442   : > { %v2579_v4 = vmul.f32 0.35355338, %v2553_v16 }
 0x443   : > { %v2578_v43 = vmul.f32 0.35355338, %v2548_v19  ;;  %v10666_v40 = vpop.f32.mrb[50].mxu0 }
 0x444   : > { %v2557_v30 = vpop.f32.mrb[51].mxu0 }
 0x445   : > { %10777 = vmatprep.mubr.msk.f32.mxu0 %vm885_vm1, %v2578_v43  ;;  %v2558_v44 = vadd.f32 %v12888_v51, %v2557_v30 }
 0x446   : > { %10757 = vmatmul.mubr.msk.f32.vlgmr.msra.gmra.mrb[66].mxu1 %vm885_vm1, %v2573_v20 }
 0x447   : > { %11526 = vmatpush3.bf16.xpose.msk.msra.mxu1 %vm12404_vm2, %v11521_v13  ;;  %10770 = vmatprep.mubr.msk.f32.mxu1 %vm885_vm1, %v2576_v39  ;;  %v2580_v15 = vmul.f32 0.35355338, %v2558_v44  ;;  %v2563_v13 = vadd.f32 %v10666_v40, %v12888_v51  ;;  %v10709_v53 = vpop.f32.mrb[52].mxu0 }
 0x448   : > { %11535 = vmatprep.subr.msk.bf16.mxu1 %vm12404_vm2, %v11533_v38  ;;  %10778 = vmatmul.mubr.msk.f32.vlgmr.msra.gmra.mrb[70].mxu0 %vm885_vm1, %v2579_v4  ;;  %v2825_v41 = vadd.f32 %v10709_v53, %v9500_v9  ;;  %v2819_v21 = vpop.f32.mrb[53].mxu0 }
 0x449   : > { %v2581_v50 = vmul.f32 0.35355338, %v2563_v13  ;;  %v2820_v3 = vadd.f32 %v9500_v9, %v2819_v21 }
 0x44b   : > { %v11539_v6 = vpack.c.bf16 %v2825_v41, %v2820_v3  ;;  %v10712_v59 = vpop.f32.mrb[54].mxu0 }
 0x44c   : > { %v2835_v22 = vadd.f32 %v10712_v59, %v9500_v9  ;;  %v2829_v7 = vpop.f32.mrb[55].mxu0 }
 0x44d   : > { %v2830_v11 = vadd.f32 %v9500_v9, %v2829_v7  ;;  %11540 = vmatprep.subr.bf16.mxu0 %v11539_v6 }
 0x44e   : > { %10771 = vmatmul.mubr.msk.f32.vlgmr.msra.gmra.mrb[68].mxu1 %vm885_vm1, %v2577_v46  ;;  %11542 = vmatpush3.bf16.msra.mxu0 %v11539_v6 }
 0x44f   : > { %11538 = vmatpush3.bf16.xpose.msk.msra.mxu1 %vm12404_vm2, %v11533_v38  ;;  %10784 = vmatprep.mubr.msk.f32.mxu1 %vm885_vm1, %v2580_v15  ;;  %v11543_v26 = vpack.c.bf16 %v2835_v22, %v2830_v11  ;;  %v10715_v51 = vpop.f32.mrb[56].mxu0 }
 0x450   : > { %v2845_v28 = vadd.f32 %v10715_v51, %v9500_v9  ;;  %v2839_v36 = vpop.f32.mrb[57].mxu0 }
 0x451   : > { %11544 = vmatprep.subr.bf16.mxu1 %v11543_v26  ;;  %v2840_v61 = vadd.f32 %v9500_v9, %v2839_v36 }
 0x453   : > { %v10718_v16 = vpop.f32.mrb[58].mxu0  ;;  %v12970_v19 = vpack.c.bf16 %v2845_v28, %v2840_v61 }
 0x454   : > { %v2855_v38 = vadd.f32 %v10718_v16, %v9500_v9  ;;  %v2849_v10 = vpop.f32.mrb[59].mxu0 }
 0x455   : > { %v2850_v39 = vadd.f32 %v9500_v9, %v2849_v10  ;;  %11548 = vmatprep.subr.bf16.mxu0 %v12970_v19 }
 0x456   : > { %10785 = vmatmul.mubr.msk.f32.vlgmr.msra.gmra.mrb[70].mxu1 %vm885_vm1, %v2581_v50 }
 0x457   : > { %11546 = vmatpush3.bf16.msra.mxu1 %v11543_v26  ;;  %v12972_v43 = vpack.c.bf16 %v2855_v38, %v2850_v39  ;;  %v10721_v40 = vpop.f32.mrb[60].mxu0 }
 0x458   : > { %v2865_v20 = vadd.f32 %v10721_v40, %v9500_v9  ;;  %v2859_v4 = vpop.f32.mrb[61].mxu0 }
 0x459   : > { %11552 = vmatprep.subr.bf16.mxu1 %v12972_v43  ;;  %v2860_v30 = vadd.f32 %v9500_v9, %v2859_v4 }
 0x45b   : > { %v10724_v44 = vpop.f32.mrb[62].mxu0  ;;  %v12976_v46 = vpack.c.bf16 %v2865_v20, %v2860_v30 }
 0x45c   : > { %v2875_v18 = vadd.f32 %v10724_v44, %v9500_v9  ;;  %v2869_v15 = vpop.f32.mrb[63].mxu0 }
 0x45d   : > { %v2870_v13 = vadd.f32 %v9500_v9, %v2869_v15 }
 0x45f   : > { %v10727_v50 = vpop.f32.mrb[64].mxu0  ;;  %v12978_v41 = vpack.c.bf16 %v2875_v18, %v2870_v13 }
 0x460   : > { %v2885_v53 = vadd.f32 %v10727_v50, %v9500_v9  ;;  %v2879_v21 = vpop.f32.mrb[65].mxu0 }
 0x461   : > { %v2880_v3 = vadd.f32 %v9500_v9, %v2879_v21 }
 0x463   : > { %v10730_v6 = vpop.f32.mrb[66].mxu0  ;;  %v12980_v7 = vpack.c.bf16 %v2885_v53, %v2880_v3 }
 0x464   : > { %v2895_v59 = vadd.f32 %v10730_v6, %v9500_v9  ;;  %v2889_v22 = vpop.f32.mrb[67].mxu0 }
 0x465   : > { %v2890_v11 = vadd.f32 %v9500_v9, %v2889_v22 }
 0x467   : > { %v12982_v26 = vpack.c.bf16 %v2895_v59, %v2890_v11 }
 0x501   : > { %v10737_v51 = vpop.f32.mrb[60].mxu1 }
 0x502   : > { %v2976_v28 = vpop.f32.mrb[61].mxu1  ;;  %v3597_v36 = vsel %vm1582_vm3, %v10737_v51, -inf }
 0x503   : > { %3598 = vmax.xlane.f32.xlu1 %v3597_v36  ;;  %v3594_v61 = vsel %vm1582_vm3, %v2976_v28, -inf }
 0x504   : > { %3595 = vmax.xlane.f32.xlu0 %v3594_v61 }
 0x509   : > { %v10744_v16 = vpop.f32.mrb[62].mxu1 }
 0x50a   : > { %v3063_v38 = vpop.f32.mrb[63].mxu1  ;;  %v3603_v10 = vsel %vm1582_vm3, %v10744_v16, -inf }
 0x50b   : > { %3604 = vmax.xlane.f32.xlu1 %v3603_v10  ;;  %v3600_v39 = vsel %vm1582_vm3, %v3063_v38, -inf }
 0x50c   : > { %3601 = vmax.xlane.f32.xlu0 %v3600_v39 }
 0x511   : > { %v10751_v40 = vpop.f32.mrb[64].mxu1  ;;  %v12988_v9 = vpop.f32.mrb[68].mxu0 }
 0x512   : > { %v3150_v20 = vpop.f32.mrb[65].mxu1  ;;  %v3609_v4 = vsel %vm1582_vm3, %v10751_v40, -inf  ;;  %v12991_v30 = vpop.f32.mrb[69].mxu0  ;;  %v3621_v18 = vsel %vm1582_vm3, %v12988_v9, -inf }
 0x513   : > { %3610 = vmax.xlane.f32.xlu1 %v3609_v4  ;;  %v3606_v44 = vsel %vm1582_vm3, %v3150_v20, -inf  ;;  %v3618_v15 = vsel %vm1582_vm3, %v12991_v30, -inf }
 0x514   : > { %3607 = vmax.xlane.f32.xlu0 %v3606_v44 }
 0x517   : > { %3622 = vmax.xlane.f32.xlu1 %v3621_v18 }
 0x518   : > { %3619 = vmax.xlane.f32.xlu0 %v3618_v15 }
 0x519   : > { %v12998_v13 = vpop.f32.mrb[66].mxu1 }
 0x51a   : > { %v13000_v50 = vpop.f32.mrb[67].mxu1  ;;  %v3615_v53 = vsel %vm1582_vm3, %v12998_v13, -inf }
 0x51b   : > { %3616 = vmax.xlane.f32.xlu1 %v3615_v53  ;;  %v3612_v21 = vsel %vm1582_vm3, %v13000_v50, -inf  ;;  %v13006_v3 = vpop.f32.mrb[70].mxu0 }
 0x51c   : > { %3613 = vmax.xlane.f32.xlu0 %v3612_v21  ;;  %v13008_v6 = vpop.f32.mrb[71].mxu0  ;;  %v3633_v44 = vsel %vm1582_vm3, %v13006_v3, -inf }
 0x51d   : > { %v3630_v18 = vsel %vm1582_vm3, %v13008_v6, -inf }
 0x521   : > { %v13010_v59 = vpop.f32.mrb[68].mxu1 }
 0x522   : > { %v13012_v22 = vpop.f32.mrb[69].mxu1  ;;  %v3627_v11 = vsel %vm1582_vm3, %v13010_v59, -inf }
 0x523   : > { %3628 = vmax.xlane.f32.xlu1 %v3627_v11  ;;  %v3624_v36 = vsel %vm1582_vm3, %v13012_v22, -inf }
 0x524   : > { %3625 = vmax.xlane.f32.xlu0 %v3624_v36 }
 0x529   : > { %v13018_v61 = vpop.f32.mrb[70].mxu1 }
 0x52a   : > { %v13020_v10 = vpop.f32.mrb[71].mxu1  ;;  %v3639_v39 = vsel %vm1582_vm3, %v13018_v61, -inf }
 0x52b   : > { %3640 = vmax.xlane.f32.xlu1 %v3639_v39  ;;  %v3636_v4 = vsel %vm1582_vm3, %v13020_v10, -inf }
 0x52c   : > { %3637 = vmax.xlane.f32.xlu0 %v3636_v4 }
 0x52f   : > { %3634 = vmax.xlane.f32.xlu1 %v3633_v44 }
 0x530   : > { %3631 = vmax.xlane.f32.xlu0 %v3630_v18 }
 0x590   : > { %v3599_v15 = vpop.xlane.xlu1 %3598 }
 0x591   : > { %v3643_v53 = vsub.f32 %v10737_v51, %v3599_v15  ;;  %v3596_v21 = vpop.xlane.xlu0 %3595 }
 0x592   : > { %v3642_v11 = vsub.f32 %v2976_v28, %v3596_v21 }
 0x593   : > { %v3660_v36 = vmul.f32 1.442695, %v3643_v53 }
 0x594   : > { %v3658_v62 = vmul.f32 1.442695, %v3642_v11 }
 0x595   : > { %11903 = vpow2.f32 %v3660_v36 }
 0x596   : > { %11905 = vpow2.f32 %v3658_v62 }
 0x598   : > { %v3605_v39 = vpop.xlane.xlu1 %3604 }
 0x599   : > { %v3645_v45 = vsub.f32 %v10744_v16, %v3605_v39  ;;  %v3602_v17 = vpop.xlane.xlu0 %3601 }
 0x59a   : > { %v3644_v4 = vsub.f32 %v3063_v38, %v3602_v17 }
 0x59b   : > { %v3664_v57 = vmul.f32 1.442695, %v3645_v45 }
 0x59c   : > { %v3662_v34 = vmul.f32 1.442695, %v3644_v4 }
 0x59d   : > { %11907 = vpow2.f32 %v3664_v57 }
 0x59e   : > { %11909 = vpow2.f32 %v3662_v34 }
 0x59f   : > { %v13030_v44 = vpop.eup %11903 }
 0x5a0   : > { %v13032_v56 = vpop.eup %11905  ;;  %v3611_v18 = vpop.xlane.xlu1 %3610  ;;  %v3693_v51 = vsel %vm1582_vm3, %v13030_v44, 0.0 }
 0x5a1   : > { %v3647_v28 = vsub.f32 %v10751_v40, %v3611_v18  ;;  %v3608_v15 = vpop.xlane.xlu0 %3607  ;;  %3694 = vadd.xlane.f32.xlu1 %v3693_v51  ;;  %v3690_v62 = vsel %vm1582_vm3, %v13032_v56, 0.0 }
 0x5a2   : > { %v3646_v16 = vsub.f32 %v3150_v20, %v3608_v15  ;;  %3691 = vadd.xlane.f32.xlu0 %v3690_v62 }
 0x5a3   : > { %v3668_v45 = vmul.f32 1.442695, %v3647_v28 }
 0x5a4   : > { %v3666_v17 = vmul.f32 1.442695, %v3646_v16  ;;  %v3623_v57 = vpop.xlane.xlu1 %3622 }
 0x5a5   : > { %11911 = vpow2.f32 %v3668_v45  ;;  %v3651_v34 = vsub.f32 %v12988_v9, %v3623_v57  ;;  %v3620_v38 = vpop.xlane.xlu0 %3619 }
 0x5a6   : > { %11913 = vpow2.f32 %v3666_v17  ;;  %v3650_v53 = vsub.f32 %v12991_v30, %v3620_v38 }
 0x5a7   : > { %v13040_v21 = vpop.eup %11907  ;;  %v3676_v40 = vmul.f32 1.442695, %v3651_v34 }
 0x5a8   : > { %v13042_v11 = vpop.eup %11909  ;;  %v3674_v36 = vmul.f32 1.442695, %v3650_v53  ;;  %v3617_v39 = vpop.xlane.xlu1 %3616  ;;  %v3699_v20 = vsel %vm1582_vm3, %v13040_v21, 0.0 }
 0x5a9   : > { %11915 = vpow2.f32 %v3676_v40  ;;  %v3649_v4 = vsub.f32 %v12998_v13, %v3617_v39  ;;  %v3614_v18 = vpop.xlane.xlu0 %3613  ;;  %3700 = vadd.xlane.f32.xlu1 %v3699_v20  ;;  %v3696_v9 = vsel %vm1582_vm3, %v13042_v11, 0.0 }
 0x5aa   : > { %11917 = vpow2.f32 %v3674_v36  ;;  %v3648_v30 = vsub.f32 %v13000_v50, %v3614_v18  ;;  %3697 = vadd.xlane.f32.xlu0 %v3696_v9 }
 0x5ab   : > { %v3672_v51 = vmul.f32 1.442695, %v3649_v4 }
 0x5ac   : > { %v3670_v28 = vmul.f32 1.442695, %v3648_v30 }
 0x5ad   : > { %11919 = vpow2.f32 %v3672_v51 }
 0x5ae   : > { %11921 = vpow2.f32 %v3670_v28 }
 0x5af   : > { %v13050_v15 = vpop.eup %11911 }
 0x5b0   : > { %v13052_v62 = vpop.eup %11913  ;;  %v3629_v16 = vpop.xlane.xlu1 %3628  ;;  %v3705_v13 = vsel %vm1582_vm3, %v13050_v15, 0.0 }
 0x5b1   : > { %v3653_v45 = vsub.f32 %v13010_v59, %v3629_v16  ;;  %v3626_v17 = vpop.xlane.xlu0 %3625  ;;  %3706 = vadd.xlane.f32.xlu1 %v3705_v13  ;;  %v3702_v50 = vsel %vm1582_vm3, %v13052_v62, 0.0 }
 0x5b2   : > { %v3652_v57 = vsub.f32 %v13012_v22, %v3626_v17  ;;  %3703 = vadd.xlane.f32.xlu0 %v3702_v50 }
 0x5b3   : > { %v13060_v34 = vpop.eup %11915  ;;  %v3680_v38 = vmul.f32 1.442695, %v3653_v45 }
 0x5b4   : > { %v13062_v53 = vpop.eup %11917  ;;  %v3678_v40 = vmul.f32 1.442695, %v3652_v57  ;;  %v3717_v36 = vsel %vm1582_vm3, %v13060_v34, 0.0 }
 0x5b5   : > { %11923 = vpow2.f32 %v3680_v38  ;;  %3718 = vadd.xlane.f32.xlu1 %v3717_v36  ;;  %v3714_v59 = vsel %vm1582_vm3, %v13062_v53, 0.0 }
 0x5b6   : > { %11925 = vpow2.f32 %v3678_v40  ;;  %3715 = vadd.xlane.f32.xlu0 %v3714_v59 }
 0x5b7   : > { %v13068_v39 = vpop.eup %11919 }
 0x5b8   : > { %v13070_v22 = vpop.eup %11921  ;;  %v3641_v20 = vpop.xlane.xlu1 %3640  ;;  %v3711_v4 = vsel %vm1582_vm3, %v13068_v39, 0.0 }
 0x5b9   : > { %v3657_v18 = vsub.f32 %v13018_v61, %v3641_v20  ;;  %3712 = vadd.xlane.f32.xlu1 %v3711_v4  ;;  %v3638_v9 = vpop.xlane.xlu0 %3637  ;;  %v3708_v30 = vsel %vm1582_vm3, %v13070_v22, 0.0 }
 0x5ba   : > { %v3656_v51 = vsub.f32 %v13020_v10, %v3638_v9  ;;  %3709 = vadd.xlane.f32.xlu0 %v3708_v30 }
 0x5bb   : > { %v3688_v28 = vmul.f32 1.442695, %v3657_v18 }
 0x5bc   : > { %v3686_v16 = vmul.f32 1.442695, %v3656_v51  ;;  %v3635_v13 = vpop.xlane.xlu1 %3634 }
 0x5bd   : > { %11927 = vpow2.f32 %v3688_v28  ;;  %v3655_v45 = vsub.f32 %v13006_v3, %v3635_v13  ;;  %v3632_v17 = vpop.xlane.xlu0 %3631 }
 0x5be   : > { %11929 = vpow2.f32 %v3686_v16  ;;  %v3654_v50 = vsub.f32 %v13008_v6, %v3632_v17 }
 0x5bf   : > { %v13080_v57 = vpop.eup %11923  ;;  %v3684_v61 = vmul.f32 1.442695, %v3655_v45 }
 0x5c0   : > { %v13082_v38 = vpop.eup %11925  ;;  %v3682_v40 = vmul.f32 1.442695, %v3654_v50  ;;  %v3723_v10 = vsel %vm1582_vm3, %v13080_v57, 0.0 }
 0x5c1   : > { %11931 = vpow2.f32 %v3684_v61  ;;  %3724 = vadd.xlane.f32.xlu1 %v3723_v10  ;;  %v3720_v36 = vsel %vm1582_vm3, %v13082_v38, 0.0 }
 0x5c2   : > { %11933 = vpow2.f32 %v3682_v40  ;;  %3721 = vadd.xlane.f32.xlu0 %v3720_v36 }
 0x5c7   : > { %v13088_v3 = vpop.eup %11927 }
 0x5c8   : > { %v13090_v59 = vpop.eup %11929  ;;  %v3735_v6 = vsel %vm1582_vm3, %v13088_v3, 0.0 }
 0x5c9   : > { %3736 = vadd.xlane.f32.xlu1 %v3735_v6  ;;  %v3732_v20 = vsel %vm1582_vm3, %v13090_v59, 0.0 }
 0x5ca   : > { %3733 = vadd.xlane.f32.xlu0 %v3732_v20 }
 0x5cb   : > { %v13096_v4 = vpop.eup %11931 }
 0x5cc   : > { %v13098_v18 = vpop.eup %11933  ;;  %v3729_v9 = vsel %vm1582_vm3, %v13096_v4, 0.0 }
 0x5cd   : > { %3730 = vadd.xlane.f32.xlu1 %v3729_v9  ;;  %v3726_v30 = vsel %vm1582_vm3, %v13098_v18, 0.0 }
 0x5ce   : > { %3727 = vadd.xlane.f32.xlu0 %v3726_v30 }
 0x62e   : > { %v3695_v51 = vpop.xlane.xlu1 %3694 }
 0x62f   : > { %11935 = vrcp.f32 %v3695_v51  ;;  %v3692_v28 = vpop.xlane.xlu0 %3691 }
 0x630   : > { %11937 = vrcp.f32 %v3692_v28 }
 0x636   : > { %v3701_v16 = vpop.xlane.xlu1 %3700 }
 0x637   : > { %11939 = vrcp.f32 %v3701_v16  ;;  %v3698_v13 = vpop.xlane.xlu0 %3697 }
 0x638   : > { %11941 = vrcp.f32 %v3698_v13 }
 0x639   : > { %v11936_v45 = vpop.eup %11935 }
 0x63a   : > { %v11938_v17 = vpop.eup %11937  ;;  %v3741_v61 = vmul.f32 %v11936_v45, %v13030_v44 }
 0x63b   : > { %v3739_v50 = vmul.f32 %v11938_v17, %v13032_v56 }
 0x63d   : > { %10791 = vmatprep.mubr.msk.f32.mxu0 %vm1582_vm3, %v3739_v50 }
 0x63e   : > { %v3707_v40 = vpop.xlane.xlu1 %3706  ;;  %10792 = vmatmul.mubr.msk.f32.vlgmr.msra.gmra.mrb[72].mxu0 %vm1582_vm3, %v3741_v61 }
 0x63f   : > { %11943 = vrcp.f32 %v3707_v40  ;;  %11550 = vmatpush3.bf16.msra.mxu0 %v12970_v19  ;;  %v3704_v10 = vpop.xlane.xlu0 %3703 }
 0x640   : > { %11945 = vrcp.f32 %v3704_v10  ;;  %11556 = vmatprep.subr.bf16.mxu0 %v12976_v46 }
 0x641   : > { %v11940_v36 = vpop.eup %11939 }
 0x642   : > { %v11942_v6 = vpop.eup %11941  ;;  %v3719_v20 = vpop.xlane.xlu1 %3718  ;;  %v3745_v44 = vmul.f32 %v11940_v36, %v13040_v21 }
 0x643   : > { %11947 = vrcp.f32 %v3719_v20  ;;  %v3716_v9 = vpop.xlane.xlu0 %3715  ;;  %v3743_v56 = vmul.f32 %v11942_v6, %v13042_v11 }
 0x644   : > { %11949 = vrcp.f32 %v3716_v9 }
 0x645   : > { %10798 = vmatprep.mubr.msk.f32.mxu1 %vm1582_vm3, %v3743_v56  ;;  %v9600_v56 = vld [vmem:[%s14294_s1 + $0x50] sm:$0xff] }
 0x646   : > { %v3713_v30 = vpop.xlane.xlu1 %3712  ;;  %10799 = vmatmul.mubr.msk.f32.vlgmr.msra.gmra.mrb[72].mxu1 %vm1582_vm3, %v3745_v44 }
 0x647   : > { %11951 = vrcp.f32 %v3713_v30  ;;  %11554 = vmatpush3.bf16.msra.mxu1 %v12972_v43  ;;  %v3710_v19 = vpop.xlane.xlu0 %3709 }
 0x648   : > { %11560 = vmatprep.subr.bf16.mxu1 %v12978_v41  ;;  %11953 = vrcp.f32 %v3710_v19 }
 0x649   : > { %v11944_v51 = vpop.eup %11943 }
 0x64a   : > { %v11946_v28 = vpop.eup %11945  ;;  %v3749_v11 = vmul.f32 %v11944_v51, %v13050_v15 }
 0x64b   : > { %v3747_v16 = vmul.f32 %v11946_v28, %v13052_v62  ;;  %v9621_v28 = vld [vmem:[%s14295_s2 + $0x48] sm:$0xff] }
 0x64d   : > { %v11948_v21 = vpop.eup %11947  ;;  %10805 = vmatprep.mubr.msk.f32.mxu0 %vm1582_vm3, %v3747_v16 }
 0x64e   : > { %v11950_v13 = vpop.eup %11949  ;;  %v3725_v45 = vpop.xlane.xlu1 %3724  ;;  %10806 = vmatmul.mubr.msk.f32.vlgmr.msra.gmra.mrb[74].mxu0 %vm1582_vm3, %v3749_v11  ;;  %v3757_v50 = vmul.f32 %v11948_v21, %v13060_v34  ;;  %v9622_v21 = vld [vmem:[%s14295_s2 + $0x50] sm:$0xff] }
 0x64f   : > { %11955 = vrcp.f32 %v3725_v45  ;;  %11558 = vmatpush3.bf16.msra.mxu0 %v12976_v46  ;;  %v3722_v43 = vpop.xlane.xlu0 %3721  ;;  %v3755_v17 = vmul.f32 %v11950_v13, %v13062_v53  ;;  %v9623_v13 = vld [vmem:[%s14295_s2 + $0x58] sm:$0xff] }
 0x650   : > { %11564 = vmatprep.subr.bf16.mxu0 %v12980_v7  ;;  %11957 = vrcp.f32 %v3722_v43 }
 0x651   : > { %v11952_v62 = vpop.eup %11951  ;;  %10819 = vmatprep.mubr.msk.f32.mxu0 %vm1582_vm3, %v3755_v17 }
 0x652   : > { %v11954_v15 = vpop.eup %11953  ;;  %10820 = vmatmul.mubr.msk.f32.vlgmr.msra.gmra.mrb[76].mxu0 %vm1582_vm3, %v3757_v50  ;;  %v3753_v46 = vmul.f32 %v11952_v62, %v13068_v39  ;;  %v9599_v39 = vld [vmem:[%s14294_s1 + $0x48] sm:$0xff] }
 0x653   : > { %11566 = vmatpush3.bf16.msra.mxu0 %v12980_v7  ;;  %v3751_v61 = vmul.f32 %v11954_v15, %v13070_v22  ;;  %v9598_v7 = vld [vmem:[%s14294_s1 + $0x40] sm:$0xff] }
 0x654   : > { %v11571_v20 = vpack.c.bf16 %v9599_v39, %v9598_v7 }
 0x655   : > { %10812 = vmatprep.mubr.msk.f32.mxu1 %vm1582_vm3, %v3751_v61 }
 0x656   : > { %v3737_v53 = vpop.xlane.xlu1 %3736  ;;  %10813 = vmatmul.mubr.msk.f32.vlgmr.msra.gmra.mrb[74].mxu1 %vm1582_vm3, %v3753_v46 }
 0x657   : > { %11959 = vrcp.f32 %v3737_v53  ;;  %11562 = vmatpush3.bf16.msra.mxu1 %v12978_v41  ;;  %v3734_v34 = vpop.xlane.xlu0 %3733 }
 0x658   : > { %11568 = vmatprep.subr.bf16.mxu1 %v12982_v26  ;;  %11961 = vrcp.f32 %v3734_v34 }
 0x659   : > { %v11956_v40 = vpop.eup %11955 }
 0x65a   : > { %v11958_v22 = vpop.eup %11957  ;;  %v3731_v10 = vpop.xlane.xlu1 %3730  ;;  %v3761_v41 = vmul.f32 %v11956_v40, %v13080_v57 }
 0x65b   : > { %11963 = vrcp.f32 %v3731_v10  ;;  %v3728_v36 = vpop.xlane.xlu0 %3727  ;;  %v3759_v6 = vmul.f32 %v11958_v22, %v13082_v38  ;;  %v9601_v38 = vld [vmem:[%s14294_s1 + $0x58] sm:$0xff]  ;;  %v13290_v22 = vld [vmem:[%s14297_s4 + $0x2] ss:$0 sm:$0xff] }
 0x65c   : > { %11965 = vrcp.f32 %v3728_v36  ;;  %v11575_v19 = vpack.c.bf16 %v9601_v38, %v9600_v56 }
 0x65d   : > { %10826 = vmatprep.mubr.msk.f32.mxu1 %vm1582_vm3, %v3759_v6 }
 0x65e   : > { %10827 = vmatmul.mubr.msk.f32.vlgmr.msra.gmra.mrb[76].mxu1 %vm1582_vm3, %v3761_v41  ;;  %v9644_v41 = vld [vmem:[%s14296_s3 + $0x50] sm:$0xff] }
 0x65f   : > { %11570 = vmatpush3.bf16.msra.mxu1 %v12982_v26  ;;  %v9620_v26 = vld [vmem:[%s14295_s2 + $0x40] sm:$0xff] }
 0x660   : > { %11572 = vmatprep.subr.bf16.mxu1 %v11571_v20  ;;  %v11579_v11 = vpack.c.bf16 %v9621_v28, %v9620_v26 }
 0x661   : > { %v11960_v9 = vpop.eup %11959 }
 0x662   : > { %v11962_v44 = vpop.eup %11961  ;;  %v3769_v30 = vmul.f32 %v11960_v9, %v13088_v3 }
 0x663   : > { %v3767_v57 = vmul.f32 %v11962_v44, %v13090_v59 }
 0x665   : > { %v11964_v51 = vpop.eup %11963  ;;  %10840 = vmatprep.mubr.msk.f32.mxu1 %vm1582_vm3, %v3767_v57 }
 0x666   : > { %v11966_v16 = vpop.eup %11965  ;;  %10841 = vmatmul.mubr.msk.f32.vlgmr.msra.gmra.mrb[78].mxu1 %vm1582_vm3, %v3769_v30  ;;  %v3765_v3 = vmul.f32 %v11964_v51, %v13096_v4 }
 0x667   : > { %11574 = vmatpush3.bf16.msra.mxu1 %v11571_v20  ;;  %v3763_v59 = vmul.f32 %v11966_v16, %v13098_v18  ;;  %10903 = vmatprep.mubr.msk.f32.mxu1 %vm363_vm0, %v12696_v2  ;;  %v11583_v18 = vpack.c.bf16 %v9623_v13, %v9622_v21  ;;  %v13203_v2 = vld [vmem:[%s12234_s11] sm:$0xff]  ;;  %v9645_v20 = vld [vmem:[%s14296_s3 + $0x58] sm:$0xff] }
 0x668   : > { %11576 = vmatprep.subr.bf16.mxu1 %v11575_v19  ;;  %v11591_v44 = vpack.c.bf16 %v9645_v20, %v9644_v41  ;;  %v13367_v13 = vld [vmem:[%s14298_s5 + $0x2] ss:$0 sm:$0xff] }
 0x669   : > { %10833 = vmatprep.mubr.msk.f32.mxu0 %vm1582_vm3, %v3763_v59  ;;  %v14313_v59 = vld [vmem:[#allocation3_spill] sm:$0xff] }
 0x66a   : > { %10834 = vmatmul.mubr.msk.f32.vlgmr.msra.gmra.mrb[78].mxu0 %vm1582_vm3, %v3765_v3 }
 0x66b   : > { %11578 = vmatpush3.bf16.msra.mxu1 %v11575_v19 }
 0x66c   : > { %11580 = vmatprep.subr.bf16.mxu1 %v11579_v11 }
 0x66e   : > { %10904 = vmatmul.mubr.msk.f32.vlgmr.msra.gmra.mrb[80].mxu1 %vm363_vm0, %v12795_v14 }
 0x66f   : > { %10906 = vmatprep.mubr.msk.f32.mxu1 %vm363_vm0, %v12800_v49  ;;  %11582 = vmatpush3.bf16.msra.mxu1 %v11579_v11  ;;  %v14314_v11 = vld [vmem:[#allocation7_spill] sm:$0xff] }
 0x670   : > { %11584 = vmatprep.subr.bf16.mxu1 %v11583_v18 }
 0x672   : > { %10907 = vmatmul.mubr.msk.f32.gmra.mrb[82].mxu1 %vm363_vm0, %v12805_v58 }
 0x673   : > { %10909 = vmatprep.mubr.msk.f32.mxu1 %vm363_vm0, %v12810_v63  ;;  %11586 = vmatpush3.bf16.msra.mxu1 %v11583_v18  ;;  %v14315_v18 = vld [vmem:[#allocation6_spill] sm:$0xff] }
 0x676   : > { %10910 = vmatmul.mubr.msk.f32.gmra.mrb[84].mxu1 %vm363_vm0, %v12815_v12 }
 0x677   : > { %10912 = vmatprep.mubr.msk.f32.mxu1 %vm363_vm0, %v12820_v52 }
 0x67a   : > { %10913 = vmatmul.mubr.msk.f32.gmra.mrb[86].mxu1 %vm363_vm0, %v12825_v55 }
 0x67b   : > { %10915 = vmatprep.mubr.msk.f32.mxu1 %vm363_vm0, %v12719_v23  ;;  %v9565_v23 = vld [vmem:[%s14300_s7 + $0x8] sm:$0xff] }
 0x67c   : > { %10843 = vmatprep.subr.mxu0 %v9565_v23 }
 0x67d   : > { %10844 = vmatpush3.msra.mxu0 %v9565_v23 }
 0x67e   : > { %10916 = vmatmul.mubr.msk.f32.gmra.mrb[88].mxu1 %vm363_vm0, %v12726_v25  ;;  %v13225_v25 = vld [vmem:[%s12234_s11 + $0x40] sm:$0xff] }
 0x67f   : > { %10918 = vmatprep.mubr.msk.f32.mxu1 %vm363_vm0, %v12733_v27  ;;  %v13230_v27 = vld [vmem:[%s12234_s11 + $0x48] sm:$0xff] }
 0x682   : > { %10919 = vmatmul.mubr.msk.f32.gmra.mrb[90].mxu1 %vm363_vm0, %v12742_v29  ;;  %v13235_v29 = vld [vmem:[%s12234_s11 + $0x50] sm:$0xff] }
 0x683   : > { %10921 = vmatprep.mubr.msk.f32.mxu1 %vm363_vm0, %v12747_v31  ;;  %v13240_v31 = vld [vmem:[%s12234_s11 + $0x58] sm:$0xff] }
 0x686   : > { %10922 = vmatmul.mubr.msk.f32.gmra.mrb[92].mxu1 %vm363_vm0, %v12754_v32  ;;  %v13245_v32 = vld [vmem:[%s12234_s11 + $0x60] sm:$0xff] }
 0x687   : > { %10924 = vmatprep.mubr.msk.f32.mxu1 %vm363_vm0, %v12761_v33  ;;  %v13250_v33 = vld [vmem:[%s12234_s11 + $0x68] sm:$0xff] }
 0x68a   : > { %10925 = vmatmul.mubr.msk.f32.gmra.mrb[94].mxu1 %vm363_vm0, %v12776_v47  ;;  %v13255_v47 = vld [vmem:[%s12234_s11 + $0x70] sm:$0xff] }
 0x68b   : > { %10935 = vmatprep.mubr.msk.f32.mxu1 %vm363_vm0, %v13203_v2 }
 0x68e   : > { %10936 = vmatmul.mubr.msk.f32.vlgmr.msra.gmra.mrb[96].mxu1 %vm363_vm0, %v12795_v14  ;;  %v13260_v14 = vld [vmem:[%s12234_s11 + $0x78] sm:$0xff] }
 0x68f   : > { %10938 = vmatprep.mubr.msk.f32.mxu1 %vm363_vm0, %v12800_v49  ;;  %v2407_v49 = vld [vmem:[%s14300_s7] sm:$0xff] }
 0x690   : > { %10869 = vmatprep.subr.mxu0 %v2407_v49 }
 0x692   : > { %10939 = vmatmul.mubr.msk.f32.gmra.mrb[98].mxu1 %vm363_vm0, %v12805_v58  ;;  %v9642_v58 = vld [vmem:[%s14296_s3 + $0x40] sm:$0xff] }
 0x693   : > { %10941 = vmatprep.mubr.msk.f32.mxu1 %vm363_vm0, %v12810_v63  ;;  %v9643_v63 = vld [vmem:[%s14296_s3 + $0x48] sm:$0xff] }
 0x696   : > { %10942 = vmatmul.mubr.msk.f32.gmra.mrb[100].mxu1 %vm363_vm0, %v12815_v12 }
 0x697   : > { %10944 = vmatprep.mubr.msk.f32.mxu1 %vm363_vm0, %v12820_v52 }
 0x69a   : > { %10945 = vmatmul.mubr.msk.f32.gmra.mrb[102].mxu1 %vm363_vm0, %v12825_v55  ;;  %v11587_v55 = vpack.c.bf16 %v9643_v63, %v9642_v58 }
 0x69b   : > { %10947 = vmatprep.mubr.msk.f32.mxu1 %vm363_vm0, %v13225_v25 }
 0x69e   : > { %10948 = vmatmul.mubr.msk.f32.gmra.mrb[104].mxu1 %vm363_vm0, %v13230_v27 }
 0x69f   : > { %10950 = vmatprep.mubr.msk.f32.mxu1 %vm363_vm0, %v13235_v29 }
 0x6a2   : > { %10951 = vmatmul.mubr.msk.f32.gmra.mrb[106].mxu1 %vm363_vm0, %v13240_v31 }
 0x6a3   : > { %10953 = vmatprep.mubr.msk.f32.mxu1 %vm363_vm0, %v13245_v32 }
 0x6a6   : > { %10954 = vmatmul.mubr.msk.f32.gmra.mrb[108].mxu1 %vm363_vm0, %v13250_v33 }
 0x6a7   : > { %10956 = vmatprep.mubr.msk.f32.mxu1 %vm363_vm0, %v13255_v47 }
 0x6aa   : > { %10957 = vmatmul.mubr.msk.f32.gmra.mrb[110].mxu1 %vm363_vm0, %v13260_v14 }
 0x711   : > { %v10793_v12 = vpop.f32.mrb[72].mxu0 }
 0x712   : > { %v3842_v52 = vpop.f32.mrb[73].mxu0 }
 0x713   : > { %10845 = vmatprep.mubr.msk.f32.mxu0 %vm885_vm1, %v3842_v52  ;;  %v14317_v52 = vld [vmem:[#allocation4_spill] sm:$0xff] }
 0x714   : > { %10846 = vmatmul.mubr.msk.f32.vlgmr.msra.gmra.mrb[80].mxu0 %vm885_vm1, %v10793_v12 }
 0x715   : > { %10870 = vmatpush3.msra.mxu0 %v2407_v49  ;;  %v14316_v49 = vld [vmem:[#allocation5_spill] sm:$0xff] }
 0x716   : > { %11588 = vmatprep.subr.bf16.mxu0 %v11587_v55 }
 0x719   : > { %v10800_v4 = vpop.f32.mrb[72].mxu1 }
 0x71a   : > { %v3923_v45 = vpop.f32.mrb[73].mxu1 }
 0x71b   : > { %10848 = vmatprep.mubr.msk.f32.mxu0 %vm885_vm1, %v3923_v45 }
 0x71c   : > { %10849 = vmatmul.mubr.msk.f32.gmra.mrb[82].mxu0 %vm885_vm1, %v10800_v4 }
 0x721   : > { %v10807_v43 = vpop.f32.mrb[74].mxu0 }
 0x722   : > { %v4004_v17 = vpop.f32.mrb[75].mxu0 }
 0x723   : > { %10851 = vmatprep.mubr.msk.f32.mxu0 %vm885_vm1, %v4004_v17 }
 0x724   : > { %10852 = vmatmul.mubr.msk.f32.gmra.mrb[84].mxu0 %vm885_vm1, %v10807_v43 }
 0x725   : > { %v10821_v50 = vpop.f32.mrb[76].mxu0 }
 0x726   : > { %v4166_v62 = vpop.f32.mrb[77].mxu0 }
 0x729   : > { %v10814_v15 = vpop.f32.mrb[74].mxu1 }
 0x72a   : > { %v4085_v61 = vpop.f32.mrb[75].mxu1 }
 0x72b   : > { %10854 = vmatprep.mubr.msk.f32.mxu0 %vm885_vm1, %v4085_v61  ;;  %v13393_v61 = vld [vmem:[%s12234_s11 + $0x10] sm:$0xff] }
 0x72c   : > { %10855 = vmatmul.mubr.msk.f32.gmra.mrb[86].mxu0 %vm885_vm1, %v10814_v15 }
 0x72d   : > { %10857 = vmatprep.mubr.msk.f32.mxu0 %vm885_vm1, %v4166_v62  ;;  %v13386_v62 = vld [vmem:[%s12234_s11 + $0x8] sm:$0xff] }
 0x730   : > { %10858 = vmatmul.mubr.msk.f32.gmra.mrb[88].mxu0 %vm885_vm1, %v10821_v50 }
 0x731   : > { %v10828_v46 = vpop.f32.mrb[76].mxu1 }
 0x732   : > { %v4247_v53 = vpop.f32.mrb[77].mxu1 }
 0x733   : > { %10860 = vmatprep.mubr.msk.f32.mxu0 %vm885_vm1, %v4247_v53 }
 0x734   : > { %10861 = vmatmul.mubr.msk.f32.gmra.mrb[90].mxu0 %vm885_vm1, %v10828_v46 }
 0x739   : > { %v10842_v34 = vpop.f32.mrb[78].mxu1 }
 0x73a   : > { %v4409_v40 = vpop.f32.mrb[79].mxu1 }
 0x73d   : > { %v10835_v7 = vpop.f32.mrb[78].mxu0 }
 0x73e   : > { %v4328_v39 = vpop.f32.mrb[79].mxu0 }
 0x73f   : > { %10863 = vmatprep.mubr.msk.f32.mxu0 %vm885_vm1, %v4328_v39  ;;  %v13403_v39 = vld [vmem:[%s12234_s11 + $0x18] sm:$0xff] }
 0x740   : > { %10864 = vmatmul.mubr.msk.f32.gmra.mrb[92].mxu0 %vm885_vm1, %v10835_v7 }
 0x741   : > { %v13292_v10 = vpop.f32.mrb[80].mxu1  ;;  %10866 = vmatprep.mubr.msk.f32.mxu0 %vm885_vm1, %v4409_v40 }
 0x742   : > { %v4885_v36 = vpop.f32.mrb[81].mxu1 }
 0x743   : > { %v4886_v6 = vadd.f32 %v13290_v22, %v4885_v36  ;;  %v13408_v36 = vld [vmem:[%s12234_s11 + $0x20] sm:$0xff] }
 0x744   : > { %10867 = vmatmul.mubr.msk.f32.gmra.mrb[94].mxu0 %vm885_vm1, %v10842_v34 }
 0x745   : > { %v4964_v9 = vmul.f32 0.35355338, %v4886_v6  ;;  %v13303_v56 = vpop.f32.mrb[82].mxu1  ;;  %10871 = vmatprep.mubr.msk.f32.mxu0 %vm885_vm1, %v12847_v37 }
 0x746   : > { %v4895_v38 = vpop.f32.mrb[83].mxu1 }
 0x747   : > { %10995 = vmatprep.mubr.msk.f32.mxu1 %vm885_vm1, %v4964_v9  ;;  %v4896_v53 = vadd.f32 %v13290_v22, %v4895_v38 }
 0x748   : > { %10872 = vmatmul.mubr.msk.f32.vlgmr.msra.gmra.mrb[80].mxu0 %vm885_vm1, %v12845_v35 }
 0x749   : > { %v13310_v57 = vpop.f32.mrb[84].mxu1  ;;  %10874 = vmatprep.mubr.msk.f32.mxu0 %vm885_vm1, %v12851_v1  ;;  %11590 = vmatpush3.bf16.msra.mxu0 %v11587_v55  ;;  %v4966_v20 = vmul.f32 0.35355338, %v4896_v53 }
 0x74a   : > { %v13314_v30 = vpop.f32.mrb[85].mxu1  ;;  %11592 = vmatprep.subr.bf16.mxu0 %v11591_v44 }
 0x74c   : > { %10875 = vmatmul.mubr.msk.f32.gmra.mrb[82].mxu0 %vm885_vm1, %v12849_v8 }
 0x74d   : > { %v10914_v37 = vpop.f32.mrb[86].mxu1  ;;  %10877 = vmatprep.mubr.msk.f32.mxu0 %vm885_vm1, %v12859_v42  ;;  %11594 = vmatpush3.bf16.msra.mxu0 %v11591_v44 }
 0x74e   : > { %v13321_v19 = vadd.f32 %v10914_v37, %v13290_v22  ;;  %v13323_v35 = vpop.f32.mrb[87].mxu1  ;;  %v4901_v37 = vadd.f32 %v13303_v56, %v13290_v22 }
 0x750   : > { %10878 = vmatmul.mubr.msk.f32.gmra.mrb[84].mxu0 %vm885_vm1, %v12857_v24 }
 0x751   : > { %v10917_v1 = vpop.f32.mrb[88].mxu1  ;;  %10880 = vmatprep.mubr.msk.f32.mxu0 %vm885_vm1, %v12855_v0 }
 0x752   : > { %v13330_v51 = vadd.f32 %v10917_v1, %v13290_v22  ;;  %v13332_v8 = vpop.f32.mrb[89].mxu1  ;;  %v13421_v1 = vld [vmem:[%s12234_s11 + $0x28] sm:$0xff] }
 0x754   : > { %10881 = vmatmul.mubr.msk.f32.gmra.mrb[86].mxu0 %vm885_vm1, %v12853_v48 }
 0x755   : > { %v10920_v42 = vpop.f32.mrb[90].mxu1  ;;  %10883 = vmatprep.mubr.msk.f32.mxu0 %vm885_vm1, %v12871_v60 }
 0x756   : > { %v13339_v26 = vadd.f32 %v10920_v42, %v13290_v22  ;;  %v4935_v24 = vpop.f32.mrb[91].mxu1 }
 0x757   : > { %v13342_v28 = vadd.f32 %v13290_v22, %v4935_v24 }
 0x758   : > { %10884 = vmatmul.mubr.msk.f32.gmra.mrb[88].mxu0 %vm885_vm1, %v12869_v54 }
 0x759   : > { %v10923_v0 = vpop.f32.mrb[92].mxu1  ;;  %10886 = vmatprep.mubr.msk.f32.mxu0 %vm885_vm1, %v12863_v5 }
 0x75a   : > { %v13349_v48 = vadd.f32 %v10923_v0, %v13290_v22  ;;  %v4945_v16 = vpop.f32.mrb[93].mxu1  ;;  %v4906_v0 = vadd.f32 %v13290_v22, %v13314_v30 }
 0x75b   : > { %v13352_v60 = vadd.f32 %v13290_v22, %v4945_v16  ;;  %v13430_v16 = vld [vmem:[%s12234_s11 + $0x30] sm:$0xff] }
 0x75c   : > { %10887 = vmatmul.mubr.msk.f32.gmra.mrb[90].mxu0 %vm885_vm1, %v14313_v59 }
 0x75d   : > { %v10926_v3 = vpop.f32.mrb[94].mxu1  ;;  %10889 = vmatprep.mubr.msk.f32.mxu0 %vm885_vm1, %v14314_v11  ;;  %v4967_v11 = vmul.f32 0.35355338, %v4901_v37 }
 0x75e   : > { %v13359_v54 = vadd.f32 %v10926_v3, %v13290_v22  ;;  %v4955_v21 = vpop.f32.mrb[95].mxu1 }
 0x75f   : > { %v13362_v5 = vadd.f32 %v13290_v22, %v4955_v21  ;;  %v13437_v21 = vld [vmem:[%s12234_s11 + $0x38] sm:$0xff] }
 0x760   : > { %10890 = vmatmul.mubr.msk.f32.gmra.mrb[92].mxu0 %vm885_vm1, %v14315_v18 }
 0x761   : > { %v10937_v23 = vpop.f32.mrb[96].mxu1  ;;  %10892 = vmatprep.mubr.msk.f32.mxu0 %vm885_vm1, %v14316_v49  ;;  %v4968_v49 = vmul.f32 0.35355338, %v4906_v0 }
 0x762   : > { %v5065_v58 = vadd.f32 %v10937_v23, %v13367_v13  ;;  %v5059_v63 = vpop.f32.mrb[97].mxu1 }
 0x763   : > { %v5060_v12 = vadd.f32 %v13367_v13, %v5059_v63 }
 0x764   : > { %10893 = vmatmul.mubr.msk.f32.gmra.mrb[94].mxu0 %vm885_vm1, %v14317_v52 }
 0x765   : > { %v11595_v55 = vpack.c.bf16 %v5065_v58, %v5060_v12  ;;  %v10940_v4 = vpop.f32.mrb[98].mxu1  ;;  %10967 = vmatprep.mubr.msk.f32.mxu0 %vm363_vm0, %v13203_v2  ;;  %v4891_v2 = vadd.f32 %v13292_v10, %v13290_v22  ;;  %v4911_v12 = vadd.f32 %v13310_v57, %v13290_v22 }
 0x766   : > { %v5075_v45 = vadd.f32 %v10940_v4, %v13367_v13  ;;  %v5069_v43 = vpop.f32.mrb[99].mxu1 }
 0x767   : > { %11597 = vmatprep.subr.msk.bf16.mxu1 %vm12404_vm2, %v11595_v55  ;;  %v5070_v50 = vadd.f32 %v13367_v13, %v5069_v43  ;;  %v4965_v10 = vmul.f32 0.35355338, %v4891_v2 }
 0x768   : > { %11600 = vmatpush3.bf16.xpose.msk.msra.mxu1 %vm12404_vm2, %v11595_v55  ;;  %10968 = vmatmul.mubr.msk.f32.vlgmr.msra.gmra.mrb[96].mxu0 %vm363_vm0, %v13386_v62  ;;  %v4916_v55 = vadd.f32 %v13290_v22, %v13323_v35 }
 0x769   : > { %v11601_v15 = vpack.c.bf16 %v5075_v45, %v5070_v50  ;;  %10970 = vmatprep.mubr.msk.f32.mxu0 %vm363_vm0, %v13393_v61  ;;  %v10943_v46 = vpop.f32.mrb[100].mxu1 }
 0x76a   : > { %v5085_v34 = vadd.f32 %v10943_v46, %v13367_v13  ;;  %v5079_v40 = vpop.f32.mrb[101].mxu1  ;;  %v4970_v2 = vmul.f32 0.35355338, %v4916_v55  ;;  %v4926_v46 = vadd.f32 %v13290_v22, %v13332_v8  ;;  %v4974_v22 = vmul.f32 0.35355338, %v13342_v28 }
 0x76b   : > { %11603 = vmatprep.subr.msk.bf16.mxu1 %vm12404_vm2, %v11601_v15  ;;  %v5080_v7 = vadd.f32 %v13367_v13, %v5079_v40  ;;  %v4973_v8 = vmul.f32 0.35355338, %v13330_v51  ;;  %v4979_v51 = vmul.f32 0.35355338, %v13359_v54 }
 0x76c   : > { %10971 = vmatmul.mubr.msk.f32.gmra.mrb[98].mxu0 %vm363_vm0, %v13403_v39 }
 0x76d   : > { %10973 = vmatprep.mubr.msk.f32.mxu0 %vm363_vm0, %v13408_v36  ;;  %v11607_v6 = vpack.c.bf16 %v5085_v34, %v5080_v7  ;;  %v10946_v41 = vpop.f32.mrb[102].mxu1 }
 0x76e   : > { %v5095_v9 = vadd.f32 %v10946_v41, %v13367_v13  ;;  %v5089_v38 = vpop.f32.mrb[103].mxu1 }
 0x76f   : > { %10996 = vmatmul.mubr.msk.f32.vlgmr.msra.gmra.mrb[112].mxu1 %vm885_vm1, %v4965_v10  ;;  %v5090_v44 = vadd.f32 %v13367_v13, %v5089_v38 }
 0x770   : > { %11606 = vmatpush3.bf16.xpose.msk.msra.mxu1 %vm12404_vm2, %v11601_v15  ;;  %11002 = vmatprep.mubr.msk.f32.mxu1 %vm885_vm1, %v4966_v20 }
 0x771   : > { %10974 = vmatmul.mubr.msk.f32.gmra.mrb[100].mxu0 %vm363_vm0, %v13421_v1  ;;  %11609 = vmatprep.subr.msk.bf16.mxu1 %vm12404_vm2, %v11607_v6  ;;  %v11613_v42 = vpack.c.bf16 %v5095_v9, %v5090_v44  ;;  %v10949_v24 = vpop.f32.mrb[104].mxu1 }
 0x772   : > { %10976 = vmatprep.mubr.msk.f32.mxu0 %vm363_vm0, %v13430_v16  ;;  %v5105_v56 = vadd.f32 %v10949_v24, %v13367_v13  ;;  %v5099_v59 = vpop.f32.mrb[105].mxu1 }
 0x773   : > { %v5100_v3 = vadd.f32 %v13367_v13, %v5099_v59 }
 0x775   : > { %10977 = vmatmul.mubr.msk.f32.gmra.mrb[102].mxu0 %vm363_vm0, %v13437_v21  ;;  %v11619_v18 = vpack.c.bf16 %v5105_v56, %v5100_v3  ;;  %v10952_v23 = vpop.f32.mrb[106].mxu1 }
 0x776   : > { %10979 = vmatprep.mubr.msk.f32.mxu0 %vm363_vm0, %v13225_v25  ;;  %v5115_v30 = vadd.f32 %v10952_v23, %v13367_v13  ;;  %v5109_v58 = vpop.f32.mrb[107].mxu1 }
 0x777   : > { %11003 = vmatmul.mubr.msk.f32.vlgmr.msra.gmra.mrb[114].mxu1 %vm885_vm1, %v4967_v11  ;;  %11621 = vmatprep.subr.msk.bf16.mxu0 %vm12404_vm2, %v11619_v18  ;;  %v5110_v63 = vadd.f32 %v13367_v13, %v5109_v58 }
 0x778   : > { %11612 = vmatpush3.bf16.xpose.msk.msra.mxu1 %vm12404_vm2, %v11607_v6  ;;  %11009 = vmatprep.mubr.msk.f32.mxu1 %vm885_vm1, %v4968_v49 }
 0x779   : > { %10980 = vmatmul.mubr.msk.f32.gmra.mrb[104].mxu0 %vm363_vm0, %v13230_v27  ;;  %11615 = vmatprep.subr.msk.bf16.mxu1 %vm12404_vm2, %v11613_v42  ;;  %v11625_v25 = vpack.c.bf16 %v5115_v30, %v5110_v63  ;;  %v10955_v52 = vpop.f32.mrb[108].mxu1  ;;  %v4969_v27 = vmul.f32 0.35355338, %v4911_v12 }
 0x77a   : > { %10982 = vmatprep.mubr.msk.f32.mxu0 %vm363_vm0, %v13235_v29  ;;  %11624 = vmatpush3.bf16.xpose.msk.msra.mxu0 %vm12404_vm2, %v11619_v18  ;;  %v5125_v4 = vadd.f32 %v10955_v52, %v13367_v13  ;;  %v5119_v57 = vpop.f32.mrb[109].mxu1 }
 0x77b   : > { %v5120_v45 = vadd.f32 %v13367_v13, %v5119_v57 }
 0x77d   : > { %10983 = vmatmul.mubr.msk.f32.gmra.mrb[106].mxu0 %vm363_vm0, %v13240_v31  ;;  %v11631_v43 = vpack.c.bf16 %v5125_v4, %v5120_v45  ;;  %v10958_v50 = vpop.f32.mrb[110].mxu1 }
 0x77e   : > { %10985 = vmatprep.mubr.msk.f32.mxu0 %vm363_vm0, %v13245_v32  ;;  %v5135_v29 = vadd.f32 %v10958_v50, %v13367_v13  ;;  %v5129_v35 = vpop.f32.mrb[111].mxu1  ;;  %v4972_v32 = vmul.f32 0.35355338, %v4926_v46 }
 0x77f   : > { %11010 = vmatmul.mubr.msk.f32.vlgmr.msra.gmra.mrb[116].mxu1 %vm885_vm1, %v4969_v27  ;;  %11633 = vmatprep.subr.msk.bf16.mxu0 %vm12404_vm2, %v11631_v43  ;;  %v5130_v15 = vadd.f32 %v13367_v13, %v5129_v35  ;;  %v4971_v13 = vmul.f32 0.35355338, %v13321_v19  ;;  %v4977_v19 = vmul.f32 0.35355338, %v13349_v48 }
 0x780   : > { %11618 = vmatpush3.bf16.xpose.msk.msra.mxu1 %vm12404_vm2, %v11613_v42  ;;  %11016 = vmatprep.mubr.msk.f32.mxu1 %vm885_vm1, %v4970_v2 }
 0x781   : > { %10986 = vmatmul.mubr.msk.f32.gmra.mrb[108].mxu0 %vm363_vm0, %v13250_v33  ;;  %11627 = vmatprep.subr.msk.bf16.mxu1 %vm12404_vm2, %v11625_v25  ;;  %v11637_v31 = vpack.c.bf16 %v5135_v29, %v5130_v15  ;;  %v4976_v33 = vmul.f32 0.35355338, %v13352_v60 }
 0x782   : > { %10988 = vmatprep.mubr.msk.f32.mxu0 %vm363_vm0, %v13255_v47  ;;  %v4975_v47 = vmul.f32 0.35355338, %v13339_v26  ;;  %v13515_v26 = vld [vmem:[%s14299_s6 + $0x2] ss:$0 sm:$0xff] }
 0x785   : > { %10989 = vmatmul.mubr.msk.f32.gmra.mrb[110].mxu0 %vm363_vm0, %v13260_v14  ;;  %v4978_v14 = vmul.f32 0.35355338, %v13362_v5 }
 0x786   : > { %11023 = vmatprep.mubr.msk.f32.mxu0 %vm885_vm1, %v4972_v32 }
 0x787   : > { %11017 = vmatmul.mubr.msk.f32.vlgmr.msra.gmra.mrb[118].mxu1 %vm885_vm1, %v4971_v13 }
 0x788   : > { %11630 = vmatpush3.bf16.xpose.msk.msra.mxu1 %vm12404_vm2, %v11625_v25  ;;  %11030 = vmatprep.mubr.msk.f32.mxu1 %vm885_vm1, %v4974_v22 }
 0x789   : > { %11024 = vmatmul.mubr.msk.f32.vlgmr.msra.gmra.mrb[112].mxu0 %vm885_vm1, %v4973_v8  ;;  %11639 = vmatprep.subr.msk.bf16.mxu1 %vm12404_vm2, %v11637_v31 }
 0x78a   : > { %11636 = vmatpush3.bf16.xpose.msk.msra.mxu0 %vm12404_vm2, %v11631_v43  ;;  %11037 = vmatprep.mubr.msk.f32.mxu0 %vm885_vm1, %v4976_v33 }
 0x78f   : > { %11031 = vmatmul.mubr.msk.f32.vlgmr.msra.gmra.mrb[120].mxu1 %vm885_vm1, %v4975_v47 }
 0x790   : > { %11642 = vmatpush3.bf16.xpose.msk.msra.mxu1 %vm12404_vm2, %v11637_v31  ;;  %11044 = vmatprep.mubr.msk.f32.mxu1 %vm885_vm1, %v4978_v14 }
 0x791   : > { %11038 = vmatmul.mubr.msk.f32.vlgmr.msra.gmra.mrb[114].mxu0 %vm885_vm1, %v4977_v19 }
 0x797   : > { %11045 = vmatmul.mubr.msk.f32.vlgmr.msra.gmra.mrb[122].mxu1 %vm885_vm1, %v4979_v51 }
 0x83b   : > { %v10969_v28 = vpop.f32.mrb[96].mxu0 }
 0x83c   : > { %v5223_v48 = vadd.f32 %v10969_v28, %v13515_v26  ;;  %v5217_v60 = vpop.f32.mrb[97].mxu0 }
 0x83d   : > { %v5218_v5 = vadd.f32 %v13515_v26, %v5217_v60 }
 0x83f   : > { %v11643_v53 = vpack.c.bf16 %v5223_v48, %v5218_v5  ;;  %v10972_v34 = vpop.f32.mrb[98].mxu0 }
 0x840   : > { %v5233_v40 = vadd.f32 %v10972_v34, %v13515_v26  ;;  %v5227_v7 = vpop.f32.mrb[99].mxu0 }
 0x841   : > { %v5228_v54 = vadd.f32 %v13515_v26, %v5227_v7  ;;  %11644 = vmatprep.subr.bf16.mxu0 %v11643_v53 }
 0x842   : > { %v13521_v10 = vpop.f32.mrb[112].mxu1  ;;  %11646 = vmatpush3.bf16.msra.mxu0 %v11643_v53 }
 0x843   : > { %v13523_v6 = vpack.c.bf16 %v5233_v40, %v5228_v54  ;;  %v13525_v41 = vpop.f32.mrb[113].mxu1  ;;  %v5995_v20 = vsel %vm1582_vm3, %v13521_v10, -inf }
 0x844   : > { %5996 = vmax.xlane.f32.xlu1 %v5995_v20  ;;  %v10975_v9 = vpop.f32.mrb[100].mxu0  ;;  %v5992_v38 = vsel %vm1582_vm3, %v13525_v41, -inf }
 0x845   : > { %v5243_v44 = vadd.f32 %v10975_v9, %v13515_v26  ;;  %5993 = vmax.xlane.f32.xlu0 %v5992_v38  ;;  %v5237_v37 = vpop.f32.mrb[101].mxu0  ;;  %11648 = vmatprep.subr.bf16.mxu0 %v13523_v6 }
 0x846   : > { %v5238_v42 = vadd.f32 %v13515_v26, %v5237_v37 }
 0x848   : > { %v11651_v24 = vpack.c.bf16 %v5243_v44, %v5238_v42  ;;  %v10978_v0 = vpop.f32.mrb[102].mxu0 }
 0x849   : > { %v5253_v56 = vadd.f32 %v10978_v0, %v13515_v26  ;;  %v5247_v59 = vpop.f32.mrb[103].mxu0 }
 0x84a   : > { %v5248_v3 = vadd.f32 %v13515_v26, %v5247_v59  ;;  %v13536_v11 = vpop.f32.mrb[114].mxu1  ;;  %11652 = vmatprep.subr.bf16.mxu1 %v11651_v24 }
 0x84b   : > { %v13538_v18 = vpop.f32.mrb[115].mxu1  ;;  %11654 = vmatpush3.bf16.msra.mxu1 %v11651_v24  ;;  %v6001_v23 = vsel %vm1582_vm3, %v13536_v11, -inf }
 0x84c   : > { %v13542_v49 = vpack.c.bf16 %v5253_v56, %v5248_v3  ;;  %6002 = vmax.xlane.f32.xlu1 %v6001_v23  ;;  %v5998_v30 = vsel %vm1582_vm3, %v13538_v18, -inf  ;;  %v10981_v58 = vpop.f32.mrb[104].mxu0 }
 0x84d   : > { %5999 = vmax.xlane.f32.xlu0 %v5998_v30  ;;  %v5263_v63 = vadd.f32 %v10981_v58, %v13515_v26  ;;  %v5257_v12 = vpop.f32.mrb[105].mxu0 }
 0x84e   : > { %v5258_v25 = vadd.f32 %v13515_v26, %v5257_v12 }
 0x850   : > { %v13548_v52 = vpack.c.bf16 %v5263_v63, %v5258_v25  ;;  %v10984_v55 = vpop.f32.mrb[106].mxu0 }
 0x851   : > { %v5273_v4 = vadd.f32 %v10984_v55, %v13515_v26  ;;  %v5267_v57 = vpop.f32.mrb[107].mxu0 }
 0x852   : > { %v5268_v45 = vadd.f32 %v13515_v26, %v5267_v57  ;;  %v13552_v27 = vpop.f32.mrb[116].mxu1  ;;  %11660 = vmatprep.subr.bf16.mxu1 %v13548_v52 }
 0x853   : > { %v13555_v43 = vpop.f32.mrb[117].mxu1  ;;  %v6007_v50 = vsel %vm1582_vm3, %v13552_v27, -inf }
 0x854   : > { %v13559_v2 = vpack.c.bf16 %v5273_v4, %v5268_v45  ;;  %6008 = vmax.xlane.f32.xlu1 %v6007_v50  ;;  %v6004_v29 = vsel %vm1582_vm3, %v13555_v43, -inf  ;;  %v10987_v35 = vpop.f32.mrb[108].mxu0 }
 0x855   : > { %6005 = vmax.xlane.f32.xlu0 %v6004_v29  ;;  %v5283_v15 = vadd.f32 %v10987_v35, %v13515_v26  ;;  %v5277_v46 = vpop.f32.mrb[109].mxu0 }
 0x856   : > { %v5278_v31 = vadd.f32 %v13515_v26, %v5277_v46 }
 0x858   : > { %v13565_v32 = vpack.c.bf16 %v5283_v15, %v5278_v31  ;;  %v10990_v13 = vpop.f32.mrb[110].mxu0 }
 0x859   : > { %v5293_v22 = vadd.f32 %v10990_v13, %v13515_v26  ;;  %v5287_v8 = vpop.f32.mrb[111].mxu0 }
 0x85a   : > { %v5288_v33 = vadd.f32 %v13515_v26, %v5287_v8  ;;  %v13569_v47 = vpop.f32.mrb[118].mxu1 }
 0x85b   : > { %v13571_v14 = vpop.f32.mrb[119].mxu1  ;;  %v6013_v19 = vsel %vm1582_vm3, %v13569_v47, -inf }
 0x85c   : > { %v13575_v51 = vpack.c.bf16 %v5293_v22, %v5288_v33  ;;  %6014 = vmax.xlane.f32.xlu1 %v6013_v19  ;;  %v13577_v28 = vpop.f32.mrb[112].mxu0  ;;  %v6010_v48 = vsel %vm1582_vm3, %v13571_v14, -inf }
 0x85d   : > { %6011 = vmax.xlane.f32.xlu0 %v6010_v48  ;;  %v13581_v60 = vpop.f32.mrb[113].mxu0  ;;  %v6019_v26 = vsel %vm1582_vm3, %v13577_v28, -inf }
 0x85e   : > { %v6016_v5 = vsel %vm1582_vm3, %v13581_v60, -inf }
 0x860   : > { %6020 = vmax.xlane.f32.xlu1 %v6019_v26 }
 0x861   : > { %6017 = vmax.xlane.f32.xlu0 %v6016_v5 }
 0x862   : > { %v13587_v53 = vpop.f32.mrb[120].mxu1 }
 0x863   : > { %v13589_v34 = vpop.f32.mrb[121].mxu1  ;;  %v6025_v40 = vsel %vm1582_vm3, %v13587_v53, -inf }
 0x864   : > { %v13593_v7 = vpop.f32.mrb[114].mxu0  ;;  %6026 = vmax.xlane.f32.xlu1 %v6025_v40  ;;  %v6022_v54 = vsel %vm1582_vm3, %v13589_v34, -inf }
 0x865   : > { %v13597_v20 = vpop.f32.mrb[115].mxu0  ;;  %6023 = vmax.xlane.f32.xlu0 %v6022_v54  ;;  %v6031_v9 = vsel %vm1582_vm3, %v13593_v7, -inf }
 0x866   : > { %v6028_v38 = vsel %vm1582_vm3, %v13597_v20, -inf }
 0x868   : > { %6032 = vmax.xlane.f32.xlu1 %v6031_v9 }
 0x869   : > { %6029 = vmax.xlane.f32.xlu0 %v6028_v38 }
 0x86a   : > { %v13603_v44 = vpop.f32.mrb[122].mxu1 }
 0x86b   : > { %v13605_v37 = vpop.f32.mrb[123].mxu1  ;;  %v6037_v42 = vsel %vm1582_vm3, %v13603_v44, -inf }
 0x86c   : > { %6038 = vmax.xlane.f32.xlu1 %v6037_v42  ;;  %v6034_v24 = vsel %vm1582_vm3, %v13605_v37, -inf }
 0x86d   : > { %6035 = vmax.xlane.f32.xlu0 %v6034_v24 }
 0x8d1   : > { %v5997_v0 = vpop.xlane.xlu1 %5996 }
 0x8d2   : > { %v6041_v56 = vsub.f32 %v13521_v10, %v5997_v0  ;;  %v5994_v59 = vpop.xlane.xlu0 %5993 }
 0x8d3   : > { %v6040_v3 = vsub.f32 %v13525_v41, %v5994_v59 }
 0x8d4   : > { %v6058_v23 = vmul.f32 1.442695, %v6041_v56 }
 0x8d5   : > { %v6056_v30 = vmul.f32 1.442695, %v6040_v3 }
 0x8d6   : > { %11967 = vpow2.f32 %v6058_v23 }
 0x8d7   : > { %11969 = vpow2.f32 %v6056_v30 }
 0x8d9   : > { %v6003_v58 = vpop.xlane.xlu1 %6002 }
 0x8da   : > { %v6043_v63 = vsub.f32 %v13536_v11, %v6003_v58  ;;  %v6000_v12 = vpop.xlane.xlu0 %5999 }
 0x8db   : > { %v6042_v25 = vsub.f32 %v13538_v18, %v6000_v12 }
 0x8dc   : > { %v6062_v55 = vmul.f32 1.442695, %v6043_v63 }
 0x8dd   : > { %v6060_v4 = vmul.f32 1.442695, %v6042_v25 }
 0x8de   : > { %11971 = vpow2.f32 %v6062_v55 }
 0x8df   : > { %11973 = vpow2.f32 %v6060_v4 }
 0x8e0   : > { %v13615_v57 = vpop.eup %11967 }
 0x8e1   : > { %v13617_v10 = vpop.eup %11969  ;;  %v6009_v45 = vpop.xlane.xlu1 %6008  ;;  %v6091_v41 = vsel %vm1582_vm3, %v13615_v57, 0.0 }
 0x8e2   : > { %v6045_v50 = vsub.f32 %v13552_v27, %v6009_v45  ;;  %6092 = vadd.xlane.f32.xlu1 %v6091_v41  ;;  %v6006_v29 = vpop.xlane.xlu0 %6005  ;;  %v6088_v11 = vsel %vm1582_vm3, %v13617_v10, 0.0 }
 0x8e3   : > { %v6044_v18 = vsub.f32 %v13555_v43, %v6006_v29  ;;  %6089 = vadd.xlane.f32.xlu0 %v6088_v11 }
 0x8e4   : > { %v6066_v35 = vmul.f32 1.442695, %v6045_v50 }
 0x8e5   : > { %v6064_v15 = vmul.f32 1.442695, %v6044_v18 }
 0x8e6   : > { %11975 = vpow2.f32 %v6066_v35 }
 0x8e7   : > { %11977 = vpow2.f32 %v6064_v15 }
 0x8e8   : > { %v13625_v46 = vpop.eup %11971 }
 0x8e9   : > { %v13627_v31 = vpop.eup %11973  ;;  %v6015_v13 = vpop.xlane.xlu1 %6014  ;;  %v6097_v27 = vsel %vm1582_vm3, %v13625_v46, 0.0 }
 0x8ea   : > { %v6047_v22 = vsub.f32 %v13569_v47, %v6015_v13  ;;  %6098 = vadd.xlane.f32.xlu1 %v6097_v27  ;;  %v6012_v8 = vpop.xlane.xlu0 %6011  ;;  %v6094_v43 = vsel %vm1582_vm3, %v13627_v31, 0.0 }
 0x8eb   : > { %v6046_v33 = vsub.f32 %v13571_v14, %v6012_v8  ;;  %6095 = vadd.xlane.f32.xlu0 %v6094_v43 }
 0x8ec   : > { %v6070_v19 = vmul.f32 1.442695, %v6047_v22 }
 0x8ed   : > { %v6068_v48 = vmul.f32 1.442695, %v6046_v33  ;;  %v6021_v26 = vpop.xlane.xlu1 %6020 }
 0x8ee   : > { %11979 = vpow2.f32 %v6070_v19  ;;  %v6049_v5 = vsub.f32 %v13577_v28, %v6021_v26  ;;  %v6018_v40 = vpop.xlane.xlu0 %6017 }
 0x8ef   : > { %11981 = vpow2.f32 %v6068_v48  ;;  %v6048_v54 = vsub.f32 %v13581_v60, %v6018_v40 }
 0x8f0   : > { %v13637_v9 = vpop.eup %11975  ;;  %v6074_v47 = vmul.f32 1.442695, %v6049_v5 }
 0x8f1   : > { %v13639_v38 = vpop.eup %11977  ;;  %v6072_v42 = vmul.f32 1.442695, %v6048_v54  ;;  %v6027_v24 = vpop.xlane.xlu1 %6026  ;;  %v6103_v14 = vsel %vm1582_vm3, %v13637_v9, 0.0 }
 0x8f2   : > { %11983 = vpow2.f32 %v6074_v47  ;;  %v6051_v0 = vsub.f32 %v13587_v53, %v6027_v24  ;;  %6104 = vadd.xlane.f32.xlu1 %v6103_v14  ;;  %v6024_v56 = vpop.xlane.xlu0 %6023  ;;  %v6100_v28 = vsel %vm1582_vm3, %v13639_v38, 0.0 }
 0x8f3   : > { %11985 = vpow2.f32 %v6072_v42  ;;  %v6050_v60 = vsub.f32 %v13589_v34, %v6024_v56  ;;  %6101 = vadd.xlane.f32.xlu0 %v6100_v28 }
 0x8f4   : > { %v6078_v59 = vmul.f32 1.442695, %v6051_v0 }
 0x8f5   : > { %v6076_v3 = vmul.f32 1.442695, %v6050_v60  ;;  %v6033_v23 = vpop.xlane.xlu1 %6032 }
 0x8f6   : > { %11987 = vpow2.f32 %v6078_v59  ;;  %v6053_v30 = vsub.f32 %v13593_v7, %v6033_v23  ;;  %v6030_v58 = vpop.xlane.xlu0 %6029 }
 0x8f7   : > { %11989 = vpow2.f32 %v6076_v3  ;;  %v6052_v63 = vsub.f32 %v13597_v20, %v6030_v58 }
 0x8f8   : > { %v13649_v53 = vpop.eup %11979  ;;  %v6082_v12 = vmul.f32 1.442695, %v6053_v30 }
 0x8f9   : > { %v13651_v25 = vpop.eup %11981  ;;  %v6080_v55 = vmul.f32 1.442695, %v6052_v63  ;;  %v6039_v4 = vpop.xlane.xlu1 %6038  ;;  %v6109_v34 = vsel %vm1582_vm3, %v13649_v53, 0.0 }
 0x8fa   : > { %11991 = vpow2.f32 %v6082_v12  ;;  %v6055_v45 = vsub.f32 %v13603_v44, %v6039_v4  ;;  %6110 = vadd.xlane.f32.xlu1 %v6109_v34  ;;  %v6036_v41 = vpop.xlane.xlu0 %6035  ;;  %v6106_v7 = vsel %vm1582_vm3, %v13651_v25, 0.0 }
 0x8fb   : > { %11993 = vpow2.f32 %v6080_v55  ;;  %v6054_v20 = vsub.f32 %v13605_v37, %v6036_v41  ;;  %6107 = vadd.xlane.f32.xlu0 %v6106_v7 }
 0x8fc   : > { %v13659_v50 = vpop.eup %11983  ;;  %v6086_v29 = vmul.f32 1.442695, %v6055_v45 }
 0x8fd   : > { %v13661_v11 = vpop.eup %11985  ;;  %v6084_v18 = vmul.f32 1.442695, %v6054_v20  ;;  %v6115_v35 = vsel %vm1582_vm3, %v13659_v50, 0.0 }
 0x8fe   : > { %11995 = vpow2.f32 %v6086_v29  ;;  %6116 = vadd.xlane.f32.xlu1 %v6115_v35  ;;  %v6112_v44 = vsel %vm1582_vm3, %v13661_v11, 0.0 }
 0x8ff   : > { %11997 = vpow2.f32 %v6084_v18  ;;  %6113 = vadd.xlane.f32.xlu0 %v6112_v44 }
 0x900   : > { %v13667_v15 = vpop.eup %11987 }
 0x901   : > { %v13669_v37 = vpop.eup %11989  ;;  %v6121_v13 = vsel %vm1582_vm3, %v13667_v15, 0.0 }
 0x902   : > { %6122 = vadd.xlane.f32.xlu1 %v6121_v13  ;;  %v6118_v27 = vsel %vm1582_vm3, %v13669_v37, 0.0 }
 0x903   : > { %6119 = vadd.xlane.f32.xlu0 %v6118_v27 }
 0x904   : > { %v13675_v22 = vpop.eup %11991 }
 0x905   : > { %v13677_v8 = vpop.eup %11993  ;;  %v6127_v43 = vsel %vm1582_vm3, %v13675_v22, 0.0 }
 0x906   : > { %6128 = vadd.xlane.f32.xlu1 %v6127_v43  ;;  %v6124_v33 = vsel %vm1582_vm3, %v13677_v8, 0.0 }
 0x907   : > { %6125 = vadd.xlane.f32.xlu0 %v6124_v33 }
 0x908   : > { %v13683_v19 = vpop.eup %11995 }
 0x909   : > { %v13685_v48 = vpop.eup %11997  ;;  %v6133_v26 = vsel %vm1582_vm3, %v13683_v19, 0.0 }
 0x90a   : > { %6134 = vadd.xlane.f32.xlu1 %v6133_v26  ;;  %v6130_v5 = vsel %vm1582_vm3, %v13685_v48, 0.0  ;;  %v9730_v26 = vld [vmem:[%s14294_s1 + $0x68] sm:$0xff] }
 0x90b   : > { %6131 = vadd.xlane.f32.xlu0 %v6130_v5 }
 0x96f   : > { %v6093_v40 = vpop.xlane.xlu1 %6092 }
 0x970   : > { %11999 = vrcp.f32 %v6093_v40  ;;  %v6090_v54 = vpop.xlane.xlu0 %6089  ;;  %v9731_v40 = vld [vmem:[%s14294_s1 + $0x70] sm:$0xff] }
 0x971   : > { %12001 = vrcp.f32 %v6090_v54  ;;  %v9732_v54 = vld [vmem:[%s14294_s1 + $0x78] sm:$0xff] }
 0x977   : > { %v6099_v47 = vpop.xlane.xlu1 %6098 }
 0x978   : > { %12003 = vrcp.f32 %v6099_v47  ;;  %v6096_v42 = vpop.xlane.xlu0 %6095  ;;  %v11679_v47 = vpack.c.bf16 %v9732_v54, %v9731_v40 }
 0x979   : > { %12005 = vrcp.f32 %v6096_v42  ;;  %v13777_v42 = vld [vmem:[%s12234_s11 + $0x40] sm:$0xff] }
 0x97a   : > { %v12000_v24 = vpop.eup %11999 }
 0x97b   : > { %v12002_v14 = vpop.eup %12001  ;;  %v6139_v56 = vmul.f32 %v12000_v24, %v13615_v57  ;;  %v13782_v24 = vld [vmem:[%s12234_s11 + $0x48] sm:$0xff] }
 0x97c   : > { %v6137_v0 = vmul.f32 %v12002_v14, %v13617_v10  ;;  %v13787_v14 = vld [vmem:[%s12234_s11 + $0x50] sm:$0xff] }
 0x97e   : > { %11051 = vmatprep.mubr.msk.f32.mxu0 %vm1582_vm3, %v6137_v0  ;;  %v13792_v0 = vld [vmem:[%s12234_s11 + $0x58] sm:$0xff] }
 0x97f   : > { %v6105_v28 = vpop.xlane.xlu1 %6104  ;;  %11052 = vmatmul.mubr.msk.f32.vlgmr.msra.gmra.mrb[116].mxu0 %vm1582_vm3, %v6139_v56  ;;  %v13797_v56 = vld [vmem:[%s12234_s11 + $0x60] sm:$0xff] }
 0x980   : > { %12007 = vrcp.f32 %v6105_v28  ;;  %11650 = vmatpush3.bf16.msra.mxu0 %v13523_v6  ;;  %v6102_v60 = vpop.xlane.xlu0 %6101  ;;  %v9773_v28 = vld [vmem:[%s14296_s3 + $0x60] sm:$0xff] }
 0x981   : > { %11656 = vmatprep.subr.bf16.mxu0 %v13542_v49  ;;  %12009 = vrcp.f32 %v6102_v60  ;;  %v9774_v60 = vld [vmem:[%s14296_s3 + $0x68] sm:$0xff] }
 0x982   : > { %v12004_v59 = vpop.eup %12003 }
 0x983   : > { %v12006_v3 = vpop.eup %12005  ;;  %v6143_v10 = vmul.f32 %v12004_v59, %v13625_v46  ;;  %v9775_v59 = vld [vmem:[%s14296_s3 + $0x70] sm:$0xff] }
 0x984   : > { %v6141_v23 = vmul.f32 %v12006_v3, %v13627_v31  ;;  %v11691_v3 = vpack.c.bf16 %v9774_v60, %v9773_v28  ;;  %v13951_v60 = vld [vmem:[%s14299_s6 + $0x3] ss:$0 sm:$0xff] }
 0x986   : > { %11058 = vmatprep.mubr.msk.f32.mxu0 %vm1582_vm3, %v6141_v23  ;;  %v9776_v23 = vld [vmem:[%s14296_s3 + $0x78] sm:$0xff] }
 0x987   : > { %v6111_v57 = vpop.xlane.xlu1 %6110  ;;  %11059 = vmatmul.mubr.msk.f32.vlgmr.msra.gmra.mrb[118].mxu0 %vm1582_vm3, %v6143_v10  ;;  %v11695_v10 = vpack.c.bf16 %v9776_v23, %v9775_v59 }
 0x988   : > { %12011 = vrcp.f32 %v6111_v57  ;;  %11658 = vmatpush3.bf16.msra.mxu0 %v13542_v49  ;;  %v6108_v30 = vpop.xlane.xlu0 %6107  ;;  %v13814_v57 = vld [vmem:[%s12234_s11 + $0x68] sm:$0xff] }
 0x989   : > { %11664 = vmatprep.subr.bf16.mxu0 %v13559_v2  ;;  %12013 = vrcp.f32 %v6108_v30  ;;  %v13819_v30 = vld [vmem:[%s12234_s11 + $0x70] sm:$0xff] }
 0x98a   : > { %v12008_v6 = vpop.eup %12007 }
 0x98b   : > { %v12010_v58 = vpop.eup %12009  ;;  %v6117_v63 = vpop.xlane.xlu1 %6116  ;;  %v6147_v46 = vmul.f32 %v12008_v6, %v13637_v9  ;;  %v13824_v6 = vld [vmem:[%s12234_s11 + $0x78] sm:$0xff] }
 0x98c   : > { %12015 = vrcp.f32 %v6117_v63  ;;  %v6114_v12 = vpop.xlane.xlu0 %6113  ;;  %v6145_v31 = vmul.f32 %v12010_v58, %v13639_v38  ;;  %v9753_v58 = vld [vmem:[%s14295_s2 + $0x70] sm:$0xff]  ;;  %v9754_v63 = vld [vmem:[%s14295_s2 + $0x78] sm:$0xff] }
 0x98d   : > { %12017 = vrcp.f32 %v6114_v12 }
 0x98e   : > { %11065 = vmatprep.mubr.msk.f32.mxu1 %vm1582_vm3, %v6145_v31 }
 0x98f   : > { %v6123_v55 = vpop.xlane.xlu1 %6122  ;;  %11066 = vmatmul.mubr.msk.f32.vlgmr.msra.gmra.mrb[124].mxu1 %vm1582_vm3, %v6147_v46  ;;  %v11687_v46 = vpack.c.bf16 %v9754_v63, %v9753_v58 }
 0x990   : > { %12019 = vrcp.f32 %v6123_v55  ;;  %11662 = vmatpush3.bf16.msra.mxu1 %v13548_v52  ;;  %v6120_v49 = vpop.xlane.xlu0 %6119 }
 0x991   : > { %11668 = vmatprep.subr.bf16.mxu1 %v13565_v32  ;;  %12021 = vrcp.f32 %v6120_v49 }
 0x992   : > { %v12012_v4 = vpop.eup %12011 }
 0x993   : > { %v12014_v34 = vpop.eup %12013  ;;  %v6129_v45 = vpop.xlane.xlu1 %6128  ;;  %v6151_v41 = vmul.f32 %v12012_v4, %v13649_v53 }
 0x994   : > { %12023 = vrcp.f32 %v6129_v45  ;;  %v6126_v38 = vpop.xlane.xlu0 %6125  ;;  %v6149_v9 = vmul.f32 %v12014_v34, %v13651_v25 }
 0x995   : > { %12025 = vrcp.f32 %v6126_v38 }
 0x996   : > { %v12016_v7 = vpop.eup %12015  ;;  %11072 = vmatprep.mubr.msk.f32.mxu0 %vm1582_vm3, %v6149_v9 }
 0x997   : > { %v12018_v20 = vpop.eup %12017  ;;  %v6135_v29 = vpop.xlane.xlu1 %6134  ;;  %11073 = vmatmul.mubr.msk.f32.vlgmr.msra.gmra.mrb[120].mxu0 %vm1582_vm3, %v6151_v41  ;;  %v6155_v35 = vmul.f32 %v12016_v7, %v13659_v50 }
 0x998   : > { %12027 = vrcp.f32 %v6135_v29  ;;  %11666 = vmatpush3.bf16.msra.mxu0 %v13559_v2  ;;  %v6132_v52 = vpop.xlane.xlu0 %6131  ;;  %v6153_v18 = vmul.f32 %v12018_v20, %v13661_v11 }
 0x999   : > { %11672 = vmatprep.subr.bf16.mxu0 %v13575_v51  ;;  %12029 = vrcp.f32 %v6132_v52 }
 0x99a   : > { %v12020_v53 = vpop.eup %12019  ;;  %11079 = vmatprep.mubr.msk.f32.mxu1 %vm1582_vm3, %v6153_v18 }
 0x99b   : > { %v12022_v25 = vpop.eup %12021  ;;  %11080 = vmatmul.mubr.msk.f32.vlgmr.msra.gmra.mrb[126].mxu1 %vm1582_vm3, %v6155_v35  ;;  %v6159_v2 = vmul.f32 %v12020_v53, %v13667_v15 }
 0x99c   : > { %11670 = vmatpush3.bf16.msra.mxu1 %v13565_v32  ;;  %v6157_v44 = vmul.f32 %v12022_v25, %v13669_v37  ;;  %v13731_v37 = vld [vmem:[%s12234_s11] sm:$0xff] }
 0x99e   : > { %v12024_v13 = vpop.eup %12023  ;;  %11086 = vmatprep.mubr.msk.f32.mxu0 %vm1582_vm3, %v6157_v44 }
 0x99f   : > { %v12026_v50 = vpop.eup %12025  ;;  %11087 = vmatmul.mubr.msk.f32.vlgmr.msra.gmra.mrb[122].mxu0 %vm1582_vm3, %v6159_v2  ;;  %v6163_v27 = vmul.f32 %v12024_v13, %v13675_v22  ;;  %v9751_v22 = vld [vmem:[%s14295_s2 + $0x60] sm:$0xff] }
 0x9a0   : > { %11674 = vmatpush3.bf16.msra.mxu0 %v13575_v51  ;;  %v6161_v11 = vmul.f32 %v12026_v50, %v13677_v8  ;;  %v9712_v51 = vld [vmem:[%s14300_s7 + $0x10] sm:$0xff]  ;;  %v9752_v8 = vld [vmem:[%s14295_s2 + $0x68] sm:$0xff] }
 0x9a1   : > { %11103 = vmatprep.subr.mxu0 %v9712_v51 }
 0x9a2   : > { %v12028_v43 = vpop.eup %12027  ;;  %11093 = vmatprep.mubr.msk.f32.mxu1 %vm1582_vm3, %v6161_v11 }
 0x9a3   : > { %v12030_v32 = vpop.eup %12029  ;;  %11094 = vmatmul.mubr.msk.f32.vlgmr.msra.gmra.mrb[128].mxu1 %vm1582_vm3, %v6163_v27  ;;  %v6167_v33 = vmul.f32 %v12028_v43, %v13683_v19  ;;  %v9729_v19 = vld [vmem:[%s14294_s1 + $0x60] sm:$0xff] }
 0x9a4   : > { %v6165_v15 = vmul.f32 %v12030_v32, %v13685_v48  ;;  %11137 = vmatprep.mubr.msk.f32.mxu1 %vm363_vm0, %v13731_v37  ;;  %v13747_v48 = vpack.c.bf16 %v9752_v8, %v9751_v22  ;;  %v11675_v5 = vpack.c.bf16 %v9730_v26, %v9729_v19 }
 0x9a6   : > { %11100 = vmatprep.mubr.msk.f32.mxu0 %vm1582_vm3, %v6165_v15  ;;  %11676 = vmatprep.subr.bf16.mxu1 %v11675_v5 }
 0x9a7   : > { %11101 = vmatmul.mubr.msk.f32.vlgmr.msra.gmra.mrb[124].mxu0 %vm1582_vm3, %v6167_v33  ;;  %11678 = vmatpush3.bf16.msra.mxu1 %v11675_v5 }
 0x9a8   : > { %11104 = vmatpush3.msra.mxu0 %v9712_v51  ;;  %11680 = vmatprep.subr.bf16.mxu1 %v11679_v47 }
 0x9a9   : > { %11684 = vmatprep.subr.bf16.mxu0 %v13747_v48 }
 0x9ab   : > { %11682 = vmatpush3.bf16.msra.mxu1 %v11679_v47 }
 0x9ac   : > { %11692 = vmatprep.subr.bf16.mxu1 %v11691_v3 }
 0x9ae   : > { %11138 = vmatmul.mubr.msk.f32.vlgmr.msra.gmra.mrb[130].mxu1 %vm363_vm0, %v13386_v62 }
 0x9af   : > { %11140 = vmatprep.mubr.msk.f32.mxu1 %vm363_vm0, %v13393_v61  ;;  %11694 = vmatpush3.bf16.msra.mxu1 %v11691_v3 }
 0x9b0   : > { %11696 = vmatprep.subr.bf16.mxu1 %v11695_v10 }
 0x9b2   : > { %11141 = vmatmul.mubr.msk.f32.gmra.mrb[132].mxu1 %vm363_vm0, %v13403_v39 }
 0x9b3   : > { %11143 = vmatprep.mubr.msk.f32.mxu1 %vm363_vm0, %v13408_v36  ;;  %11698 = vmatpush3.bf16.msra.mxu1 %v11695_v10 }
 0x9b6   : > { %11144 = vmatmul.mubr.msk.f32.gmra.mrb[134].mxu1 %vm363_vm0, %v13421_v1 }
 0x9b7   : > { %11146 = vmatprep.mubr.msk.f32.mxu1 %vm363_vm0, %v13430_v16 }
 0x9ba   : > { %11147 = vmatmul.mubr.msk.f32.gmra.mrb[136].mxu1 %vm363_vm0, %v13437_v21 }
 0x9bb   : > { %11149 = vmatprep.mubr.msk.f32.mxu1 %vm363_vm0, %v13777_v42 }
 0x9be   : > { %11150 = vmatmul.mubr.msk.f32.gmra.mrb[138].mxu1 %vm363_vm0, %v13782_v24 }
 0x9bf   : > { %11152 = vmatprep.mubr.msk.f32.mxu1 %vm363_vm0, %v13787_v14 }
 0x9c2   : > { %11153 = vmatmul.mubr.msk.f32.gmra.mrb[140].mxu1 %vm363_vm0, %v13792_v0 }
 0x9c3   : > { %11155 = vmatprep.mubr.msk.f32.mxu1 %vm363_vm0, %v13797_v56 }
 0x9c6   : > { %11156 = vmatmul.mubr.msk.f32.gmra.mrb[142].mxu1 %vm363_vm0, %v13814_v57 }
 0x9c7   : > { %11158 = vmatprep.mubr.msk.f32.mxu1 %vm363_vm0, %v13819_v30 }
 0x9ca   : > { %11159 = vmatmul.mubr.msk.f32.gmra.mrb[144].mxu1 %vm363_vm0, %v13824_v6 }
 0x9cb   : > { %11201 = vmatprep.mubr.msk.f32.mxu1 %vm363_vm0, %v13731_v37 }
 0x9ce   : > { %11202 = vmatmul.mubr.msk.f32.vlgmr.msra.gmra.mrb[146].mxu1 %vm363_vm0, %v13386_v62 }
 0x9cf   : > { %11204 = vmatprep.mubr.msk.f32.mxu1 %vm363_vm0, %v13393_v61 }
 0x9d2   : > { %11205 = vmatmul.mubr.msk.f32.gmra.mrb[148].mxu1 %vm363_vm0, %v13403_v39 }
 0x9d3   : > { %11207 = vmatprep.mubr.msk.f32.mxu1 %vm363_vm0, %v13408_v36 }
 0x9d6   : > { %11208 = vmatmul.mubr.msk.f32.gmra.mrb[150].mxu1 %vm363_vm0, %v13421_v1 }
 0x9d7   : > { %11210 = vmatprep.mubr.msk.f32.mxu1 %vm363_vm0, %v13430_v16 }
 0x9da   : > { %11211 = vmatmul.mubr.msk.f32.gmra.mrb[152].mxu1 %vm363_vm0, %v13437_v21 }
 0x9db   : > { %11213 = vmatprep.mubr.msk.f32.mxu1 %vm363_vm0, %v13777_v42 }
 0x9de   : > { %11214 = vmatmul.mubr.msk.f32.gmra.mrb[154].mxu1 %vm363_vm0, %v13782_v24 }
 0x9df   : > { %11216 = vmatprep.mubr.msk.f32.mxu1 %vm363_vm0, %v13787_v14 }
 0x9e2   : > { %11217 = vmatmul.mubr.msk.f32.gmra.mrb[156].mxu1 %vm363_vm0, %v13792_v0 }
 0x9e3   : > { %11219 = vmatprep.mubr.msk.f32.mxu1 %vm363_vm0, %v13797_v56 }
 0x9e6   : > { %11220 = vmatmul.mubr.msk.f32.gmra.mrb[158].mxu1 %vm363_vm0, %v13814_v57 }
 0x9e7   : > { %11222 = vmatprep.mubr.msk.f32.mxu1 %vm363_vm0, %v13819_v30 }
 0x9ea   : > { %11223 = vmatmul.mubr.msk.f32.gmra.mrb[160].mxu1 %vm363_vm0, %v13824_v6 }
 0xa52   : > { %v11053_v12 = vpop.f32.mrb[116].mxu0 }
 0xa53   : > { %v6240_v31 = vpop.f32.mrb[117].mxu0 }
 0xa54   : > { %11105 = vmatprep.mubr.msk.f32.mxu0 %vm885_vm1, %v6240_v31 }
 0xa55   : > { %11106 = vmatmul.mubr.msk.f32.vlgmr.msra.gmra.mrb[80].mxu0 %vm885_vm1, %v11053_v12 }
 0xa56   : > { %11686 = vmatpush3.bf16.msra.mxu0 %v13747_v48 }
 0xa57   : > { %11688 = vmatprep.subr.bf16.mxu0 %v11687_v46 }
 0xa5a   : > { %v11060_v55 = vpop.f32.mrb[118].mxu0  ;;  %11690 = vmatpush3.bf16.msra.mxu0 %v11687_v46 }
 0xa5b   : > { %v6321_v49 = vpop.f32.mrb[119].mxu0 }
 0xa5c   : > { %11108 = vmatprep.mubr.msk.f32.mxu0 %vm885_vm1, %v6321_v49 }
 0xa5d   : > { %11109 = vmatmul.mubr.msk.f32.gmra.mrb[82].mxu0 %vm885_vm1, %v11060_v55 }
 0xa62   : > { %v11067_v4 = vpop.f32.mrb[124].mxu1 }
 0xa63   : > { %v6402_v34 = vpop.f32.mrb[125].mxu1 }
 0xa64   : > { %11111 = vmatprep.mubr.msk.f32.mxu0 %vm885_vm1, %v6402_v34 }
 0xa65   : > { %11112 = vmatmul.mubr.msk.f32.gmra.mrb[84].mxu0 %vm885_vm1, %v11067_v4 }
 0xa6a   : > { %v11074_v45 = vpop.f32.mrb[120].mxu0 }
 0xa6b   : > { %v6483_v38 = vpop.f32.mrb[121].mxu0 }
 0xa6c   : > { %11114 = vmatprep.mubr.msk.f32.mxu0 %vm885_vm1, %v6483_v38 }
 0xa6d   : > { %11115 = vmatmul.mubr.msk.f32.gmra.mrb[86].mxu0 %vm885_vm1, %v11074_v45 }
 0xa6e   : > { %v11081_v9 = vpop.f32.mrb[126].mxu1 }
 0xa6f   : > { %v6564_v41 = vpop.f32.mrb[127].mxu1 }
 0xa70   : > { %11117 = vmatprep.mubr.msk.f32.mxu0 %vm885_vm1, %v6564_v41 }
 0xa71   : > { %11118 = vmatmul.mubr.msk.f32.gmra.mrb[88].mxu0 %vm885_vm1, %v11081_v9 }
 0xa72   : > { %v11088_v7 = vpop.f32.mrb[122].mxu0 }
 0xa73   : > { %v6645_v20 = vpop.f32.mrb[123].mxu0 }
 0xa74   : > { %11120 = vmatprep.mubr.msk.f32.mxu0 %vm885_vm1, %v6645_v20 }
 0xa75   : > { %11121 = vmatmul.mubr.msk.f32.gmra.mrb[90].mxu0 %vm885_vm1, %v11088_v7 }
 0xa76   : > { %v11095_v29 = vpop.f32.mrb[128].mxu1 }
 0xa77   : > { %v6726_v52 = vpop.f32.mrb[129].mxu1 }
 0xa78   : > { %11123 = vmatprep.mubr.msk.f32.mxu0 %vm885_vm1, %v6726_v52 }
 0xa79   : > { %11124 = vmatmul.mubr.msk.f32.gmra.mrb[92].mxu0 %vm885_vm1, %v11095_v29 }
 0xa7a   : > { %v11102_v18 = vpop.f32.mrb[124].mxu0 }
 0xa7b   : > { %v6807_v35 = vpop.f32.mrb[125].mxu0 }
 0xa7c   : > { %11126 = vmatprep.mubr.msk.f32.mxu0 %vm885_vm1, %v6807_v35 }
 0xa7d   : > { %11127 = vmatmul.mubr.msk.f32.gmra.mrb[94].mxu0 %vm885_vm1, %v11102_v18 }
 0xa7e   : > { %11169 = vmatprep.mubr.msk.f32.mxu0 %vm363_vm0, %v13731_v37 }
 0xa81   : > { %11170 = vmatmul.mubr.msk.f32.vlgmr.msra.gmra.mrb[126].mxu0 %vm363_vm0, %v13386_v62  ;;  %v11139_v62 = vpop.f32.mrb[130].mxu1 }
 0xa82   : > { %11172 = vmatprep.mubr.msk.f32.mxu0 %vm363_vm0, %v13393_v61  ;;  %v9734_v61 = vld [vmem:[%s14297_s4 + $0x3] ss:$0 sm:$0xff] }
 0xa85   : > { %11173 = vmatmul.mubr.msk.f32.gmra.mrb[128].mxu0 %vm363_vm0, %v13403_v39  ;;  %v7106_v39 = vpop.f32.mrb[131].mxu1 }
 0xa86   : > { %11175 = vmatprep.mubr.msk.f32.mxu0 %vm363_vm0, %v13408_v36  ;;  %v13918_v36 = vadd.f32 %v11139_v62, %v9734_v61 }
 0xa89   : > { %11176 = vmatmul.mubr.msk.f32.gmra.mrb[130].mxu0 %vm363_vm0, %v13421_v1  ;;  %v7107_v1 = vadd.f32 %v9734_v61, %v7106_v39 }
 0xa8a   : > { %11178 = vmatprep.mubr.msk.f32.mxu0 %vm363_vm0, %v13430_v16 }
 0xa8b   : > { %v7185_v16 = vmul.f32 0.35355338, %v7107_v1 }
 0xa8d   : > { %11179 = vmatmul.mubr.msk.f32.gmra.mrb[132].mxu0 %vm363_vm0, %v13437_v21  ;;  %v11142_v21 = vpop.f32.mrb[132].mxu1 }
 0xa8e   : > { %11181 = vmatprep.mubr.msk.f32.mxu0 %vm363_vm0, %v13777_v42  ;;  %v13920_v53 = vadd.f32 %v11142_v21, %v9734_v61  ;;  %v7116_v25 = vpop.f32.mrb[133].mxu1 }
 0xa8f   : > { %v7117_v44 = vadd.f32 %v9734_v61, %v7116_v25  ;;  %v11145_v13 = vpop.f32.mrb[134].mxu1 }
 0xa90   : > { %v13923_v50 = vadd.f32 %v11145_v13, %v9734_v61  ;;  %v7126_v11 = vpop.f32.mrb[135].mxu1 }
 0xa91   : > { %11182 = vmatmul.mubr.msk.f32.gmra.mrb[134].mxu0 %vm363_vm0, %v13782_v24  ;;  %v7187_v2 = vmul.f32 0.35355338, %v7117_v44  ;;  %v13925_v27 = vadd.f32 %v9734_v61, %v7126_v11  ;;  %v11148_v43 = vpop.f32.mrb[136].mxu1 }
 0xa92   : > { %11184 = vmatprep.mubr.msk.f32.mxu0 %vm363_vm0, %v13787_v14  ;;  %v13928_v32 = vadd.f32 %v11148_v43, %v9734_v61  ;;  %v7136_v15 = vpop.f32.mrb[137].mxu1 }
 0xa93   : > { %11236 = vmatprep.mubr.msk.f32.mxu1 %vm885_vm1, %v7187_v2  ;;  %v13930_v37 = vadd.f32 %v9734_v61, %v7136_v15  ;;  %v11151_v33 = vpop.f32.mrb[138].mxu1 }
 0xa94   : > { %v13932_v51 = vadd.f32 %v11151_v33, %v9734_v61  ;;  %v7146_v22 = vpop.f32.mrb[139].mxu1 }
 0xa95   : > { %11185 = vmatmul.mubr.msk.f32.gmra.mrb[136].mxu0 %vm363_vm0, %v13792_v0  ;;  %v13934_v8 = vadd.f32 %v9734_v61, %v7146_v22  ;;  %v11154_v48 = vpop.f32.mrb[140].mxu1 }
 0xa96   : > { %11187 = vmatprep.mubr.msk.f32.mxu0 %vm363_vm0, %v13797_v56  ;;  %v13936_v19 = vadd.f32 %v11154_v48, %v9734_v61  ;;  %v7156_v26 = vpop.f32.mrb[141].mxu1 }
 0xa97   : > { %v13938_v5 = vadd.f32 %v9734_v61, %v7156_v26 }
 0xa99   : > { %11188 = vmatmul.mubr.msk.f32.gmra.mrb[138].mxu0 %vm363_vm0, %v13814_v57  ;;  %v11157_v40 = vpop.f32.mrb[142].mxu1 }
 0xa9a   : > { %11190 = vmatprep.mubr.msk.f32.mxu0 %vm363_vm0, %v13819_v30  ;;  %v13940_v54 = vadd.f32 %v11157_v40, %v9734_v61  ;;  %v7166_v47 = vpop.f32.mrb[143].mxu1 }
 0xa9b   : > { %v13942_v42 = vadd.f32 %v9734_v61, %v7166_v47 }
 0xa9d   : > { %11191 = vmatmul.mubr.msk.f32.gmra.mrb[140].mxu0 %vm363_vm0, %v13824_v6  ;;  %v11160_v24 = vpop.f32.mrb[144].mxu1 }
 0xa9e   : > { %11229 = vmatprep.mubr.msk.f32.mxu0 %vm885_vm1, %v7185_v16  ;;  %v13944_v14 = vadd.f32 %v11160_v24, %v9734_v61  ;;  %v7176_v0 = vpop.f32.mrb[145].mxu1  ;;  %v13982_v16 = vld [vmem:[%s14298_s5 + $0x3] ss:$0 sm:$0xff]  ;;  %v7189_v24 = vmul.f32 0.35355338, %v13925_v27 }
 0xa9f   : > { %v13946_v56 = vadd.f32 %v9734_v61, %v7176_v0  ;;  %v7186_v0 = vmul.f32 0.35355338, %v13918_v36  ;;  %v7188_v36 = vmul.f32 0.35355338, %v13920_v53  ;;  %v7190_v53 = vmul.f32 0.35355338, %v13923_v50 }
 0xaa0   : > { %v7192_v50 = vmul.f32 0.35355338, %v13928_v32  ;;  %v7194_v32 = vmul.f32 0.35355338, %v13932_v51  ;;  %v7196_v51 = vmul.f32 0.35355338, %v13936_v19 }
 0xaa1   : > { %v11203_v28 = vpop.f32.mrb[146].mxu1  ;;  %v7200_v19 = vmul.f32 0.35355338, %v13944_v14 }
 0xaa2   : > { %v7444_v59 = vadd.f32 %v11203_v28, %v13951_v60  ;;  %v7438_v3 = vpop.f32.mrb[147].mxu1 }
 0xaa3   : > { %v7439_v23 = vadd.f32 %v13951_v60, %v7438_v3 }
 0xaa5   : > { %v11206_v10 = vpop.f32.mrb[148].mxu1  ;;  %v13956_v6 = vpack.c.bf16 %v7444_v59, %v7439_v23 }
 0xaa6   : > { %v7454_v57 = vadd.f32 %v11206_v10, %v13951_v60  ;;  %v7448_v30 = vpop.f32.mrb[149].mxu1 }
 0xaa7   : > { %v7449_v58 = vadd.f32 %v13951_v60, %v7448_v30 }
 0xaa9   : > { %v11209_v63 = vpop.f32.mrb[150].mxu1  ;;  %v13959_v12 = vpack.c.bf16 %v7454_v57, %v7449_v58  ;;  %v7191_v57 = vmul.f32 0.35355338, %v13930_v37  ;;  %v7193_v37 = vmul.f32 0.35355338, %v13934_v8 }
 0xaaa   : > { %v7464_v31 = vadd.f32 %v11209_v63, %v13951_v60  ;;  %v7458_v46 = vpop.f32.mrb[151].mxu1  ;;  %v7195_v8 = vmul.f32 0.35355338, %v13938_v5  ;;  %v7197_v5 = vmul.f32 0.35355338, %v13942_v42 }
 0xaab   : > { %v7459_v55 = vadd.f32 %v13951_v60, %v7458_v46  ;;  %v7199_v42 = vmul.f32 0.35355338, %v13946_v56 }
 0xaad   : > { %v13963_v49 = vpack.c.bf16 %v7464_v31, %v7459_v55  ;;  %v11212_v4 = vpop.f32.mrb[152].mxu1 }
 0xaae   : > { %v7474_v34 = vadd.f32 %v11212_v4, %v13951_v60  ;;  %v7468_v45 = vpop.f32.mrb[153].mxu1 }
 0xaaf   : > { %v7469_v38 = vadd.f32 %v13951_v60, %v7468_v45 }
 0xab1   : > { %v13967_v9 = vpack.c.bf16 %v7474_v34, %v7469_v38  ;;  %v11215_v41 = vpop.f32.mrb[154].mxu1 }
 0xab2   : > { %v7484_v7 = vadd.f32 %v11215_v41, %v13951_v60  ;;  %v7478_v20 = vpop.f32.mrb[155].mxu1 }
 0xab3   : > { %v7479_v29 = vadd.f32 %v13951_v60, %v7478_v20 }
 0xab5   : > { %v13971_v52 = vpack.c.bf16 %v7484_v7, %v7479_v29  ;;  %v11218_v18 = vpop.f32.mrb[156].mxu1 }
 0xab6   : > { %v7494_v35 = vadd.f32 %v11218_v18, %v13951_v60  ;;  %v7488_v62 = vpop.f32.mrb[157].mxu1 }
 0xab7   : > { %v7489_v61 = vadd.f32 %v13951_v60, %v7488_v62 }
 0xab9   : > { %v13975_v39 = vpack.c.bf16 %v7494_v35, %v7489_v61  ;;  %v13977_v1 = vpop.f32.mrb[158].mxu1 }
 0xaba   : > { %v7504_v17 = vadd.f32 %v13977_v1, %v13951_v60 }
 0xb54   : > { %v11171_v21 = vpop.f32.mrb[126].mxu0 }
 0xb55   : > { %v7286_v25 = vadd.f32 %v11171_v21, %v13982_v16  ;;  %v7280_v44 = vpop.f32.mrb[127].mxu0 }
 0xb56   : > { %v7281_v2 = vadd.f32 %v13982_v16, %v7280_v44 }
 0xb58   : > { %v11699_v13 = vpack.c.bf16 %v7286_v25, %v7281_v2  ;;  %v11174_v11 = vpop.f32.mrb[128].mxu0 }
 0xb59   : > { %v7296_v43 = vadd.f32 %v11174_v11, %v13982_v16  ;;  %v7290_v15 = vpop.f32.mrb[129].mxu0 }
 0xb5a   : > { %v7291_v33 = vadd.f32 %v13982_v16, %v7290_v15  ;;  %11701 = vmatprep.subr.msk.bf16.mxu0 %vm12404_vm2, %v11699_v13 }
 0xb5b   : > { %11704 = vmatpush3.bf16.xpose.msk.msra.mxu0 %vm12404_vm2, %v11699_v13 }
 0xb5c   : > { %v11705_v22 = vpack.c.bf16 %v7296_v43, %v7291_v33  ;;  %v11177_v48 = vpop.f32.mrb[130].mxu0 }
 0xb5d   : > { %v7306_v26 = vadd.f32 %v11177_v48, %v13982_v16  ;;  %v7300_v40 = vpop.f32.mrb[131].mxu0 }
 0xb5e   : > { %v7301_v47 = vadd.f32 %v13982_v16, %v7300_v40  ;;  %11707 = vmatprep.subr.msk.bf16.mxu1 %vm12404_vm2, %v11705_v22 }
 0xb5f   : > { %11710 = vmatpush3.bf16.xpose.msk.msra.mxu1 %vm12404_vm2, %v11705_v22 }
 0xb60   : > { %v11711_v28 = vpack.c.bf16 %v7306_v26, %v7301_v47  ;;  %v11180_v59 = vpop.f32.mrb[132].mxu0 }
 0xb61   : > { %v7316_v3 = vadd.f32 %v11180_v59, %v13982_v16  ;;  %v7310_v23 = vpop.f32.mrb[133].mxu0 }
 0xb62   : > { %v7311_v10 = vadd.f32 %v13982_v16, %v7310_v23  ;;  %11230 = vmatmul.mubr.msk.f32.vlgmr.msra.gmra.mrb[142].mxu0 %vm885_vm1, %v7186_v0  ;;  %11713 = vmatprep.subr.msk.bf16.mxu0 %vm12404_vm2, %v11711_v28 }
 0xb63   : > { %11716 = vmatpush3.bf16.xpose.msk.msra.mxu0 %vm12404_vm2, %v11711_v28  ;;  %11243 = vmatprep.mubr.msk.f32.mxu0 %vm885_vm1, %v7189_v24 }
 0xb64   : > { %v11717_v27 = vpack.c.bf16 %v7316_v3, %v7311_v10  ;;  %v11183_v30 = vpop.f32.mrb[134].mxu0 }
 0xb65   : > { %v7326_v58 = vadd.f32 %v11183_v30, %v13982_v16  ;;  %v7320_v63 = vpop.f32.mrb[135].mxu0 }
 0xb66   : > { %v7321_v31 = vadd.f32 %v13982_v16, %v7320_v63  ;;  %11237 = vmatmul.mubr.msk.f32.vlgmr.msra.gmra.mrb[162].mxu1 %vm885_vm1, %v7188_v36  ;;  %11719 = vmatprep.subr.msk.bf16.mxu1 %vm12404_vm2, %v11717_v27 }
 0xb67   : > { %11722 = vmatpush3.bf16.xpose.msk.msra.mxu1 %vm12404_vm2, %v11717_v27  ;;  %11250 = vmatprep.mubr.msk.f32.mxu1 %vm885_vm1, %v7191_v57 }
 0xb68   : > { %v11723_v46 = vpack.c.bf16 %v7326_v58, %v7321_v31  ;;  %v11186_v55 = vpop.f32.mrb[136].mxu0 }
 0xb69   : > { %v7336_v4 = vadd.f32 %v11186_v55, %v13982_v16  ;;  %v7330_v34 = vpop.f32.mrb[137].mxu0 }
 0xb6a   : > { %v7331_v45 = vadd.f32 %v13982_v16, %v7330_v34  ;;  %11244 = vmatmul.mubr.msk.f32.vlgmr.msra.gmra.mrb[144].mxu0 %vm885_vm1, %v7190_v53  ;;  %11725 = vmatprep.subr.msk.bf16.mxu0 %vm12404_vm2, %v11723_v46 }
 0xb6b   : > { %11728 = vmatpush3.bf16.xpose.msk.msra.mxu0 %vm12404_vm2, %v11723_v46  ;;  %11257 = vmatprep.mubr.msk.f32.mxu0 %vm885_vm1, %v7193_v37 }
 0xb6c   : > { %v11729_v38 = vpack.c.bf16 %v7336_v4, %v7331_v45  ;;  %v11189_v41 = vpop.f32.mrb[138].mxu0 }
 0xb6d   : > { %v7346_v7 = vadd.f32 %v11189_v41, %v13982_v16  ;;  %v7340_v20 = vpop.f32.mrb[139].mxu0 }
 0xb6e   : > { %v7341_v29 = vadd.f32 %v13982_v16, %v7340_v20  ;;  %11251 = vmatmul.mubr.msk.f32.vlgmr.msra.gmra.mrb[164].mxu1 %vm885_vm1, %v7192_v50  ;;  %11731 = vmatprep.subr.msk.bf16.mxu1 %vm12404_vm2, %v11729_v38 }
 0xb6f   : > { %11734 = vmatpush3.bf16.xpose.msk.msra.mxu1 %vm12404_vm2, %v11729_v38  ;;  %11264 = vmatprep.mubr.msk.f32.mxu1 %vm885_vm1, %v7195_v8 }
 0xb70   : > { %v11735_v18 = vpack.c.bf16 %v7346_v7, %v7341_v29  ;;  %v11192_v35 = vpop.f32.mrb[140].mxu0 }
 0xb71   : > { %v7356_v62 = vadd.f32 %v11192_v35, %v13982_v16  ;;  %v7350_v61 = vpop.f32.mrb[141].mxu0 }
 0xb72   : > { %v7351_v21 = vadd.f32 %v13982_v16, %v7350_v61  ;;  %11258 = vmatmul.mubr.msk.f32.vlgmr.msra.gmra.mrb[146].mxu0 %vm885_vm1, %v7194_v32  ;;  %11737 = vmatprep.subr.msk.bf16.mxu0 %vm12404_vm2, %v11735_v18  ;;  %v7198_v16 = vmul.f32 0.35355338, %v13940_v54  ;;  %v7498_v54 = vpop.f32.mrb[159].mxu1 }
 0xb73   : > { %11740 = vmatpush3.bf16.xpose.msk.msra.mxu0 %vm12404_vm2, %v11735_v18  ;;  %11271 = vmatprep.mubr.msk.f32.mxu0 %vm885_vm1, %v7197_v5  ;;  %v7499_v56 = vadd.f32 %v13951_v60, %v7498_v54  ;;  %v11224_v2 = vpop.f32.mrb[160].mxu1 }
 0xb74   : > { %v11741_v25 = vpack.c.bf16 %v7356_v62, %v7351_v21  ;;  %11748 = vmatprep.subr.bf16.mxu0 %v13956_v6  ;;  %v7508_v14 = vpop.f32.mrb[161].mxu1 }
 0xb75   : > { %v14069_v44 = vpack.c.bf16 %v7504_v17, %v7499_v56  ;;  %v7509_v13 = vadd.f32 %v13951_v60, %v7508_v14 }
 0xb76   : > { %11265 = vmatmul.mubr.msk.f32.vlgmr.msra.gmra.mrb[166].mxu1 %vm885_vm1, %v7196_v51  ;;  %11743 = vmatprep.subr.msk.bf16.mxu1 %vm12404_vm2, %v11741_v25 }
 0xb77   : > { %11746 = vmatpush3.bf16.xpose.msk.msra.mxu1 %vm12404_vm2, %v11741_v25  ;;  %11278 = vmatprep.mubr.msk.f32.mxu1 %vm885_vm1, %v7199_v42 }
 0xb78   : > { %11752 = vmatprep.subr.bf16.mxu1 %v13959_v12 }
 0xb7a   : > { %11272 = vmatmul.mubr.msk.f32.vlgmr.msra.gmra.mrb[148].mxu0 %vm885_vm1, %v7198_v16 }
 0xb7b   : > { %11750 = vmatpush3.bf16.msra.mxu0 %v13956_v6  ;;  %v7514_v6 = vadd.f32 %v11224_v2, %v13951_v60 }
 0xb7c   : > { %11756 = vmatprep.subr.bf16.mxu0 %v13963_v49 }
 0xb7d   : > { %v14073_v11 = vpack.c.bf16 %v7514_v6, %v7509_v13 }
 0xb7e   : > { %11279 = vmatmul.mubr.msk.f32.vlgmr.msra.gmra.mrb[168].mxu1 %vm885_vm1, %v7200_v19 }
 0xb7f   : > { %11754 = vmatpush3.bf16.msra.mxu1 %v13959_v12 }
 0xb80   : > { %11760 = vmatprep.subr.bf16.mxu1 %v13967_v9 }
 0xc35   : > { %v11231_v43 = vpop.f32.mrb[142].mxu0 }
 0xc36   : > { %v7595_v12 = vpop.f32.mrb[143].mxu0  ;;  %v8216_v15 = vsel %vm1582_vm3, %v11231_v43, -inf }
 0xc37   : > { %8217 = vmax.xlane.f32.xlu1 %v8216_v15  ;;  %v8213_v1 = vsel %vm1582_vm3, %v7595_v12, -inf }
 0xc38   : > { %8214 = vmax.xlane.f32.xlu0 %v8213_v1 }
 0xc39   : > { %v11238_v33 = vpop.f32.mrb[162].mxu1 }
 0xc3a   : > { %v7682_v22 = vpop.f32.mrb[163].mxu1  ;;  %v8222_v48 = vsel %vm1582_vm3, %v11238_v33, -inf }
 0xc3b   : > { %8223 = vmax.xlane.f32.xlu1 %v8222_v48  ;;  %v8219_v26 = vsel %vm1582_vm3, %v7682_v22, -inf }
 0xc3c   : > { %8220 = vmax.xlane.f32.xlu0 %v8219_v26 }
 0xc3d   : > { %v11245_v40 = vpop.f32.mrb[144].mxu0 }
 0xc3e   : > { %v7769_v60 = vpop.f32.mrb[145].mxu0  ;;  %v8228_v47 = vsel %vm1582_vm3, %v11245_v40, -inf }
 0xc3f   : > { %8229 = vmax.xlane.f32.xlu1 %v8228_v47  ;;  %v8225_v24 = vsel %vm1582_vm3, %v7769_v60, -inf }
 0xc40   : > { %8226 = vmax.xlane.f32.xlu0 %v8225_v24 }
 0xc41   : > { %v11252_v0 = vpop.f32.mrb[164].mxu1 }
 0xc42   : > { %v7856_v28 = vpop.f32.mrb[165].mxu1  ;;  %v8234_v59 = vsel %vm1582_vm3, %v11252_v0, -inf }
 0xc43   : > { %8235 = vmax.xlane.f32.xlu1 %v8234_v59  ;;  %v8231_v3 = vsel %vm1582_vm3, %v7856_v28, -inf }
 0xc44   : > { %8232 = vmax.xlane.f32.xlu0 %v8231_v3 }
 0xc45   : > { %v14083_v23 = vpop.f32.mrb[146].mxu0 }
 0xc46   : > { %v14085_v10 = vpop.f32.mrb[147].mxu0  ;;  %v8240_v57 = vsel %vm1582_vm3, %v14083_v23, -inf }
 0xc47   : > { %8241 = vmax.xlane.f32.xlu1 %v8240_v57  ;;  %v8237_v36 = vsel %vm1582_vm3, %v14085_v10, -inf }
 0xc48   : > { %8238 = vmax.xlane.f32.xlu0 %v8237_v36 }
 0xc49   : > { %v14091_v27 = vpop.f32.mrb[166].mxu1 }
 0xc4a   : > { %v14093_v30 = vpop.f32.mrb[167].mxu1  ;;  %v8246_v58 = vsel %vm1582_vm3, %v14091_v27, -inf }
 0xc4b   : > { %8247 = vmax.xlane.f32.xlu1 %v8246_v58  ;;  %v8243_v63 = vsel %vm1582_vm3, %v14093_v30, -inf }
 0xc4c   : > { %8244 = vmax.xlane.f32.xlu0 %v8243_v63 }
 0xc4d   : > { %v14099_v31 = vpop.f32.mrb[148].mxu0 }
 0xc4e   : > { %v14101_v37 = vpop.f32.mrb[149].mxu0  ;;  %v8252_v53 = vsel %vm1582_vm3, %v14099_v31, -inf }
 0xc4f   : > { %8253 = vmax.xlane.f32.xlu1 %v8252_v53  ;;  %v8249_v46 = vsel %vm1582_vm3, %v14101_v37, -inf }
 0xc50   : > { %8250 = vmax.xlane.f32.xlu0 %v8249_v46 }
 0xc51   : > { %v14107_v55 = vpop.f32.mrb[168].mxu1 }
 0xc52   : > { %v14109_v4 = vpop.f32.mrb[169].mxu1  ;;  %v8258_v34 = vsel %vm1582_vm3, %v14107_v55, -inf }
 0xc53   : > { %8259 = vmax.xlane.f32.xlu1 %v8258_v34  ;;  %v8255_v45 = vsel %vm1582_vm3, %v14109_v4, -inf }
 0xc54   : > { %8256 = vmax.xlane.f32.xlu0 %v8255_v45 }
 0xcc4   : > { %v8218_v8 = vpop.xlane.xlu1 %8217 }
 0xcc5   : > { %v8262_v50 = vsub.f32 %v11231_v43, %v8218_v8  ;;  %v8215_v38 = vpop.xlane.xlu0 %8214 }
 0xcc6   : > { %v8261_v41 = vsub.f32 %v7595_v12, %v8215_v38 }
 0xcc7   : > { %v8279_v7 = vmul.f32 1.442695, %v8262_v50 }
 0xcc8   : > { %v8277_v20 = vmul.f32 1.442695, %v8261_v41  ;;  %v8224_v29 = vpop.xlane.xlu1 %8223 }
 0xcc9   : > { %12031 = vpow2.f32 %v8279_v7  ;;  %v8264_v5 = vsub.f32 %v11238_v33, %v8224_v29  ;;  %v8221_v32 = vpop.xlane.xlu0 %8220 }
 0xcca   : > { %12033 = vpow2.f32 %v8277_v20  ;;  %v8263_v18 = vsub.f32 %v7682_v22, %v8221_v32 }
 0xccb   : > { %v8283_v35 = vmul.f32 1.442695, %v8264_v5 }
 0xccc   : > { %v8281_v62 = vmul.f32 1.442695, %v8263_v18  ;;  %v8230_v61 = vpop.xlane.xlu1 %8229 }
 0xccd   : > { %12035 = vpow2.f32 %v8283_v35  ;;  %v8266_v21 = vsub.f32 %v11245_v40, %v8230_v61  ;;  %v8227_v42 = vpop.xlane.xlu0 %8226 }
 0xcce   : > { %12037 = vpow2.f32 %v8281_v62  ;;  %v8265_v51 = vsub.f32 %v7769_v60, %v8227_v42 }
 0xccf   : > { %v8287_v25 = vmul.f32 1.442695, %v8266_v21 }
 0xcd0   : > { %v8285_v16 = vmul.f32 1.442695, %v8265_v51  ;;  %v8236_v19 = vpop.xlane.xlu1 %8235 }
 0xcd1   : > { %12039 = vpow2.f32 %v8287_v25  ;;  %v8268_v17 = vsub.f32 %v11252_v0, %v8236_v19  ;;  %v8233_v54 = vpop.xlane.xlu0 %8232 }
 0xcd2   : > { %12041 = vpow2.f32 %v8285_v16  ;;  %v8267_v56 = vsub.f32 %v7856_v28, %v8233_v54 }
 0xcd3   : > { %v14115_v2 = vpop.eup %12031  ;;  %v8291_v6 = vmul.f32 1.442695, %v8268_v17 }
 0xcd4   : > { %v14117_v14 = vpop.eup %12033  ;;  %v8289_v13 = vmul.f32 1.442695, %v8267_v56  ;;  %v8242_v43 = vpop.xlane.xlu1 %8241  ;;  %v8312_v12 = vsel %vm1582_vm3, %v14115_v2, 0.0 }
 0xcd5   : > { %12043 = vpow2.f32 %v8291_v6  ;;  %v8270_v15 = vsub.f32 %v14083_v23, %v8242_v43  ;;  %v8239_v1 = vpop.xlane.xlu0 %8238  ;;  %8313 = vadd.xlane.f32.xlu1 %v8312_v12  ;;  %v8309_v33 = vsel %vm1582_vm3, %v14117_v14, 0.0 }
 0xcd6   : > { %12045 = vpow2.f32 %v8289_v13  ;;  %v8269_v22 = vsub.f32 %v14085_v10, %v8239_v1  ;;  %8310 = vadd.xlane.f32.xlu0 %v8309_v33 }
 0xcd7   : > { %v14125_v48 = vpop.eup %12035  ;;  %v8295_v26 = vmul.f32 1.442695, %v8270_v15 }
 0xcd8   : > { %v14127_v40 = vpop.eup %12037  ;;  %v8293_v60 = vmul.f32 1.442695, %v8269_v22  ;;  %v8248_v47 = vpop.xlane.xlu1 %8247  ;;  %v8318_v24 = vsel %vm1582_vm3, %v14125_v48, 0.0 }
 0xcd9   : > { %12047 = vpow2.f32 %v8295_v26  ;;  %v8272_v0 = vsub.f32 %v14091_v27, %v8248_v47  ;;  %v8245_v28 = vpop.xlane.xlu0 %8244  ;;  %8319 = vadd.xlane.f32.xlu1 %v8318_v24  ;;  %v8315_v59 = vsel %vm1582_vm3, %v14127_v40, 0.0 }
 0xcda   : > { %12049 = vpow2.f32 %v8293_v60  ;;  %v8271_v3 = vsub.f32 %v14093_v30, %v8245_v28  ;;  %8316 = vadd.xlane.f32.xlu0 %v8315_v59 }
 0xcdb   : > { %v14135_v23 = vpop.eup %12039  ;;  %v8299_v10 = vmul.f32 1.442695, %v8272_v0 }
 0xcdc   : > { %v14137_v57 = vpop.eup %12041  ;;  %v8297_v36 = vmul.f32 1.442695, %v8271_v3  ;;  %v8254_v58 = vpop.xlane.xlu1 %8253  ;;  %v8324_v63 = vsel %vm1582_vm3, %v14135_v23, 0.0 }
 0xcdd   : > { %12051 = vpow2.f32 %v8299_v10  ;;  %v8274_v27 = vsub.f32 %v14099_v31, %v8254_v58  ;;  %8325 = vadd.xlane.f32.xlu1 %v8324_v63  ;;  %v8251_v53 = vpop.xlane.xlu0 %8250  ;;  %v8321_v46 = vsel %vm1582_vm3, %v14137_v57, 0.0 }
 0xcde   : > { %12053 = vpow2.f32 %v8297_v36  ;;  %v8273_v30 = vsub.f32 %v14101_v37, %v8251_v53  ;;  %8322 = vadd.xlane.f32.xlu0 %v8321_v46 }
 0xcdf   : > { %v14145_v34 = vpop.eup %12043  ;;  %v8303_v45 = vmul.f32 1.442695, %v8274_v27 }
 0xce0   : > { %v14147_v8 = vpop.eup %12045  ;;  %v8301_v50 = vmul.f32 1.442695, %v8273_v30  ;;  %v8260_v38 = vpop.xlane.xlu1 %8259  ;;  %v8330_v41 = vsel %vm1582_vm3, %v14145_v34, 0.0 }
 0xce1   : > { %12055 = vpow2.f32 %v8303_v45  ;;  %v8276_v31 = vsub.f32 %v14107_v55, %v8260_v38  ;;  %8331 = vadd.xlane.f32.xlu1 %v8330_v41  ;;  %v8257_v7 = vpop.xlane.xlu0 %8256  ;;  %v8327_v20 = vsel %vm1582_vm3, %v14147_v8, 0.0 }
 0xce2   : > { %12057 = vpow2.f32 %v8301_v50  ;;  %v8275_v37 = vsub.f32 %v14109_v4, %v8257_v7  ;;  %8328 = vadd.xlane.f32.xlu0 %v8327_v20 }
 0xce3   : > { %v14155_v29 = vpop.eup %12047  ;;  %v8307_v5 = vmul.f32 1.442695, %v8276_v31 }
 0xce4   : > { %v14157_v32 = vpop.eup %12049  ;;  %v8305_v18 = vmul.f32 1.442695, %v8275_v37  ;;  %v8336_v35 = vsel %vm1582_vm3, %v14155_v29, 0.0 }
 0xce5   : > { %12059 = vpow2.f32 %v8307_v5  ;;  %8337 = vadd.xlane.f32.xlu1 %v8336_v35  ;;  %v8333_v55 = vsel %vm1582_vm3, %v14157_v32, 0.0 }
 0xce6   : > { %12061 = vpow2.f32 %v8305_v18  ;;  %8334 = vadd.xlane.f32.xlu0 %v8333_v55 }
 0xce7   : > { %v14163_v62 = vpop.eup %12051 }
 0xce8   : > { %v14165_v4 = vpop.eup %12053  ;;  %v8342_v61 = vsel %vm1582_vm3, %v14163_v62, 0.0 }
 0xce9   : > { %8343 = vadd.xlane.f32.xlu1 %v8342_v61  ;;  %v8339_v21 = vsel %vm1582_vm3, %v14165_v4, 0.0 }
 0xcea   : > { %8340 = vadd.xlane.f32.xlu0 %v8339_v21 }
 0xceb   : > { %v14171_v42 = vpop.eup %12055 }
 0xcec   : > { %v14173_v51 = vpop.eup %12057  ;;  %v8348_v25 = vsel %vm1582_vm3, %v14171_v42, 0.0 }
 0xced   : > { %8349 = vadd.xlane.f32.xlu1 %v8348_v25  ;;  %v8345_v16 = vsel %vm1582_vm3, %v14173_v51, 0.0 }
 0xcee   : > { %8346 = vadd.xlane.f32.xlu0 %v8345_v16 }
 0xcef   : > { %v14179_v19 = vpop.eup %12059 }
 0xcf0   : > { %v14181_v17 = vpop.eup %12061  ;;  %v8354_v54 = vsel %vm1582_vm3, %v14179_v19, 0.0 }
 0xcf1   : > { %8355 = vadd.xlane.f32.xlu1 %v8354_v54  ;;  %v8351_v56 = vsel %vm1582_vm3, %v14181_v17, 0.0 }
 0xcf2   : > { %8352 = vadd.xlane.f32.xlu0 %v8351_v56 }
 0xd62   : > { %v8314_v6 = vpop.xlane.xlu1 %8313 }
 0xd63   : > { %12063 = vrcp.f32 %v8314_v6  ;;  %v8311_v13 = vpop.xlane.xlu0 %8310 }
 0xd64   : > { %12065 = vrcp.f32 %v8311_v13  ;;  %v9860_v13 = vld [vmem:[%s14301_s8] ss:$0 sm:$0xff] }
 0xd66   : > { %v8320_v43 = vpop.xlane.xlu1 %8319 }
 0xd67   : > { %12067 = vrcp.f32 %v8320_v43  ;;  %v8317_v12 = vpop.xlane.xlu0 %8316 }
 0xd68   : > { %12069 = vrcp.f32 %v8317_v12 }
 0xd6a   : > { %v8326_v15 = vpop.xlane.xlu1 %8325 }
 0xd6b   : > { %12071 = vrcp.f32 %v8326_v15  ;;  %v8323_v1 = vpop.xlane.xlu0 %8322 }
 0xd6c   : > { %12073 = vrcp.f32 %v8323_v1 }
 0xd6d   : > { %v12064_v33 = vpop.eup %12063 }
 0xd6e   : > { %v12066_v22 = vpop.eup %12065  ;;  %v8332_v26 = vpop.xlane.xlu1 %8331  ;;  %v8360_v24 = vmul.f32 %v12064_v33, %v14115_v2 }
 0xd6f   : > { %12075 = vrcp.f32 %v8332_v26  ;;  %v8329_v60 = vpop.xlane.xlu0 %8328  ;;  %v8358_v47 = vmul.f32 %v12066_v22, %v14117_v14 }
 0xd70   : > { %12077 = vrcp.f32 %v8329_v60 }
 0xd71   : > { %v12068_v0 = vpop.eup %12067  ;;  %11285 = vmatprep.mubr.msk.f32.mxu0 %vm1582_vm3, %v8358_v47 }
 0xd72   : > { %v12070_v28 = vpop.eup %12069  ;;  %v8338_v59 = vpop.xlane.xlu1 %8337  ;;  %11286 = vmatmul.mubr.msk.f32.vlgmr.msra.gmra.mrb[150].mxu0 %vm1582_vm3, %v8360_v24  ;;  %v8364_v36 = vmul.f32 %v12068_v0, %v14125_v48 }
 0xd73   : > { %12079 = vrcp.f32 %v8338_v59  ;;  %11758 = vmatpush3.bf16.msra.mxu0 %v13963_v49  ;;  %v8335_v3 = vpop.xlane.xlu0 %8334  ;;  %v8362_v10 = vmul.f32 %v12070_v28, %v14127_v40 }
 0xd74   : > { %11764 = vmatprep.subr.bf16.mxu0 %v13971_v52  ;;  %12081 = vrcp.f32 %v8335_v3 }
 0xd75   : > { %v12072_v2 = vpop.eup %12071  ;;  %11292 = vmatprep.mubr.msk.f32.mxu1 %vm1582_vm3, %v8362_v10 }
 0xd76   : > { %v12074_v14 = vpop.eup %12073  ;;  %v8344_v58 = vpop.xlane.xlu1 %8343  ;;  %11293 = vmatmul.mubr.msk.f32.vlgmr.msra.gmra.mrb[170].mxu1 %vm1582_vm3, %v8364_v36  ;;  %v8368_v40 = vmul.f32 %v12072_v2, %v14135_v23 }
 0xd77   : > { %12083 = vrcp.f32 %v8344_v58  ;;  %11762 = vmatpush3.bf16.msra.mxu1 %v13967_v9  ;;  %v8341_v63 = vpop.xlane.xlu0 %8340  ;;  %v8366_v49 = vmul.f32 %v12074_v14, %v14137_v57 }
 0xd78   : > { %11768 = vmatprep.subr.bf16.mxu1 %v13975_v39  ;;  %12085 = vrcp.f32 %v8341_v63 }
 0xd79   : > { %v12076_v48 = vpop.eup %12075  ;;  %11299 = vmatprep.mubr.msk.f32.mxu0 %vm1582_vm3, %v8366_v49 }
 0xd7a   : > { %v12078_v27 = vpop.eup %12077  ;;  %v8350_v53 = vpop.xlane.xlu1 %8349  ;;  %11300 = vmatmul.mubr.msk.f32.vlgmr.msra.gmra.mrb[152].mxu0 %vm1582_vm3, %v8368_v40  ;;  %v8372_v57 = vmul.f32 %v12076_v48, %v14145_v34 }
 0xd7b   : > { %12087 = vrcp.f32 %v8350_v53  ;;  %11766 = vmatpush3.bf16.msra.mxu0 %v13971_v52  ;;  %v8347_v46 = vpop.xlane.xlu0 %8346  ;;  %v8370_v9 = vmul.f32 %v12078_v27, %v14147_v8 }
 0xd7c   : > { %11772 = vmatprep.subr.bf16.mxu0 %v14069_v44  ;;  %12089 = vrcp.f32 %v8347_v46 }
 0xd7d   : > { %v12080_v23 = vpop.eup %12079  ;;  %11306 = vmatprep.mubr.msk.f32.mxu1 %vm1582_vm3, %v8370_v9 }
 0xd7e   : > { %v12082_v30 = vpop.eup %12081  ;;  %v8356_v45 = vpop.xlane.xlu1 %8355  ;;  %11307 = vmatmul.mubr.msk.f32.vlgmr.msra.gmra.mrb[172].mxu1 %vm1582_vm3, %v8372_v57  ;;  %v8376_v8 = vmul.f32 %v12080_v23, %v14155_v29 }
 0xd7f   : > { %12091 = vrcp.f32 %v8356_v45  ;;  %11770 = vmatpush3.bf16.msra.mxu1 %v13975_v39  ;;  %v8353_v50 = vpop.xlane.xlu0 %8352  ;;  %v8374_v52 = vmul.f32 %v12082_v30, %v14157_v32 }
 0xd80   : > { %11776 = vmatprep.subr.bf16.mxu1 %v14073_v11  ;;  %12093 = vrcp.f32 %v8353_v50 }
 0xd81   : > { %v12084_v34 = vpop.eup %12083  ;;  %11313 = vmatprep.mubr.msk.f32.mxu0 %vm1582_vm3, %v8374_v52 }
 0xd82   : > { %v12086_v38 = vpop.eup %12085  ;;  %11314 = vmatmul.mubr.msk.f32.vlgmr.msra.gmra.mrb[154].mxu0 %vm1582_vm3, %v8376_v8  ;;  %v8380_v39 = vmul.f32 %v12084_v34, %v14163_v62 }
 0xd83   : > { %11774 = vmatpush3.bf16.msra.mxu0 %v14069_v44  ;;  %v8378_v41 = vmul.f32 %v12086_v38, %v14165_v4 }
 0xd85   : > { %v12088_v31 = vpop.eup %12087  ;;  %11320 = vmatprep.mubr.msk.f32.mxu1 %vm1582_vm3, %v8378_v41 }
 0xd86   : > { %v12090_v7 = vpop.eup %12089  ;;  %11321 = vmatmul.mubr.msk.f32.vlgmr.msra.gmra.mrb[174].mxu1 %vm1582_vm3, %v8380_v39  ;;  %v8384_v37 = vmul.f32 %v12088_v31, %v14171_v42 }
 0xd87   : > { %11778 = vmatpush3.bf16.msra.mxu1 %v14073_v11  ;;  %v8382_v20 = vmul.f32 %v12090_v7, %v14173_v51  ;;  %v9843_v11 = vld [vmem:[%s14300_s7 + $0x18] sm:$0xff] }
 0xd88   : > { %11337 = vmatprep.subr.mxu0 %v9843_v11 }
 0xd89   : > { %v12092_v29 = vpop.eup %12091  ;;  %11327 = vmatprep.mubr.msk.f32.mxu0 %vm1582_vm3, %v8382_v20 }
 0xd8a   : > { %v12094_v44 = vpop.eup %12093  ;;  %11328 = vmatmul.mubr.msk.f32.vlgmr.msra.gmra.mrb[156].mxu0 %vm1582_vm3, %v8384_v37  ;;  %v8388_v32 = vmul.f32 %v12092_v29, %v14179_v19 }
 0xd8b   : > { %v8386_v5 = vmul.f32 %v12094_v44, %v14181_v17  ;;  %11338 = vmatpush3.msra.mxu0 %v9843_v11 }
 0xd8d   : > { %11334 = vmatprep.mubr.msk.f32.mxu1 %vm1582_vm3, %v8386_v5 }
 0xd8e   : > { %11335 = vmatmul.mubr.msk.f32.vlgmr.msra.gmra.mrb[176].mxu1 %vm1582_vm3, %v8388_v32 }
 0xe45   : > { %v11287_v18 = vpop.f32.mrb[150].mxu0 }
 0xe46   : > { %v8461_v35 = vpop.f32.mrb[151].mxu0 }
 0xe47   : > { %11339 = vmatprep.mubr.msk.f32.mxu0 %vm885_vm1, %v8461_v35 }
 0xe48   : > { %11340 = vmatmul.mubr.msk.f32.vlgmr.msra.gmra.mrb[80].mxu0 %vm885_vm1, %v11287_v18 }
 0xe49   : > { %v11294_v55 = vpop.f32.mrb[170].mxu1 }
 0xe4a   : > { %v8542_v62 = vpop.f32.mrb[171].mxu1 }
 0xe4b   : > { %11342 = vmatprep.mubr.msk.f32.mxu0 %vm885_vm1, %v8542_v62 }
 0xe4c   : > { %11343 = vmatmul.mubr.msk.f32.gmra.mrb[82].mxu0 %vm885_vm1, %v11294_v55 }
 0xe4d   : > { %v11301_v4 = vpop.f32.mrb[152].mxu0 }
 0xe4e   : > { %v8623_v61 = vpop.f32.mrb[153].mxu0 }
 0xe4f   : > { %11345 = vmatprep.mubr.msk.f32.mxu0 %vm885_vm1, %v8623_v61 }
 0xe50   : > { %11346 = vmatmul.mubr.msk.f32.gmra.mrb[84].mxu0 %vm885_vm1, %v11301_v4 }
 0xe51   : > { %v11308_v21 = vpop.f32.mrb[172].mxu1 }
 0xe52   : > { %v8704_v42 = vpop.f32.mrb[173].mxu1 }
 0xe53   : > { %11348 = vmatprep.mubr.msk.f32.mxu0 %vm885_vm1, %v8704_v42 }
 0xe54   : > { %11349 = vmatmul.mubr.msk.f32.gmra.mrb[86].mxu0 %vm885_vm1, %v11308_v21 }
 0xe55   : > { %v11315_v51 = vpop.f32.mrb[154].mxu0 }
 0xe56   : > { %v8785_v25 = vpop.f32.mrb[155].mxu0 }
 0xe57   : > { %11351 = vmatprep.mubr.msk.f32.mxu0 %vm885_vm1, %v8785_v25 }
 0xe58   : > { %11352 = vmatmul.mubr.msk.f32.gmra.mrb[88].mxu0 %vm885_vm1, %v11315_v51 }
 0xe59   : > { %v11322_v16 = vpop.f32.mrb[174].mxu1 }
 0xe5a   : > { %v8866_v19 = vpop.f32.mrb[175].mxu1 }
 0xe5b   : > { %11354 = vmatprep.mubr.msk.f32.mxu0 %vm885_vm1, %v8866_v19 }
 0xe5c   : > { %11355 = vmatmul.mubr.msk.f32.gmra.mrb[90].mxu0 %vm885_vm1, %v11322_v16 }
 0xe5d   : > { %v11329_v17 = vpop.f32.mrb[156].mxu0 }
 0xe5e   : > { %v8947_v54 = vpop.f32.mrb[157].mxu0 }
 0xe5f   : > { %11357 = vmatprep.mubr.msk.f32.mxu0 %vm885_vm1, %v8947_v54 }
 0xe60   : > { %11358 = vmatmul.mubr.msk.f32.gmra.mrb[92].mxu0 %vm885_vm1, %v11329_v17 }
 0xe61   : > { %v11336_v56 = vpop.f32.mrb[176].mxu1 }
 0xe62   : > { %v9028_v6 = vpop.f32.mrb[177].mxu1 }
 0xe63   : > { %11360 = vmatprep.mubr.msk.f32.mxu0 %vm885_vm1, %v9028_v6 }
 0xe64   : > { %11361 = vmatmul.mubr.msk.f32.gmra.mrb[94].mxu0 %vm885_vm1, %v11336_v56 }
 0xf1b   : > { %v11341_v43 = vpop.f32.mrb[80].mxu0 }
 0xf1c   : > { %v9256_v12 = vadd.f32 %v11341_v43, %v9860_v13  ;;  %v9153_v15 = vpop.f32.mrb[81].mxu0 }
 0xf1d   : > { %v9255_v1 = vadd.f32 %v9860_v13, %v9153_v15 }
 0xf1e   : > { %9272 = vst.msk [vmem:[%s14256_s26 + $0x8] sm:$0xff] %vm363_vm0, %v9256_v12 }
 0xf1f   : > { %9271 = vst.msk [vmem:[%s14256_s26] sm:$0xff] %vm363_vm0, %v9255_v1  ;;  %v11344_v33 = vpop.f32.mrb[82].mxu0 }
 0xf20   : > { %v9258_v22 = vadd.f32 %v11344_v33, %v9860_v13  ;;  %v9163_v26 = vpop.f32.mrb[83].mxu0 }
 0xf21   : > { %v9257_v60 = vadd.f32 %v9860_v13, %v9163_v26 }
 0xf22   : > { %9274 = vst.msk [vmem:[%s14256_s26 + $0x18] sm:$0xff] %vm363_vm0, %v9258_v22 }
 0xf23   : > { %9273 = vst.msk [vmem:[%s14256_s26 + $0x10] sm:$0xff] %vm363_vm0, %v9257_v60  ;;  %v11347_v47 = vpop.f32.mrb[84].mxu0 }
 0xf24   : > { %v9260_v24 = vadd.f32 %v11347_v47, %v9860_v13  ;;  %v9173_v0 = vpop.f32.mrb[85].mxu0 }
 0xf25   : > { %v9259_v28 = vadd.f32 %v9860_v13, %v9173_v0 }
 0xf26   : > { %9276 = vst.msk [vmem:[%s14256_s26 + $0x28] sm:$0xff] %vm363_vm0, %v9260_v24 }
 0xf27   : > { %9275 = vst.msk [vmem:[%s14256_s26 + $0x20] sm:$0xff] %vm363_vm0, %v9259_v28  ;;  %v11350_v59 = vpop.f32.mrb[86].mxu0 }
 0xf28   : > { %v9262_v3 = vadd.f32 %v11350_v59, %v9860_v13  ;;  %v9183_v10 = vpop.f32.mrb[87].mxu0 }
 0xf29   : > { %v9261_v36 = vadd.f32 %v9860_v13, %v9183_v10 }
 0xf2a   : > { %9278 = vst.msk [vmem:[%s14256_s26 + $0x38] sm:$0xff] %vm363_vm0, %v9262_v3 }
 0xf2b   : > { %9277 = vst.msk [vmem:[%s14256_s26 + $0x30] sm:$0xff] %vm363_vm0, %v9261_v36  ;;  %v11353_v2 = vpop.f32.mrb[88].mxu0 }
 0xf2c   : > { %v9264_v14 = vadd.f32 %v11353_v2, %v9860_v13  ;;  %v9193_v58 = vpop.f32.mrb[89].mxu0 }
 0xf2d   : > { %v9263_v63 = vadd.f32 %v9860_v13, %v9193_v58 }
 0xf2e   : > { %9280 = vst.msk [vmem:[%s14256_s26 + $0x48] sm:$0xff] %vm363_vm0, %v9264_v14 }
 0xf2f   : > { %9279 = vst.msk [vmem:[%s14256_s26 + $0x40] sm:$0xff] %vm363_vm0, %v9263_v63  ;;  %v11356_v49 = vpop.f32.mrb[90].mxu0 }
 0xf30   : > { %v9266_v40 = vadd.f32 %v11356_v49, %v9860_v13  ;;  %v9203_v48 = vpop.f32.mrb[91].mxu0 }
 0xf31   : > { %v9265_v27 = vadd.f32 %v9860_v13, %v9203_v48 }
 0xf32   : > { %9282 = vst.msk [vmem:[%s14256_s26 + $0x58] sm:$0xff] %vm363_vm0, %v9266_v40 }
 0xf33   : > { %9281 = vst.msk [vmem:[%s14256_s26 + $0x50] sm:$0xff] %vm363_vm0, %v9265_v27  ;;  %v11359_v53 = vpop.f32.mrb[92].mxu0 }
 0xf34   : > { %v9268_v46 = vadd.f32 %v11359_v53, %v9860_v13  ;;  %v9213_v9 = vpop.f32.mrb[93].mxu0 }
 0xf35   : > { %v9267_v57 = vadd.f32 %v9860_v13, %v9213_v9 }
 0xf36   : > { %9284 = vst.msk [vmem:[%s14256_s26 + $0x68] sm:$0xff] %vm363_vm0, %v9268_v46 }
 0xf37   : > { %9283 = vst.msk [vmem:[%s14256_s26 + $0x60] sm:$0xff] %vm363_vm0, %v9267_v57  ;;  %v11362_v23 = vpop.f32.mrb[94].mxu0 }
 0xf38   : > { %v9270_v30 = vadd.f32 %v11362_v23, %v9860_v13  ;;  %v9223_v45 = vpop.f32.mrb[95].mxu0 }
 0xf39   : > { %v9269_v50 = vadd.f32 %v9860_v13, %v9223_v45 }
 0xf3a   : > { %9286 = vst.msk [vmem:[%s14256_s26 + $0x78] sm:$0xff] %vm363_vm0, %v9270_v30 }
 0xf3b   : > { %9285 = vst.msk [vmem:[%s14256_s26 + $0x70] sm:$0xff] %vm363_vm0, %v9269_v50 }
 0xf3c PF: > { %s19_s30 = sadd.s32 1, %s12142_s30  }
 0xf3d   : > { %p16_p4 = scmp.ge.s32.totalorder %s19_s30, 6  }
 0xf3f   :  { %18 = sbr.rel (!%p16_p4) target bundleno = 1 (0x1), region = 107 }

</bundles_post_ra>
